<compile_context>
chip_gen: v7x
topology: tpu7x:2x2x1
jax: 0.10.0
libtpu: 0.0.40
codegen_flags: <defaults>
</compile_context>

<pallas_src>
import math

import jax
import jax.numpy as jnp
from jax.experimental import pallas as pl
from jax.experimental.pallas import tpu as pltpu

_NEG = -1e30
_LANE = 128
_SUBLANE = 8
_WDT = jnp.bfloat16          # streamed-weight / kv dtype (f32 accumulate in-kernel)


def _rup(x, m):
    return ((x + m - 1) // m) * m


def _pad_last(a, n):
    p = n - a.shape[-1]
    if p == 0:
        return a
    return jnp.pad(a, [(0, 0)] * (a.ndim - 1) + [(0, p)])


def _pad_axis(a, axis, n):
    p = n - a.shape[axis]
    if p == 0:
        return a
    w = [(0, 0)] * a.ndim
    w[axis] = (0, p)
    return jnp.pad(a, w)


# ------------------------- fused transformer kernel -------------------------


def _make_transformer_kernel(*, BB, Tp, Tkp, R, D, Dp, H, L, has_ctxt,
                             has_cross):
    Dh = D // H
    scale = 1.0 / math.sqrt(Dh)
    inv_d = 1.0 / D
    BT = BB * Tp

    def _ln(v, g_ref, b_ref):
        # v: (rows, Dp) f32; lanes >= D are zero, gamma/beta zero-padded there,
        # so statistics are taken over the true width D only.
        mu = jnp.sum(v, axis=-1, keepdims=True) * inv_d
        var = jnp.sum(v * v, axis=-1, keepdims=True) * inv_d - mu * mu
        var = jnp.maximum(var, 0.0)
        return (v - mu) * jax.lax.rsqrt(var + 1e-5) * g_ref[...] + b_ref[...]

    def _mm(a, w_ref, b_ref):
        # bf16 weight stream, f32 accumulate; biases stay f32.
        return (jnp.dot(a.astype(w_ref.dtype), w_ref[...],
                        preferred_element_type=jnp.float32) + b_ref[...])

    def _attn(q3, k3, v3, bias, hmask_rows):
        # q3: (BB, Tp, Dp), k3/v3: (BB, Tk, Dp), bias: (BB, 1, Tk) additive.
        # Heads stacked along the query-row axis (row r -> head r // Tp) via a
        # lane-ownership mask, so each contraction is ONE batched dot_general.
        Tq = q3.shape[1]
        qs = jnp.concatenate([q3] * H, axis=1) * hmask_rows      # (BB, H*Tq, Dp)
        logits = jnp.einsum("bqd,bkd->bqk", qs, k3,
                            preferred_element_type=jnp.float32) * scale
        logits = logits + bias                                   # key-mask bias
        m = jnp.max(logits, axis=-1, keepdims=True)
        e = jnp.exp(logits - m)
        probs = e * pl.reciprocal(jnp.sum(e, axis=-1, keepdims=True),
                                  approx=True)
        o = jnp.einsum("bqk,bkd->bqd", probs, v3,
                       preferred_element_type=jnp.float32) * hmask_rows
        acc = o[:, 0:Tq, :]
        for hh in range(1, H):                                   # disjoint lanes
            acc = acc + o[:, hh * Tq:(hh + 1) * Tq, :]
        return acc                                               # (BB, Tq, Dp)

    def kernel(*refs):
        it = iter(refs)
        x_ref = next(it)            # (BB, Tp, Xp)   zero rows for registers/pad
        posreg_ref = next(it)       # (Tp, Dp)       [registers ; pos_enc ; 0]
        sbias_ref = next(it)        # (BB, 1, Tp)    self-attn key-mask bias
        hmask_ref = next(it)        # (1, H*Tp, Dp)  head->lane ownership mask
        ctxt_ref = next(it) if has_ctxt else None
        if has_cross:
            kv_ref = next(it)       # (BB, Tkp, Dp)  bf16
            kvbias_ref = next(it)   # (BB, 1, Tkp)
        emb_w = next(it); emb_b = next(it)
        if has_ctxt:
            ctxt_w = next(it); ctxt_b = next(it)
        ln1g = next(it); ln1b = next(it)
        wqkv = next(it); bqkv = next(it)
        wo = next(it); bo = next(it)
        if has_cross:
            ln2g = next(it); ln2b = next(it)
            xwq = next(it); xbq = next(it)
            xwkv = next(it); xbkv = next(it)
            xwo = next(it); xbo = next(it)
        ln3g = next(it); ln3b = next(it)
        w1 = next(it); b1 = next(it)
        w2 = next(it); b2 = next(it)
        fing = next(it); finb = next(it)
        outw = next(it); outb = next(it)
        o_ref = next(it)            # (BB, Tp, Op)
        h_ref = next(it)            # (BB, Tp, Dp)  VMEM-resident hidden state

        layer = pl.program_id(1)
        hmask = hmask_ref[...]

        # ---- embedding phase (layer 0 of each batch chunk) ----
        @pl.when(layer == 0)
        def _embed():
            xe = _mm(x_ref[...].reshape(BT, -1), emb_w, emb_b)   # (BT, Dp)
            xe = xe.reshape(BB, Tp, Dp)
            if has_ctxt:
                c = _mm(ctxt_ref[...].reshape(BB, -1), ctxt_w, ctxt_b)
                xe = xe + c[:, None, :]
            row = jax.lax.broadcasted_iota(jnp.int32, (1, Tp, 1), 1)
            # register rows (< R) keep only their learned embedding.
            h_ref[...] = posreg_ref[...][None] + jnp.where(row >= R, xe, 0.0)

        h = h_ref[...].reshape(BT, Dp)
        sbias = sbias_ref[...]

        # ---- self attention (LN + fused QKV + softmax + out-proj + residual)
        hn = _ln(h, ln1g, ln1b)
        qkv = _mm(hn, wqkv, bqkv)                                # (BT, 3*Dp)
        q = qkv[:, 0 * Dp:1 * Dp].reshape(BB, Tp, Dp)
        k = qkv[:, 1 * Dp:2 * Dp].reshape(BB, Tp, Dp)
        v = qkv[:, 2 * Dp:3 * Dp].reshape(BB, Tp, Dp)
        a = _attn(q, k, v, sbias, hmask)
        h = h + _mm(a.reshape(BT, Dp), wo, bo)

        # ---- cross attention (decoder only) ----
        if has_cross:
            hn = _ln(h, ln2g, ln2b)
            q = _mm(hn, xwq, xbq).reshape(BB, Tp, Dp)
            kvp = _mm(kv_ref[...].reshape(BB * Tkp, Dp), xwkv, xbkv)
            k = kvp[:, 0 * Dp:1 * Dp].reshape(BB, Tkp, Dp)
            v = kvp[:, 1 * Dp:2 * Dp].reshape(BB, Tkp, Dp)
            a = _attn(q, k, v, kvbias_ref[...], hmask)
            h = h + _mm(a.reshape(BT, Dp), xwo, xbo)

        # ---- feed-forward (LN + GELU MLP + residual) ----
        hn = _ln(h, ln3g, ln3b)
        f = _mm(hn, w1, b1)
        f = jax.nn.gelu(f, approximate=True)
        h = h + _mm(f, w2, b2)

        h_ref[...] = h.reshape(BB, Tp, Dp)

        # ---- final LN + output projection (last layer) ----
        @pl.when(layer == L - 1)
        def _final():
            hn2 = _ln(h, fing, finb)
            o_ref[...] = _mm(hn2, outw, outb).reshape(
                BB, Tp, -1).astype(o_ref.dtype)

    return kernel


def transformer_forward(p, x, mask, *, ctxt=None, kv=None, kv_mask=None,
                        batch_block=None):
    """Full pre-LN transformer as ONE pallas_call with grid (batch_chunks, L)."""
    B, S, Din = x.shape
    D = p["dim"]
    R = p["num_registers"]
    H = p["num_heads"]
    assert D % H == 0
    Dh = D // H
    L = int(p["wqkv"].shape[0])
    Xp = int(p["embed_w"].shape[0])
    Dp = int(p["embed_w"].shape[1])
    Op = int(p["out_w"].shape[1])
    T = R + S
    Tp = _rup(T, _SUBLANE)
    has_ctxt = ctxt is not None
    has_cross = kv is not None
    Tkp = int(kv.shape[1]) if has_cross else 0

    # Batch folding: default = whole batch in one block (weights DMA'd once per
    # layer).  On v7x pass batch_block=B//2 so a >=2-wide "parallel" grid axis
    # keeps both TensorCores busy.
    BB = B if batch_block is None else batch_block
    assert B % BB == 0
    n_chunks = B // BB

    # ----- cheap JAX glue (constant-foldable / fused by XLA) -----
    cmask = jnp.concatenate([jnp.ones((B, R), dtype=bool), mask], axis=1)
    cmask_p = _pad_axis(cmask, 1, Tp)                    # pad rows -> masked
    self_bias = jnp.where(cmask_p, 0.0, _NEG).astype(jnp.float32).reshape(
        B, 1, Tp)

    x_pad = jnp.zeros((B, Tp, Xp), jnp.float32)
    x_pad = x_pad.at[:, R:R + S, :Din].set(x.astype(jnp.float32))

    posreg = _pad_axis(
        jnp.concatenate([p["registers"], p["pos_enc"][:S]], axis=0), 0, Tp)

    # head -> lane ownership mask for the row-stacked-head attention.
    r_head = jnp.repeat(jnp.arange(H), Tp)               # (H*Tp,)
    lane = jnp.arange(Dp)
    hmask_rows = ((lane[None, :] >= r_head[:, None] * Dh) &
                  (lane[None, :] < (r_head[:, None] + 1) * Dh)
                  ).astype(jnp.float32).reshape(1, H * Tp, Dp)

    inputs, specs = [], []

    def add(arr, block, imap):
        inputs.append(arr)
        specs.append(pl.BlockSpec(block, imap))

    def add_shared(arr):
        nd = arr.ndim
        add(arr, arr.shape, lambda c, l, n=nd: (0,) * n)

    def add_layer(name):
        arr = p[name]
        add(arr, (None,) + arr.shape[1:], lambda c, l: (l, 0, 0))

    add(x_pad, (BB, Tp, Xp), lambda c, l: (c, 0, 0))
    add(posreg, (Tp, Dp), lambda c, l: (0, 0))
    add(self_bias, (BB, 1, Tp), lambda c, l: (c, 0, 0))
    add(hmask_rows, (1, H * Tp, Dp), lambda c, l: (0, 0, 0))
    if has_ctxt:
        Cp = int(p["ctxt_w"].shape[0])
        ctxt_p = _pad_last(ctxt.astype(jnp.float32), Cp).reshape(B, 1, Cp)
        add(ctxt_p, (BB, 1, Cp), lambda c, l: (c, 0, 0))
    if has_cross:
        assert int(kv.shape[-1]) == Dp
        kv_bias = jnp.where(kv_mask, 0.0, _NEG).astype(jnp.float32).reshape(
            B, 1, Tkp)
        add(kv.astype(_WDT), (BB, Tkp, Dp), lambda c, l: (c, 0, 0))
        add(kv_bias, (BB, 1, Tkp), lambda c, l: (c, 0, 0))

    add_shared(p["embed_w"]); add_shared(p["embed_b"])
    if has_ctxt:
        add_shared(p["ctxt_w"]); add_shared(p["ctxt_b"])
    for name in ("ln1_g", "ln1_b", "wqkv", "bqkv", "wo", "bo"):
        add_layer(name)
    if has_cross:
        for name in ("ln2_g", "ln2_b", "xwq", "xbq", "xwkv", "xbkv",
                     "xwo", "xbo"):
            add_layer(name)
    for name in ("ln3_g", "ln3_b", "w1", "b1", "w2", "b2"):
        add_layer(name)
    add_shared(p["final_g"]); add_shared(p["final_b"])
    add_shared(p["out_w"]); add_shared(p["out_b"])

    kernel = _make_transformer_kernel(
        BB=BB, Tp=Tp, Tkp=Tkp, R=R, D=D, Dp=Dp, H=H, L=L,
        has_ctxt=has_ctxt, has_cross=has_cross)

    out = pl.pallas_call(
        kernel,
        out_shape=jax.ShapeDtypeStruct((B, Tp, Op), jnp.float32),
        grid=(n_chunks, L),
        in_specs=specs,
        out_specs=pl.BlockSpec((BB, Tp, Op), lambda c, l: (c, 0, 0)),
        scratch_shapes=[pltpu.VMEM((BB, Tp, Dp), jnp.float32)],
        compiler_params=pltpu.CompilerParams(
            dimension_semantics=("parallel", "arbitrary")),
    )(*inputs)
    # out: (B, Tp, Op) row/lane padded; cmask_p == combined key mask (pads=False)
    return out, cmask_p


# -------------------- Fourier + time-MLP (plain XLA, tiny) -------------------


def time_embedding(p, t):
    # Fourier(16) -> SiLU MLP; left to XLA (a dedicated kernel is pure launch
    # overhead at this size).
    half = p["w1"].shape[0] // 2
    k = jnp.arange(1, half + 1, dtype=jnp.float32)
    ang = t[:, None].astype(jnp.float32) * k[None, :] * (2.0 * math.pi)
    f = jnp.concatenate([jnp.cos(ang), jnp.sin(ang)], axis=-1)
    h = f @ p["w1"] + p["b1"]
    h = h * jax.nn.sigmoid(h)                                   # SiLU
    return h @ p["w2"] + p["b2"]


# -------------------------- parameter construction --------------------------


def _init_linear(key, din, dout, zero=False):
    if zero:
        return jnp.zeros((din, dout), jnp.float32), jnp.zeros((dout,),
                                                              jnp.float32)
    kw, kb = jax.random.split(key)
    w = jax.random.normal(kw, (din, dout), jnp.float32) / math.sqrt(din)
    b = 0.01 * jax.random.normal(kb, (dout,), jnp.float32)
    return w, b


def _pad_w(w, rp, cp):
    return _pad_axis(_pad_last(w, cp), 0, rp)


def _pad_b(b, cp):
    return _pad_last(b.reshape(1, -1), cp)


def _init_layer(key, D, Dp, Fp, ff_mult, cross):
    ks = jax.random.split(key, 10)
    F = D * ff_mult

    def lin(k, di, do, rp, cp):
        w, b = _init_linear(k, di, do)
        return _pad_w(w, rp, cp), _pad_b(b, cp)

    wq, bq = lin(ks[0], D, D, Dp, Dp)
    wk, bk = lin(ks[1], D, D, Dp, Dp)
    wv, bv = lin(ks[2], D, D, Dp, Dp)
    zeros_d = jnp.zeros((D,), jnp.float32)
    ones_d = jnp.ones((D,), jnp.float32)
    p = {
        "ln1_g": _pad_b(ones_d, Dp), "ln1_b": _pad_b(zeros_d, Dp),
        "ln3_g": _pad_b(ones_d, Dp), "ln3_b": _pad_b(zeros_d, Dp),
        # per-section padding so in-kernel 128-aligned slices pick q/k/v.
        "wqkv": jnp.concatenate([wq, wk, wv], axis=1),      # (Dp, 3*Dp)
        "bqkv": jnp.concatenate([bq, bk, bv], axis=1),      # (1, 3*Dp)
    }
    p["wo"], p["bo"] = lin(ks[3], D, D, Dp, Dp)
    p["w1"], p["b1"] = lin(ks[4], D, F, Dp, Fp)
    p["w2"], p["b2"] = lin(ks[5], F, D, Fp, Dp)
    if cross:
        p["ln2_g"] = _pad_b(ones_d, Dp)
        p["ln2_b"] = _pad_b(zeros_d, Dp)
        p["xwq"], p["xbq"] = lin(ks[6], D, D, Dp, Dp)
        xk, xbk = lin(ks[7], D, D, Dp, Dp)
        xv, xbv = lin(ks[8], D, D, Dp, Dp)
        p["xwkv"] = jnp.concatenate([xk, xv], axis=1)       # (Dp, 2*Dp)
        p["xbkv"] = jnp.concatenate([xbk, xbv], axis=1)
        p["xwo"], p["xbo"] = lin(ks[9], D, D, Dp, Dp)
    return p


def init_transformer(key, *, inpt_dim, dim, outp_dim, num_heads, num_layers,
                     num_registers, max_seq_len, ctxt_dim=0, use_decoder=False,
                     zero_out=False, ff_mult=2):
    Dp = _rup(dim, _LANE)
    Fp = _rup(dim * ff_mult, _LANE)
    Xp = _rup(inpt_dim, _LANE)
    Op = _rup(outp_dim, _LANE)
    keys = jax.random.split(key, num_layers + 5)
    p = {"dim": dim, "outp_dim": outp_dim, "num_heads": num_heads,
         "num_registers": num_registers}
    ew, eb = _init_linear(keys[0], inpt_dim, dim)
    p["embed_w"], p["embed_b"] = _pad_w(ew, Xp, Dp), _pad_b(eb, Dp)
    p["pos_enc"] = _pad_last(
        0.02 * jax.random.normal(keys[1], (max_seq_len, dim), jnp.float32), Dp)
    p["registers"] = _pad_last(
        0.02 * jax.random.normal(keys[2], (num_registers, dim), jnp.float32),
        Dp)
    if ctxt_dim:
        Cp = _rup(ctxt_dim, _LANE)
        cw, cb = _init_linear(keys[3], ctxt_dim, dim)
        p["ctxt_w"], p["ctxt_b"] = _pad_w(cw, Cp, Dp), _pad_b(cb, Dp)
    layer_ps = [_init_layer(keys[5 + i], dim, Dp, Fp, ff_mult, use_decoder)
                for i in range(num_layers)]
    for name in layer_ps[0]:
        p[name] = jnp.stack([lp[name] for lp in layer_ps], axis=0)
    p["final_g"] = _pad_b(jnp.ones((dim,), jnp.float32), Dp)
    p["final_b"] = _pad_b(jnp.zeros((dim,), jnp.float32), Dp)
    # SSFM.__init__ zeroes decoder.linear_out weight & bias.
    ow, ob = _init_linear(keys[4], dim, outp_dim, zero=zero_out)
    p["out_w"], p["out_b"] = _pad_w(ow, Dp, Op), _pad_b(ob, Op)
    # stream the big weight matrices as bf16 (f32 accumulate in-kernel).
    for name in ("embed_w", "ctxt_w", "wqkv", "wo", "w1", "w2",
                 "xwq", "xwkv", "xwo", "out_w"):
        if name in p:
            p[name] = p[name].astype(_WDT)
    return p


def init_ssfm(key, *, inpt_dim, max_seq_len, dim=32, num_heads=4, enc_layers=2,
              dec_layers=2, num_registers=2, ctxt_dim=16, fourier_dim=16,
              time_hidden=32):
    k_enc, k_dec, k_t1, k_t2 = jax.random.split(key, 4)
    decoder = init_transformer(
        k_dec, inpt_dim=inpt_dim, dim=dim, outp_dim=2 * inpt_dim,
        num_heads=num_heads, num_layers=dec_layers,
        num_registers=num_registers, max_seq_len=max_seq_len,
        ctxt_dim=ctxt_dim, use_decoder=True, zero_out=True)
    encoder = init_transformer(
        k_enc, inpt_dim=inpt_dim, dim=dim, outp_dim=dim,  # enc outp = dec.dim
        num_heads=num_heads, num_layers=enc_layers,
        num_registers=num_registers, max_seq_len=max_seq_len)
    tw1, tb1 = _init_linear(k_t1, fourier_dim, time_hidden)
    tw2, tb2 = _init_linear(k_t2, time_hidden, ctxt_dim)
    return {
        "encoder": encoder,
        "decoder": decoder,
        "time_mlp": {"w1": tw1, "b1": tb1.reshape(1, -1),
                     "w2": tw2, "b2": tb2.reshape(1, -1)},
    }


# ------------------------------ model forward --------------------------------


def ssfm_forward(params, xt, t, *, x0, xt_mask, x0_mask, return_logvar=False):
    """Velocity prediction; mirrors SSFM.forward (reuse_cache=False path)."""
    # encoder_cache = (encoder(x0, mask), get_combined_mask(mask))
    enc_out, enc_cmask = transformer_forward(params["encoder"], x0, x0_mask)
    ctxt = time_embedding(params["time_mlp"], t)
    dec_out, _ = transformer_forward(
        params["decoder"], xt, xt_mask, ctxt=ctxt, kv=enc_out,
        kv_mask=enc_cmask)
    R = params["decoder"]["num_registers"]
    S = xt.shape[1]
    dout = params["decoder"]["outp_dim"]                 # = 2 * inpt_dim
    v_hat = dec_out[:, R:R + S, :dout]                   # strip registers + pads
    v_mean, v_logvar = jnp.split(v_hat, 2, axis=-1)      # chunk(2, dim=-1)
    if return_logvar:
        return v_mean, v_logvar
    # v_mean[x0_mask] = 0  (boolean-index assignment -> masked select)
    return jnp.where(x0_mask[..., None], 0.0, v_mean)


# ---------------------------------- main -------------------------------------


if __name__ == "__main__":
    key = jax.random.PRNGKey(0)
    B, S, D = 2, 8, 4  # batch, max_seq_len, inpt_dim
    k_p, k_x0, k_x1, k_t, k_m = jax.random.split(key, 5)

    params = init_ssfm(k_p, inpt_dim=D, max_seq_len=S)

    x0 = jax.random.normal(k_x0, (B, S, D), jnp.float32)
    x1 = jax.random.normal(k_x1, (B, S, D), jnp.float32)
    t = jax.nn.sigmoid(jax.random.normal(k_t, (B,), jnp.float32))
    x0_mask = jax.random.uniform(k_m, (B, S)) > 0.35
    x0_mask = x0_mask.at[:, 0].set(False)  # guarantee at least one False / row
    xt_mask = ~x0_mask
    xt = x0 + (x1 - x0) * t[:, None, None]

    fwd = jax.jit(lambda xt_, t_, x0_, xtm_, x0m_: ssfm_forward(
        params, xt_, t_, x0=x0_, xt_mask=xtm_, x0_mask=x0m_))

    v_mean = jax.block_until_ready(fwd(xt, t, x0, xt_mask, x0_mask))

    assert v_mean.shape == (B, S, D), v_mean.shape
    assert v_mean.dtype == jnp.float32
    assert bool(jnp.all(jnp.isfinite(v_mean)))
    print("KERNEL_OK")
</pallas_src>

<mosaic_0001>
module attributes {stable_mosaic.version = 11 : i64} {
  func.func @kernel(%arg0: i32, %arg1: i32, %arg2: memref<2x16x128xf32, #tpu.memory_space<vmem>>, %arg3: memref<16x128xf32, #tpu.memory_space<vmem>>, %arg4: memref<2x1x16xf32, #tpu.memory_space<vmem>>, %arg5: memref<1x64x128xf32, #tpu.memory_space<vmem>>, %arg6: memref<128x128xbf16, #tpu.memory_space<vmem>>, %arg7: memref<1x128xf32, #tpu.memory_space<vmem>>, %arg8: memref<1x1x128xf32, #tpu.memory_space<vmem>>, %arg9: memref<1x1x128xf32, #tpu.memory_space<vmem>>, %arg10: memref<1x128x384xbf16, #tpu.memory_space<vmem>>, %arg11: memref<1x1x384xf32, #tpu.memory_space<vmem>>, %arg12: memref<1x128x128xbf16, #tpu.memory_space<vmem>>, %arg13: memref<1x1x128xf32, #tpu.memory_space<vmem>>, %arg14: memref<1x1x128xf32, #tpu.memory_space<vmem>>, %arg15: memref<1x1x128xf32, #tpu.memory_space<vmem>>, %arg16: memref<1x128x128xbf16, #tpu.memory_space<vmem>>, %arg17: memref<1x1x128xf32, #tpu.memory_space<vmem>>, %arg18: memref<1x128x128xbf16, #tpu.memory_space<vmem>>, %arg19: memref<1x1x128xf32, #tpu.memory_space<vmem>>, %arg20: memref<1x128xf32, #tpu.memory_space<vmem>>, %arg21: memref<1x128xf32, #tpu.memory_space<vmem>>, %arg22: memref<128x128xbf16, #tpu.memory_space<vmem>>, %arg23: memref<1x128xf32, #tpu.memory_space<vmem>>, %arg24: memref<2x16x128xf32, #tpu.memory_space<vmem>>, %arg25: memref<2x16x128xf32, #tpu.memory_space<vmem>>) attributes {dimension_semantics = [#tpu.dimension_semantics<parallel>, #tpu.dimension_semantics<arbitrary>], iteration_bounds = array<i64: 1, 2>, scalar_prefetch = 0 : i64, scratch_operands = 1 : i64, tpu.core_type = #tpu.core_type<tc>, window_params = [{transform_indices = @transform_0, window_bounds = array<i64: 2, 16, 128>}, {pipeline_mode = #tpu.pipeline_mode<synchronous>, transform_indices = @transform_1, window_bounds = array<i64: 16, 128>}, {transform_indices = @transform_2, window_bounds = array<i64: 2, 1, 16>}, {pipeline_mode = #tpu.pipeline_mode<synchronous>, transform_indices = @transform_3, window_bounds = array<i64: 1, 64, 128>}, {pipeline_mode = #tpu.pipeline_mode<synchronous>, transform_indices = @transform_4, window_bounds = array<i64: 128, 128>}, {pipeline_mode = #tpu.pipeline_mode<synchronous>, transform_indices = @transform_5, window_bounds = array<i64: 1, 128>}, {transform_indices = @transform_6, window_bounds = array<i64: 1, 1, 128>}, {transform_indices = @transform_7, window_bounds = array<i64: 1, 1, 128>}, {transform_indices = @transform_8, window_bounds = array<i64: 1, 128, 384>}, {transform_indices = @transform_9, window_bounds = array<i64: 1, 1, 384>}, {transform_indices = @transform_10, window_bounds = array<i64: 1, 128, 128>}, {transform_indices = @transform_11, window_bounds = array<i64: 1, 1, 128>}, {transform_indices = @transform_12, window_bounds = array<i64: 1, 1, 128>}, {transform_indices = @transform_13, window_bounds = array<i64: 1, 1, 128>}, {transform_indices = @transform_14, window_bounds = array<i64: 1, 128, 128>}, {transform_indices = @transform_15, window_bounds = array<i64: 1, 1, 128>}, {transform_indices = @transform_16, window_bounds = array<i64: 1, 128, 128>}, {transform_indices = @transform_17, window_bounds = array<i64: 1, 1, 128>}, {pipeline_mode = #tpu.pipeline_mode<synchronous>, transform_indices = @transform_18, window_bounds = array<i64: 1, 128>}, {pipeline_mode = #tpu.pipeline_mode<synchronous>, transform_indices = @transform_19, window_bounds = array<i64: 1, 128>}, {pipeline_mode = #tpu.pipeline_mode<synchronous>, transform_indices = @transform_20, window_bounds = array<i64: 128, 128>}, {pipeline_mode = #tpu.pipeline_mode<synchronous>, transform_indices = @transform_21, window_bounds = array<i64: 1, 128>}, {transform_indices = @transform_22, window_bounds = array<i64: 2, 16, 128>}]} {
    %c0 = arith.constant 0 : index
    %c0_0 = arith.constant 0 : index
    %c0_1 = arith.constant 0 : index
    %0 = vector.load %arg5[%c0, %c0_0, %c0_1] : memref<1x64x128xf32, #tpu.memory_space<vmem>>, vector<1x64x128xf32>
    %c0_i32 = arith.constant 0 : i32
    %1 = arith.cmpi eq, %arg1, %c0_i32 : i32
    %2 = arith.extui %1 : i1 to i32
    %c0_i32_2 = arith.constant 0 : i32
    %3 = arith.cmpi ne, %2, %c0_i32_2 : i32
    scf.if %3 {
      %c0_73 = arith.constant 0 : index
      %c0_74 = arith.constant 0 : index
      %c0_75 = arith.constant 0 : index
      %150 = vector.load %arg2[%c0_73, %c0_74, %c0_75] : memref<2x16x128xf32, #tpu.memory_space<vmem>>, vector<2x16x128xf32>
      %151 = vector.shape_cast %150 : vector<2x16x128xf32> to vector<32x128xf32>
      %152 = arith.truncf %151 : vector<32x128xf32> to vector<32x128xbf16>
      %c0_76 = arith.constant 0 : index
      %c0_77 = arith.constant 0 : index
      %153 = vector.load %arg6[%c0_76, %c0_77] : memref<128x128xbf16, #tpu.memory_space<vmem>>, vector<128x128xbf16>
      %cst_78 = arith.constant dense<0.000000e+00> : vector<32x128xf32>
      %154 = tpu.matmul %152, %153, %cst_78 {dimension_numbers = #tpu.dot_dimension_numbers<[1], [0], [0], [1], [0, 0, 1, 1], [], []>} : vector<32x128xbf16>, vector<128x128xbf16>, vector<32x128xf32> -> vector<32x128xf32>
      %c0_79 = arith.constant 0 : index
      %c0_80 = arith.constant 0 : index
      %155 = vector.load %arg7[%c0_79, %c0_80] : memref<1x128xf32, #tpu.memory_space<vmem>>, vector<1x128xf32>
      %156 = vector.broadcast %155 : vector<1x128xf32> to vector<32x128xf32>
      %157 = arith.addf %154, %156 : vector<32x128xf32>
      %158 = vector.shape_cast %157 : vector<32x128xf32> to vector<2x16x128xf32>
      %159 = tpu.iota {dimensions = array<i32: 1>} : vector<1x16x1xi32>
      %c0_81 = arith.constant 0 : index
      %c0_82 = arith.constant 0 : index
      %160 = vector.load %arg3[%c0_81, %c0_82] : memref<16x128xf32, #tpu.memory_space<vmem>>, vector<16x128xf32>
      %161 = vector.shape_cast %160 : vector<16x128xf32> to vector<1x16x128xf32>
      %c2_i32 = arith.constant 2 : i32
      %162 = vector.broadcast %c2_i32 : i32 to vector<1x16x1xi32>
      %163 = arith.cmpi sge, %159, %162 : vector<1x16x1xi32>
      %cst_83 = arith.constant 0.000000e+00 : f32
      %164 = vector.shape_cast %163 : vector<1x16x1xi1> to vector<1x16x1xi1>
      %165 = vector.broadcast %164 : vector<1x16x1xi1> to vector<2x16x128xi1>
      %166 = vector.broadcast %cst_83 : f32 to vector<2x16x128xf32>
      %167 = arith.select %165, %158, %166 : vector<2x16x128xi1>, vector<2x16x128xf32>
      %168 = vector.broadcast %161 : vector<1x16x128xf32> to vector<2x16x128xf32>
      %169 = arith.addf %168, %167 : vector<2x16x128xf32>
      %c0_84 = arith.constant 0 : index
      %c0_85 = arith.constant 0 : index
      %c0_86 = arith.constant 0 : index
      %170 = vector.load %arg25[%c0_84, %c0_85, %c0_86] : memref<2x16x128xf32, #tpu.memory_space<vmem>>, vector<2x16x128xf32>
      tpu.vector_store %arg25[%c0_84, %c0_85, %c0_86], %169 {strides = array<i32>} : memref<2x16x128xf32, #tpu.memory_space<vmem>>, vector<2x16x128xf32>,
    } else {
    }
    %c0_3 = arith.constant 0 : index
    %c0_4 = arith.constant 0 : index
    %c0_5 = arith.constant 0 : index
    %4 = vector.load %arg25[%c0_3, %c0_4, %c0_5] : memref<2x16x128xf32, #tpu.memory_space<vmem>>, vector<2x16x128xf32>
    %5 = vector.shape_cast %4 : vector<2x16x128xf32> to vector<32x128xf32>
    %c0_6 = arith.constant 0 : index
    %c0_7 = arith.constant 0 : index
    %c0_8 = arith.constant 0 : index
    %6 = vector.load %arg4[%c0_6, %c0_7, %c0_8] : memref<2x1x16xf32, #tpu.memory_space<vmem>>, vector<2x1x16xf32>
    %cst = arith.constant dense<0.000000e+00> : vector<32xf32>
    %7 = vector.multi_reduction <add>, %5, %cst [1] : vector<32x128xf32> to vector<32xf32>
    %8 = vector.shape_cast %7 : vector<32xf32> to vector<32x1xf32>
    %cst_9 = arith.constant 3.125000e-02 : f32
    %9 = vector.broadcast %cst_9 : f32 to vector<32x1xf32>
    %10 = arith.mulf %8, %9 : vector<32x1xf32>
    %11 = arith.mulf %5, %5 : vector<32x128xf32>
    %cst_10 = arith.constant dense<0.000000e+00> : vector<32xf32>
    %12 = vector.multi_reduction <add>, %11, %cst_10 [1] : vector<32x128xf32> to vector<32xf32>
    %13 = vector.shape_cast %12 : vector<32xf32> to vector<32x1xf32>
    %cst_11 = arith.constant 3.125000e-02 : f32
    %14 = vector.broadcast %cst_11 : f32 to vector<32x1xf32>
    %15 = arith.mulf %13, %14 : vector<32x1xf32>
    %16 = arith.mulf %10, %10 : vector<32x1xf32>
    %17 = arith.subf %15, %16 : vector<32x1xf32>
    %cst_12 = arith.constant 0.000000e+00 : f32
    %18 = vector.broadcast %cst_12 : f32 to vector<32x1xf32>
    %19 = arith.maximumf %17, %18 : vector<32x1xf32>
    %20 = vector.broadcast %10 : vector<32x1xf32> to vector<32x128xf32>
    %21 = arith.subf %5, %20 : vector<32x128xf32>
    %cst_13 = arith.constant 9.99999974E-6 : f32
    %22 = vector.broadcast %cst_13 : f32 to vector<32x1xf32>
    %23 = arith.addf %19, %22 : vector<32x1xf32>
    %24 = math.rsqrt %23 : vector<32x1xf32>
    %25 = vector.broadcast %24 : vector<32x1xf32> to vector<32x128xf32>
    %26 = arith.mulf %21, %25 : vector<32x128xf32>
    %c0_14 = arith.constant 0 : index
    %c0_15 = arith.constant 0 : index
    %c0_16 = arith.constant 0 : index
    %27 = vector.load %arg8[%c0_14, %c0_15, %c0_16] : memref<1x1x128xf32, #tpu.memory_space<vmem>>, vector<1x1x128xf32>
    %28 = vector.shape_cast %27 : vector<1x1x128xf32> to vector<1x128xf32>
    %29 = vector.broadcast %28 : vector<1x128xf32> to vector<32x128xf32>
    %30 = arith.mulf %26, %29 : vector<32x128xf32>
    %c0_17 = arith.constant 0 : index
    %c0_18 = arith.constant 0 : index
    %c0_19 = arith.constant 0 : index
    %31 = vector.load %arg9[%c0_17, %c0_18, %c0_19] : memref<1x1x128xf32, #tpu.memory_space<vmem>>, vector<1x1x128xf32>
    %32 = vector.shape_cast %31 : vector<1x1x128xf32> to vector<1x128xf32>
    %33 = vector.broadcast %32 : vector<1x128xf32> to vector<32x128xf32>
    %34 = arith.addf %30, %33 : vector<32x128xf32>
    %35 = arith.truncf %34 : vector<32x128xf32> to vector<32x128xbf16>
    %c0_20 = arith.constant 0 : index
    %c0_21 = arith.constant 0 : index
    %c0_22 = arith.constant 0 : index
    %36 = vector.load %arg10[%c0_20, %c0_21, %c0_22] : memref<1x128x384xbf16, #tpu.memory_space<vmem>>, vector<1x128x384xbf16>
    %37 = vector.shape_cast %36 : vector<1x128x384xbf16> to vector<128x384xbf16>
    %cst_23 = arith.constant dense<0.000000e+00> : vector<32x384xf32>
    %38 = tpu.matmul %35, %37, %cst_23 {dimension_numbers = #tpu.dot_dimension_numbers<[1], [0], [0], [1], [0, 0, 1, 1], [], []>} : vector<32x128xbf16>, vector<128x384xbf16>, vector<32x384xf32> -> vector<32x384xf32>
    %c0_24 = arith.constant 0 : index
    %c0_25 = arith.constant 0 : index
    %c0_26 = arith.constant 0 : index
    %39 = vector.load %arg11[%c0_24, %c0_25, %c0_26] : memref<1x1x384xf32, #tpu.memory_space<vmem>>, vector<1x1x384xf32>
    %40 = vector.shape_cast %39 : vector<1x1x384xf32> to vector<1x384xf32>
    %41 = vector.broadcast %40 : vector<1x384xf32> to vector<32x384xf32>
    %42 = arith.addf %38, %41 : vector<32x384xf32>
    %43 = vector.extract_strided_slice %42 {offsets = [0, 0], sizes = [32, 128], strides = [1, 1]} : vector<32x384xf32> to vector<32x128xf32>
    %44 = vector.shape_cast %43 : vector<32x128xf32> to vector<2x16x128xf32>
    %45 = vector.extract_strided_slice %42 {offsets = [0, 128], sizes = [32, 128], strides = [1, 1]} : vector<32x384xf32> to vector<32x128xf32>
    %46 = vector.shape_cast %45 : vector<32x128xf32> to vector<2x16x128xf32>
    %47 = vector.extract_strided_slice %42 {offsets = [0, 256], sizes = [32, 128], strides = [1, 1]} : vector<32x384xf32> to vector<32x128xf32>
    %48 = vector.shape_cast %47 : vector<32x128xf32> to vector<2x16x128xf32>
    %49 = tpu.concatenate %44, %44, %44, %44 in 1 : vector<2x16x128xf32>, vector<2x16x128xf32>, vector<2x16x128xf32>, vector<2x16x128xf32> -> vector<2x64x128xf32>
    %50 = vector.broadcast %0 : vector<1x64x128xf32> to vector<2x64x128xf32>
    %51 = arith.mulf %49, %50 : vector<2x64x128xf32>
    "tpu.trace_start"() <{level = 10 : i32, message = "bqd,bkd->bqk"}> : () -> ()
    %cst_27 = arith.constant dense<0.000000e+00> : vector<2x64x16xf32>
    %52 = tpu.matmul %51, %46, %cst_27 {dimension_numbers = #tpu.dot_dimension_numbers<[2], [2], [1], [1], [0, 0, 0, 1, 1, 1], [0], [0]>} : vector<2x64x128xf32>, vector<2x16x128xf32>, vector<2x64x16xf32> -> vector<2x64x16xf32>
    "tpu.trace_stop"() : () -> ()
    %cst_28 = arith.constant 0.353553385 : f32
    %53 = vector.broadcast %cst_28 : f32 to vector<2x64x16xf32>
    %54 = arith.mulf %52, %53 : vector<2x64x16xf32>
    %55 = vector.broadcast %6 : vector<2x1x16xf32> to vector<2x64x16xf32>
    %56 = arith.addf %54, %55 : vector<2x64x16xf32>
    %cst_29 = arith.constant dense<0xFF800000> : vector<2x64xf32>
    %57 = vector.multi_reduction <maximumf>, %56, %cst_29 [2] : vector<2x64x16xf32> to vector<2x64xf32>
    %58 = vector.shape_cast %57 : vector<2x64xf32> to vector<2x64x1xf32>
    %59 = vector.broadcast %58 : vector<2x64x1xf32> to vector<2x64x16xf32>
    %60 = arith.subf %56, %59 : vector<2x64x16xf32>
    %61 = math.exp %60 : vector<2x64x16xf32>
    %cst_30 = arith.constant dense<0.000000e+00> : vector<2x64xf32>
    %62 = vector.multi_reduction <add>, %61, %cst_30 [2] : vector<2x64x16xf32> to vector<2x64xf32>
    %63 = vector.shape_cast %62 : vector<2x64xf32> to vector<2x64x1xf32>
    %64 = tpu.reciprocal %63 {approx = true} : vector<2x64x1xf32> -> vector<2x64x1xf32>
    %65 = vector.broadcast %64 : vector<2x64x1xf32> to vector<2x64x16xf32>
    %66 = arith.mulf %61, %65 : vector<2x64x16xf32>
    "tpu.trace_start"() <{level = 10 : i32, message = "bqk,bkd->bqd"}> : () -> ()
    %cst_31 = arith.constant dense<0.000000e+00> : vector<2x64x128xf32>
    %67 = tpu.matmul %66, %48, %cst_31 {dimension_numbers = #tpu.dot_dimension_numbers<[2], [1], [1], [2], [0, 0, 0, 1, 1, 2], [0], [0]>} : vector<2x64x16xf32>, vector<2x16x128xf32>, vector<2x64x128xf32> -> vector<2x64x128xf32>
    "tpu.trace_stop"() : () -> ()
    %68 = vector.broadcast %0 : vector<1x64x128xf32> to vector<2x64x128xf32>
    %69 = arith.mulf %67, %68 : vector<2x64x128xf32>
    %70 = vector.extract_strided_slice %69 {offsets = [0, 0, 0], sizes = [2, 16, 128], strides = [1, 1, 1]} : vector<2x64x128xf32> to vector<2x16x128xf32>
    %71 = vector.extract_strided_slice %69 {offsets = [0, 16, 0], sizes = [2, 16, 128], strides = [1, 1, 1]} : vector<2x64x128xf32> to vector<2x16x128xf32>
    %72 = arith.addf %70, %71 : vector<2x16x128xf32>
    %73 = vector.extract_strided_slice %69 {offsets = [0, 32, 0], sizes = [2, 16, 128], strides = [1, 1, 1]} : vector<2x64x128xf32> to vector<2x16x128xf32>
    %74 = arith.addf %72, %73 : vector<2x16x128xf32>
    %75 = vector.extract_strided_slice %69 {offsets = [0, 48, 0], sizes = [2, 16, 128], strides = [1, 1, 1]} : vector<2x64x128xf32> to vector<2x16x128xf32>
    %76 = arith.addf %74, %75 : vector<2x16x128xf32>
    %77 = vector.shape_cast %76 : vector<2x16x128xf32> to vector<32x128xf32>
    %78 = arith.truncf %77 : vector<32x128xf32> to vector<32x128xbf16>
    %c0_32 = arith.constant 0 : index
    %c0_33 = arith.constant 0 : index
    %c0_34 = arith.constant 0 : index
    %79 = vector.load %arg12[%c0_32, %c0_33, %c0_34] : memref<1x128x128xbf16, #tpu.memory_space<vmem>>, vector<1x128x128xbf16>
    %80 = vector.shape_cast %79 : vector<1x128x128xbf16> to vector<128x128xbf16>
    %cst_35 = arith.constant dense<0.000000e+00> : vector<32x128xf32>
    %81 = tpu.matmul %78, %80, %cst_35 {dimension_numbers = #tpu.dot_dimension_numbers<[1], [0], [0], [1], [0, 0, 1, 1], [], []>} : vector<32x128xbf16>, vector<128x128xbf16>, vector<32x128xf32> -> vector<32x128xf32>
    %c0_36 = arith.constant 0 : index
    %c0_37 = arith.constant 0 : index
    %c0_38 = arith.constant 0 : index
    %82 = vector.load %arg13[%c0_36, %c0_37, %c0_38] : memref<1x1x128xf32, #tpu.memory_space<vmem>>, vector<1x1x128xf32>
    %83 = vector.shape_cast %82 : vector<1x1x128xf32> to vector<1x128xf32>
    %84 = vector.broadcast %83 : vector<1x128xf32> to vector<32x128xf32>
    %85 = arith.addf %81, %84 : vector<32x128xf32>
    %86 = arith.addf %5, %85 : vector<32x128xf32>
    %cst_39 = arith.constant dense<0.000000e+00> : vector<32xf32>
    %87 = vector.multi_reduction <add>, %86, %cst_39 [1] : vector<32x128xf32> to vector<32xf32>
    %88 = vector.shape_cast %87 : vector<32xf32> to vector<32x1xf32>
    %cst_40 = arith.constant 3.125000e-02 : f32
    %89 = vector.broadcast %cst_40 : f32 to vector<32x1xf32>
    %90 = arith.mulf %88, %89 : vector<32x1xf32>
    %91 = arith.mulf %86, %86 : vector<32x128xf32>
    %cst_41 = arith.constant dense<0.000000e+00> : vector<32xf32>
    %92 = vector.multi_reduction <add>, %91, %cst_41 [1] : vector<32x128xf32> to vector<32xf32>
    %93 = vector.shape_cast %92 : vector<32xf32> to vector<32x1xf32>
    %cst_42 = arith.constant 3.125000e-02 : f32
    %94 = vector.broadcast %cst_42 : f32 to vector<32x1xf32>
    %95 = arith.mulf %93, %94 : vector<32x1xf32>
    %96 = arith.mulf %90, %90 : vector<32x1xf32>
    %97 = arith.subf %95, %96 : vector<32x1xf32>
    %cst_43 = arith.constant 0.000000e+00 : f32
    %98 = vector.broadcast %cst_43 : f32 to vector<32x1xf32>
    %99 = arith.maximumf %97, %98 : vector<32x1xf32>
    %100 = vector.broadcast %90 : vector<32x1xf32> to vector<32x128xf32>
    %101 = arith.subf %86, %100 : vector<32x128xf32>
    %cst_44 = arith.constant 9.99999974E-6 : f32
    %102 = vector.broadcast %cst_44 : f32 to vector<32x1xf32>
    %103 = arith.addf %99, %102 : vector<32x1xf32>
    %104 = math.rsqrt %103 : vector<32x1xf32>
    %105 = vector.broadcast %104 : vector<32x1xf32> to vector<32x128xf32>
    %106 = arith.mulf %101, %105 : vector<32x128xf32>
    %c0_45 = arith.constant 0 : index
    %c0_46 = arith.constant 0 : index
    %c0_47 = arith.constant 0 : index
    %107 = vector.load %arg14[%c0_45, %c0_46, %c0_47] : memref<1x1x128xf32, #tpu.memory_space<vmem>>, vector<1x1x128xf32>
    %108 = vector.shape_cast %107 : vector<1x1x128xf32> to vector<1x128xf32>
    %109 = vector.broadcast %108 : vector<1x128xf32> to vector<32x128xf32>
    %110 = arith.mulf %106, %109 : vector<32x128xf32>
    %c0_48 = arith.constant 0 : index
    %c0_49 = arith.constant 0 : index
    %c0_50 = arith.constant 0 : index
    %111 = vector.load %arg15[%c0_48, %c0_49, %c0_50] : memref<1x1x128xf32, #tpu.memory_space<vmem>>, vector<1x1x128xf32>
    %112 = vector.shape_cast %111 : vector<1x1x128xf32> to vector<1x128xf32>
    %113 = vector.broadcast %112 : vector<1x128xf32> to vector<32x128xf32>
    %114 = arith.addf %110, %113 : vector<32x128xf32>
    %115 = arith.truncf %114 : vector<32x128xf32> to vector<32x128xbf16>
    %c0_51 = arith.constant 0 : index
    %c0_52 = arith.constant 0 : index
    %c0_53 = arith.constant 0 : index
    %116 = vector.load %arg16[%c0_51, %c0_52, %c0_53] : memref<1x128x128xbf16, #tpu.memory_space<vmem>>, vector<1x128x128xbf16>
    %117 = vector.shape_cast %116 : vector<1x128x128xbf16> to vector<128x128xbf16>
    %cst_54 = arith.constant dense<0.000000e+00> : vector<32x128xf32>
    %118 = tpu.matmul %115, %117, %cst_54 {dimension_numbers = #tpu.dot_dimension_numbers<[1], [0], [0], [1], [0, 0, 1, 1], [], []>} : vector<32x128xbf16>, vector<128x128xbf16>, vector<32x128xf32> -> vector<32x128xf32>
    %c0_55 = arith.constant 0 : index
    %c0_56 = arith.constant 0 : index
    %c0_57 = arith.constant 0 : index
    %119 = vector.load %arg17[%c0_55, %c0_56, %c0_57] : memref<1x1x128xf32, #tpu.memory_space<vmem>>, vector<1x1x128xf32>
    %120 = vector.shape_cast %119 : vector<1x1x128xf32> to vector<1x128xf32>
    %121 = vector.broadcast %120 : vector<1x128xf32> to vector<32x128xf32>
    %122 = arith.addf %118, %121 : vector<32x128xf32>
    %123 = arith.mulf %122, %122 : vector<32x128xf32>
    %124 = arith.mulf %122, %123 : vector<32x128xf32>
    %cst_58 = arith.constant 4.471500e-02 : f32
    %125 = vector.broadcast %cst_58 : f32 to vector<32x128xf32>
    %126 = arith.mulf %125, %124 : vector<32x128xf32>
    %127 = arith.addf %122, %126 : vector<32x128xf32>
    %cst_59 = arith.constant 0.797884583 : f32
    %128 = vector.broadcast %cst_59 : f32 to vector<32x128xf32>
    %129 = arith.mulf %128, %127 : vector<32x128xf32>
    %130 = math.tanh %129 : vector<32x128xf32>
    %cst_60 = arith.constant 1.000000e+00 : f32
    %131 = vector.broadcast %cst_60 : f32 to vector<32x128xf32>
    %132 = arith.addf %131, %130 : vector<32x128xf32>
    %cst_61 = arith.constant 5.000000e-01 : f32
    %133 = vector.broadcast %cst_61 : f32 to vector<32x128xf32>
    %134 = arith.mulf %133, %132 : vector<32x128xf32>
    %135 = arith.mulf %122, %134 : vector<32x128xf32>
    %136 = arith.truncf %135 : vector<32x128xf32> to vector<32x128xbf16>
    %c0_62 = arith.constant 0 : index
    %c0_63 = arith.constant 0 : index
    %c0_64 = arith.constant 0 : index
    %137 = vector.load %arg18[%c0_62, %c0_63, %c0_64] : memref<1x128x128xbf16, #tpu.memory_space<vmem>>, vector<1x128x128xbf16>
    %138 = vector.shape_cast %137 : vector<1x128x128xbf16> to vector<128x128xbf16>
    %cst_65 = arith.constant dense<0.000000e+00> : vector<32x128xf32>
    %139 = tpu.matmul %136, %138, %cst_65 {dimension_numbers = #tpu.dot_dimension_numbers<[1], [0], [0], [1], [0, 0, 1, 1], [], []>} : vector<32x128xbf16>, vector<128x128xbf16>, vector<32x128xf32> -> vector<32x128xf32>
    %c0_66 = arith.constant 0 : index
    %c0_67 = arith.constant 0 : index
    %c0_68 = arith.constant 0 : index
    %140 = vector.load %arg19[%c0_66, %c0_67, %c0_68] : memref<1x1x128xf32, #tpu.memory_space<vmem>>, vector<1x1x128xf32>
    %141 = vector.shape_cast %140 : vector<1x1x128xf32> to vector<1x128xf32>
    %142 = vector.broadcast %141 : vector<1x128xf32> to vector<32x128xf32>
    %143 = arith.addf %139, %142 : vector<32x128xf32>
    %144 = arith.addf %86, %143 : vector<32x128xf32>
    %145 = vector.shape_cast %144 : vector<32x128xf32> to vector<2x16x128xf32>
    %c0_69 = arith.constant 0 : index
    %c0_70 = arith.constant 0 : index
    %c0_71 = arith.constant 0 : index
    %146 = vector.load %arg25[%c0_69, %c0_70, %c0_71] : memref<2x16x128xf32, #tpu.memory_space<vmem>>, vector<2x16x128xf32>
    tpu.vector_store %arg25[%c0_69, %c0_70, %c0_71], %145 {strides = array<i32>} : memref<2x16x128xf32, #tpu.memory_space<vmem>>, vector<2x16x128xf32>,
    %c1_i32 = arith.constant 1 : i32
    %147 = arith.cmpi eq, %arg1, %c1_i32 : i32
    %148 = arith.extui %147 : i1 to i32
    %c0_i32_72 = arith.constant 0 : i32
    %149 = arith.cmpi ne, %148, %c0_i32_72 : i32
    scf.if %149 {
      %cst_73 = arith.constant dense<0.000000e+00> : vector<32xf32>
      %150 = vector.multi_reduction <add>, %144, %cst_73 [1] : vector<32x128xf32> to vector<32xf32>
      %151 = vector.shape_cast %150 : vector<32xf32> to vector<32x1xf32>
      %cst_74 = arith.constant 3.125000e-02 : f32
      %152 = vector.broadcast %cst_74 : f32 to vector<32x1xf32>
      %153 = arith.mulf %151, %152 : vector<32x1xf32>
      %154 = arith.mulf %144, %144 : vector<32x128xf32>
      %cst_75 = arith.constant dense<0.000000e+00> : vector<32xf32>
      %155 = vector.multi_reduction <add>, %154, %cst_75 [1] : vector<32x128xf32> to vector<32xf32>
      %156 = vector.shape_cast %155 : vector<32xf32> to vector<32x1xf32>
      %cst_76 = arith.constant 3.125000e-02 : f32
      %157 = vector.broadcast %cst_76 : f32 to vector<32x1xf32>
      %158 = arith.mulf %156, %157 : vector<32x1xf32>
      %159 = arith.mulf %153, %153 : vector<32x1xf32>
      %160 = arith.subf %158, %159 : vector<32x1xf32>
      %cst_77 = arith.constant 0.000000e+00 : f32
      %161 = vector.broadcast %cst_77 : f32 to vector<32x1xf32>
      %162 = arith.maximumf %160, %161 : vector<32x1xf32>
      %163 = vector.broadcast %153 : vector<32x1xf32> to vector<32x128xf32>
      %164 = arith.subf %144, %163 : vector<32x128xf32>
      %cst_78 = arith.constant 9.99999974E-6 : f32
      %165 = vector.broadcast %cst_78 : f32 to vector<32x1xf32>
      %166 = arith.addf %162, %165 : vector<32x1xf32>
      %167 = math.rsqrt %166 : vector<32x1xf32>
      %168 = vector.broadcast %167 : vector<32x1xf32> to vector<32x128xf32>
      %169 = arith.mulf %164, %168 : vector<32x128xf32>
      %c0_79 = arith.constant 0 : index
      %c0_80 = arith.constant 0 : index
      %170 = vector.load %arg20[%c0_79, %c0_80] : memref<1x128xf32, #tpu.memory_space<vmem>>, vector<1x128xf32>
      %171 = vector.broadcast %170 : vector<1x128xf32> to vector<32x128xf32>
      %172 = arith.mulf %169, %171 : vector<32x128xf32>
      %c0_81 = arith.constant 0 : index
      %c0_82 = arith.constant 0 : index
      %173 = vector.load %arg21[%c0_81, %c0_82] : memref<1x128xf32, #tpu.memory_space<vmem>>, vector<1x128xf32>
      %174 = vector.broadcast %173 : vector<1x128xf32> to vector<32x128xf32>
      %175 = arith.addf %172, %174 : vector<32x128xf32>
      %176 = arith.truncf %175 : vector<32x128xf32> to vector<32x128xbf16>
      %c0_83 = arith.constant 0 : index
      %c0_84 = arith.constant 0 : index
      %177 = vector.load %arg22[%c0_83, %c0_84] : memref<128x128xbf16, #tpu.memory_space<vmem>>, vector<128x128xbf16>
      %cst_85 = arith.constant dense<0.000000e+00> : vector<32x128xf32>
      %178 = tpu.matmul %176, %177, %cst_85 {dimension_numbers = #tpu.dot_dimension_numbers<[1], [0], [0], [1], [0, 0, 1, 1], [], []>} : vector<32x128xbf16>, vector<128x128xbf16>, vector<32x128xf32> -> vector<32x128xf32>
      %c0_86 = arith.constant 0 : index
      %c0_87 = arith.constant 0 : index
      %179 = vector.load %arg23[%c0_86, %c0_87] : memref<1x128xf32, #tpu.memory_space<vmem>>, vector<1x128xf32>
      %180 = vector.broadcast %179 : vector<1x128xf32> to vector<32x128xf32>
      %181 = arith.addf %178, %180 : vector<32x128xf32>
      %182 = vector.shape_cast %181 : vector<32x128xf32> to vector<2x16x128xf32>
      %c0_88 = arith.constant 0 : index
      %c0_89 = arith.constant 0 : index
      %c0_90 = arith.constant 0 : index
      %183 = vector.load %arg24[%c0_88, %c0_89, %c0_90] : memref<2x16x128xf32, #tpu.memory_space<vmem>>, vector<2x16x128xf32>
      tpu.vector_store %arg24[%c0_88, %c0_89, %c0_90], %182 {strides = array<i32>} : memref<2x16x128xf32, #tpu.memory_space<vmem>>, vector<2x16x128xf32>,
    } else {
    }
    return
  }
  func.func @transform_0(%arg0: i32, %arg1: i32) -> (i32, i32, i32) {
    %c0_i32 = arith.constant 0 : i32
    %c0_i32_0 = arith.constant 0 : i32
    %c0_i32_1 = arith.constant 0 : i32
    return %arg0, %c0_i32, %c0_i32_0 : i32, i32, i32
  }
  func.func @transform_1(%arg0: i32, %arg1: i32) -> (i32, i32) {
    %c0_i32 = arith.constant 0 : i32
    %c0_i32_0 = arith.constant 0 : i32
    %c0_i32_1 = arith.constant 0 : i32
    return %c0_i32, %c0_i32_0 : i32, i32
  }
  func.func @transform_2(%arg0: i32, %arg1: i32) -> (i32, i32, i32) {
    %c0_i32 = arith.constant 0 : i32
    %c0_i32_0 = arith.constant 0 : i32
    %c0_i32_1 = arith.constant 0 : i32
    return %arg0, %c0_i32, %c0_i32_0 : i32, i32, i32
  }
  func.func @transform_3(%arg0: i32, %arg1: i32) -> (i32, i32, i32) {
    %c0_i32 = arith.constant 0 : i32
    %c0_i32_0 = arith.constant 0 : i32
    %c0_i32_1 = arith.constant 0 : i32
    %c0_i32_2 = arith.constant 0 : i32
    return %c0_i32, %c0_i32_0, %c0_i32_1 : i32, i32, i32
  }
  func.func @transform_4(%arg0: i32, %arg1: i32) -> (i32, i32) {
    %c0_i32 = arith.constant 0 : i32
    %c0_i32_0 = arith.constant 0 : i32
    %c0_i32_1 = arith.constant 0 : i32
    return %c0_i32, %c0_i32_0 : i32, i32
  }
  func.func @transform_5(%arg0: i32, %arg1: i32) -> (i32, i32) {
    %c0_i32 = arith.constant 0 : i32
    %c0_i32_0 = arith.constant 0 : i32
    %c0_i32_1 = arith.constant 0 : i32
    return %c0_i32, %c0_i32_0 : i32, i32
  }
  func.func @transform_6(%arg0: i32, %arg1: i32) -> (i32, i32, i32) {
    %c0_i32 = arith.constant 0 : i32
    %c0_i32_0 = arith.constant 0 : i32
    %c0_i32_1 = arith.constant 0 : i32
    return %arg1, %c0_i32, %c0_i32_0 : i32, i32, i32
  }
  func.func @transform_7(%arg0: i32, %arg1: i32) -> (i32, i32, i32) {
    %c0_i32 = arith.constant 0 : i32
    %c0_i32_0 = arith.constant 0 : i32
    %c0_i32_1 = arith.constant 0 : i32
    return %arg1, %c0_i32, %c0_i32_0 : i32, i32, i32
  }
  func.func @transform_8(%arg0: i32, %arg1: i32) -> (i32, i32, i32) {
    %c0_i32 = arith.constant 0 : i32
    %c0_i32_0 = arith.constant 0 : i32
    %c0_i32_1 = arith.constant 0 : i32
    return %arg1, %c0_i32, %c0_i32_0 : i32, i32, i32
  }
  func.func @transform_9(%arg0: i32, %arg1: i32) -> (i32, i32, i32) {
    %c0_i32 = arith.constant 0 : i32
    %c0_i32_0 = arith.constant 0 : i32
    %c0_i32_1 = arith.constant 0 : i32
    return %arg1, %c0_i32, %c0_i32_0 : i32, i32, i32
  }
  func.func @transform_10(%arg0: i32, %arg1: i32) -> (i32, i32, i32) {
    %c0_i32 = arith.constant 0 : i32
    %c0_i32_0 = arith.constant 0 : i32
    %c0_i32_1 = arith.constant 0 : i32
    return %arg1, %c0_i32, %c0_i32_0 : i32, i32, i32
  }
  func.func @transform_11(%arg0: i32, %arg1: i32) -> (i32, i32, i32) {
    %c0_i32 = arith.constant 0 : i32
    %c0_i32_0 = arith.constant 0 : i32
    %c0_i32_1 = arith.constant 0 : i32
    return %arg1, %c0_i32, %c0_i32_0 : i32, i32, i32
  }
  func.func @transform_12(%arg0: i32, %arg1: i32) -> (i32, i32, i32) {
    %c0_i32 = arith.constant 0 : i32
    %c0_i32_0 = arith.constant 0 : i32
    %c0_i32_1 = arith.constant 0 : i32
    return %arg1, %c0_i32, %c0_i32_0 : i32, i32, i32
  }
  func.func @transform_13(%arg0: i32, %arg1: i32) -> (i32, i32, i32) {
    %c0_i32 = arith.constant 0 : i32
    %c0_i32_0 = arith.constant 0 : i32
    %c0_i32_1 = arith.constant 0 : i32
    return %arg1, %c0_i32, %c0_i32_0 : i32, i32, i32
  }
  func.func @transform_14(%arg0: i32, %arg1: i32) -> (i32, i32, i32) {
    %c0_i32 = arith.constant 0 : i32
    %c0_i32_0 = arith.constant 0 : i32
    %c0_i32_1 = arith.constant 0 : i32
    return %arg1, %c0_i32, %c0_i32_0 : i32, i32, i32
  }
  func.func @transform_15(%arg0: i32, %arg1: i32) -> (i32, i32, i32) {
    %c0_i32 = arith.constant 0 : i32
    %c0_i32_0 = arith.constant 0 : i32
    %c0_i32_1 = arith.constant 0 : i32
    return %arg1, %c0_i32, %c0_i32_0 : i32, i32, i32
  }
  func.func @transform_16(%arg0: i32, %arg1: i32) -> (i32, i32, i32) {
    %c0_i32 = arith.constant 0 : i32
    %c0_i32_0 = arith.constant 0 : i32
    %c0_i32_1 = arith.constant 0 : i32
    return %arg1, %c0_i32, %c0_i32_0 : i32, i32, i32
  }
  func.func @transform_17(%arg0: i32, %arg1: i32) -> (i32, i32, i32) {
    %c0_i32 = arith.constant 0 : i32
    %c0_i32_0 = arith.constant 0 : i32
    %c0_i32_1 = arith.constant 0 : i32
    return %arg1, %c0_i32, %c0_i32_0 : i32, i32, i32
  }
  func.func @transform_18(%arg0: i32, %arg1: i32) -> (i32, i32) {
    %c0_i32 = arith.constant 0 : i32
    %c0_i32_0 = arith.constant 0 : i32
    %c0_i32_1 = arith.constant 0 : i32
    return %c0_i32, %c0_i32_0 : i32, i32
  }
  func.func @transform_19(%arg0: i32, %arg1: i32) -> (i32, i32) {
    %c0_i32 = arith.constant 0 : i32
    %c0_i32_0 = arith.constant 0 : i32
    %c0_i32_1 = arith.constant 0 : i32
    return %c0_i32, %c0_i32_0 : i32, i32
  }
  func.func @transform_20(%arg0: i32, %arg1: i32) -> (i32, i32) {
    %c0_i32 = arith.constant 0 : i32
    %c0_i32_0 = arith.constant 0 : i32
    %c0_i32_1 = arith.constant 0 : i32
    return %c0_i32, %c0_i32_0 : i32, i32
  }
  func.func @transform_21(%arg0: i32, %arg1: i32) -> (i32, i32) {
    %c0_i32 = arith.constant 0 : i32
    %c0_i32_0 = arith.constant 0 : i32
    %c0_i32_1 = arith.constant 0 : i32
    return %c0_i32, %c0_i32_0 : i32, i32
  }
  func.func @transform_22(%arg0: i32, %arg1: i32) -> (i32, i32, i32) {
    %c0_i32 = arith.constant 0 : i32
    %c0_i32_0 = arith.constant 0 : i32
    %c0_i32_1 = arith.constant 0 : i32
    return %arg0, %c0_i32, %c0_i32_0 : i32, i32, i32
  }
}

module attributes {stable_mosaic.version = 11 : i64} {
  func.func @kernel(%arg0: i32, %arg1: i32, %arg2: memref<2x16x128xf32, #tpu.memory_space<vmem>>, %arg3: memref<16x128xf32, #tpu.memory_space<vmem>>, %arg4: memref<2x1x16xf32, #tpu.memory_space<vmem>>, %arg5: memref<1x64x128xf32, #tpu.memory_space<vmem>>, %arg6: memref<2x1x128xf32, #tpu.memory_space<vmem>>, %arg7: memref<2x16x128xbf16, #tpu.memory_space<vmem>>, %arg8: memref<2x1x16xf32, #tpu.memory_space<vmem>>, %arg9: memref<128x128xbf16, #tpu.memory_space<vmem>>, %arg10: memref<1x128xf32, #tpu.memory_space<vmem>>, %arg11: memref<128x128xbf16, #tpu.memory_space<vmem>>, %arg12: memref<1x128xf32, #tpu.memory_space<vmem>>, %arg13: memref<1x1x128xf32, #tpu.memory_space<vmem>>, %arg14: memref<1x1x128xf32, #tpu.memory_space<vmem>>, %arg15: memref<1x128x384xbf16, #tpu.memory_space<vmem>>, %arg16: memref<1x1x384xf32, #tpu.memory_space<vmem>>, %arg17: memref<1x128x128xbf16, #tpu.memory_space<vmem>>, %arg18: memref<1x1x128xf32, #tpu.memory_space<vmem>>, %arg19: memref<1x1x128xf32, #tpu.memory_space<vmem>>, %arg20: memref<1x1x128xf32, #tpu.memory_space<vmem>>, %arg21: memref<1x128x128xbf16, #tpu.memory_space<vmem>>, %arg22: memref<1x1x128xf32, #tpu.memory_space<vmem>>, %arg23: memref<1x128x256xbf16, #tpu.memory_space<vmem>>, %arg24: memref<1x1x256xf32, #tpu.memory_space<vmem>>, %arg25: memref<1x128x128xbf16, #tpu.memory_space<vmem>>, %arg26: memref<1x1x128xf32, #tpu.memory_space<vmem>>, %arg27: memref<1x1x128xf32, #tpu.memory_space<vmem>>, %arg28: memref<1x1x128xf32, #tpu.memory_space<vmem>>, %arg29: memref<1x128x128xbf16, #tpu.memory_space<vmem>>, %arg30: memref<1x1x128xf32, #tpu.memory_space<vmem>>, %arg31: memref<1x128x128xbf16, #tpu.memory_space<vmem>>, %arg32: memref<1x1x128xf32, #tpu.memory_space<vmem>>, %arg33: memref<1x128xf32, #tpu.memory_space<vmem>>, %arg34: memref<1x128xf32, #tpu.memory_space<vmem>>, %arg35: memref<128x128xbf16, #tpu.memory_space<vmem>>, %arg36: memref<1x128xf32, #tpu.memory_space<vmem>>, %arg37: memref<2x16x128xf32, #tpu.memory_space<vmem>>, %arg38: memref<2x16x128xf32, #tpu.memory_space<vmem>>) attributes {dimension_semantics = [#tpu.dimension_semantics<parallel>, #tpu.dimension_semantics<arbitrary>], iteration_bounds = array<i64: 1, 2>, scalar_prefetch = 0 : i64, scratch_operands = 1 : i64, tpu.core_type = #tpu.core_type<tc>, window_params = [{transform_indices = @transform_0, window_bounds = array<i64: 2, 16, 128>}, {pipeline_mode = #tpu.pipeline_mode<synchronous>, transform_indices = @transform_1, window_bounds = array<i64: 16, 128>}, {transform_indices = @transform_2, window_bounds = array<i64: 2, 1, 16>}, {pipeline_mode = #tpu.pipeline_mode<synchronous>, transform_indices = @transform_3, window_bounds = array<i64: 1, 64, 128>}, {transform_indices = @transform_4, window_bounds = array<i64: 2, 1, 128>}, {transform_indices = @transform_5, window_bounds = array<i64: 2, 16, 128>}, {transform_indices = @transform_6, window_bounds = array<i64: 2, 1, 16>}, {pipeline_mode = #tpu.pipeline_mode<synchronous>, transform_indices = @transform_7, window_bounds = array<i64: 128, 128>}, {pipeline_mode = #tpu.pipeline_mode<synchronous>, transform_indices = @transform_8, window_bounds = array<i64: 1, 128>}, {pipeline_mode = #tpu.pipeline_mode<synchronous>, transform_indices = @transform_9, window_bounds = array<i64: 128, 128>}, {pipeline_mode = #tpu.pipeline_mode<synchronous>, transform_indices = @transform_10, window_bounds = array<i64: 1, 128>}, {transform_indices = @transform_11, window_bounds = array<i64: 1, 1, 128>}, {transform_indices = @transform_12, window_bounds = array<i64: 1, 1, 128>}, {transform_indices = @transform_13, window_bounds = array<i64: 1, 128, 384>}, {transform_indices = @transform_14, window_bounds = array<i64: 1, 1, 384>}, {transform_indices = @transform_15, window_bounds = array<i64: 1, 128, 128>}, {transform_indices = @transform_16, window_bounds = array<i64: 1, 1, 128>}, {transform_indices = @transform_17, window_bounds = array<i64: 1, 1, 128>}, {transform_indices = @transform_18, window_bounds = array<i64: 1, 1, 128>}, {transform_indices = @transform_19, window_bounds = array<i64: 1, 128, 128>}, {transform_indices = @transform_20, window_bounds = array<i64: 1, 1, 128>}, {transform_indices = @transform_21, window_bounds = array<i64: 1, 128, 256>}, {transform_indices = @transform_22, window_bounds = array<i64: 1, 1, 256>}, {transform_indices = @transform_23, window_bounds = array<i64: 1, 128, 128>}, {transform_indices = @transform_24, window_bounds = array<i64: 1, 1, 128>}, {transform_indices = @transform_25, window_bounds = array<i64: 1, 1, 128>}, {transform_indices = @transform_26, window_bounds = array<i64: 1, 1, 128>}, {transform_indices = @transform_27, window_bounds = array<i64: 1, 128, 128>}, {transform_indices = @transform_28, window_bounds = array<i64: 1, 1, 128>}, {transform_indices = @transform_29, window_bounds = array<i64: 1, 128, 128>}, {transform_indices = @transform_30, window_bounds = array<i64: 1, 1, 128>}, {pipeline_mode = #tpu.pipeline_mode<synchronous>, transform_indices = @transform_31, window_bounds = array<i64: 1, 128>}, {pipeline_mode = #tpu.pipeline_mode<synchronous>, transform_indices = @transform_32, window_bounds = array<i64: 1, 128>}, {pipeline_mode = #tpu.pipeline_mode<synchronous>, transform_indices = @transform_33, window_bounds = array<i64: 128, 128>}, {pipeline_mode = #tpu.pipeline_mode<synchronous>, transform_indices = @transform_34, window_bounds = array<i64: 1, 128>}, {transform_indices = @transform_35, window_bounds = array<i64: 2, 16, 128>}]} {
    %c0 = arith.constant 0 : index
    %c0_0 = arith.constant 0 : index
    %c0_1 = arith.constant 0 : index
    %0 = vector.load %arg5[%c0, %c0_0, %c0_1] : memref<1x64x128xf32, #tpu.memory_space<vmem>>, vector<1x64x128xf32>
    %c0_i32 = arith.constant 0 : i32
    %1 = arith.cmpi eq, %arg1, %c0_i32 : i32
    %2 = arith.extui %1 : i1 to i32
    %c0_i32_2 = arith.constant 0 : i32
    %3 = arith.cmpi ne, %2, %c0_i32_2 : i32
    scf.if %3 {
      %c0_117 = arith.constant 0 : index
      %c0_118 = arith.constant 0 : index
      %c0_119 = arith.constant 0 : index
      %239 = vector.load %arg2[%c0_117, %c0_118, %c0_119] : memref<2x16x128xf32, #tpu.memory_space<vmem>>, vector<2x16x128xf32>
      %240 = vector.shape_cast %239 : vector<2x16x128xf32> to vector<32x128xf32>
      %241 = arith.truncf %240 : vector<32x128xf32> to vector<32x128xbf16>
      %c0_120 = arith.constant 0 : index
      %c0_121 = arith.constant 0 : index
      %242 = vector.load %arg9[%c0_120, %c0_121] : memref<128x128xbf16, #tpu.memory_space<vmem>>, vector<128x128xbf16>
      %cst_122 = arith.constant dense<0.000000e+00> : vector<32x128xf32>
      %243 = tpu.matmul %241, %242, %cst_122 {dimension_numbers = #tpu.dot_dimension_numbers<[1], [0], [0], [1], [0, 0, 1, 1], [], []>} : vector<32x128xbf16>, vector<128x128xbf16>, vector<32x128xf32> -> vector<32x128xf32>
      %c0_123 = arith.constant 0 : index
      %c0_124 = arith.constant 0 : index
      %244 = vector.load %arg10[%c0_123, %c0_124] : memref<1x128xf32, #tpu.memory_space<vmem>>, vector<1x128xf32>
      %245 = vector.broadcast %244 : vector<1x128xf32> to vector<32x128xf32>
      %246 = arith.addf %243, %245 : vector<32x128xf32>
      %247 = vector.shape_cast %246 : vector<32x128xf32> to vector<2x16x128xf32>
      %c0_125 = arith.constant 0 : index
      %c0_126 = arith.constant 0 : index
      %c0_127 = arith.constant 0 : index
      %248 = vector.load %arg6[%c0_125, %c0_126, %c0_127] : memref<2x1x128xf32, #tpu.memory_space<vmem>>, vector<2x1x128xf32>
      %249 = vector.shape_cast %248 : vector<2x1x128xf32> to vector<2x128xf32>
      %250 = arith.truncf %249 : vector<2x128xf32> to vector<2x128xbf16>
      %c0_128 = arith.constant 0 : index
      %c0_129 = arith.constant 0 : index
      %251 = vector.load %arg11[%c0_128, %c0_129] : memref<128x128xbf16, #tpu.memory_space<vmem>>, vector<128x128xbf16>
      %cst_130 = arith.constant dense<0.000000e+00> : vector<2x128xf32>
      %252 = tpu.matmul %250, %251, %cst_130 {dimension_numbers = #tpu.dot_dimension_numbers<[1], [0], [0], [1], [0, 0, 1, 1], [], []>} : vector<2x128xbf16>, vector<128x128xbf16>, vector<2x128xf32> -> vector<2x128xf32>
      %c0_131 = arith.constant 0 : index
      %c0_132 = arith.constant 0 : index
      %253 = vector.load %arg12[%c0_131, %c0_132] : memref<1x128xf32, #tpu.memory_space<vmem>>, vector<1x128xf32>
      %254 = vector.broadcast %253 : vector<1x128xf32> to vector<2x128xf32>
      %255 = arith.addf %252, %254 : vector<2x128xf32>
      %256 = vector.shape_cast %255 : vector<2x128xf32> to vector<2x1x128xf32>
      %257 = vector.broadcast %256 : vector<2x1x128xf32> to vector<2x16x128xf32>
      %258 = arith.addf %247, %257 : vector<2x16x128xf32>
      %259 = tpu.iota {dimensions = array<i32: 1>} : vector<1x16x1xi32>
      %c0_133 = arith.constant 0 : index
      %c0_134 = arith.constant 0 : index
      %260 = vector.load %arg3[%c0_133, %c0_134] : memref<16x128xf32, #tpu.memory_space<vmem>>, vector<16x128xf32>
      %261 = vector.shape_cast %260 : vector<16x128xf32> to vector<1x16x128xf32>
      %c2_i32 = arith.constant 2 : i32
      %262 = vector.broadcast %c2_i32 : i32 to vector<1x16x1xi32>
      %263 = arith.cmpi sge, %259, %262 : vector<1x16x1xi32>
      %cst_135 = arith.constant 0.000000e+00 : f32
      %264 = vector.shape_cast %263 : vector<1x16x1xi1> to vector<1x16x1xi1>
      %265 = vector.broadcast %264 : vector<1x16x1xi1> to vector<2x16x128xi1>
      %266 = vector.broadcast %cst_135 : f32 to vector<2x16x128xf32>
      %267 = arith.select %265, %258, %266 : vector<2x16x128xi1>, vector<2x16x128xf32>
      %268 = vector.broadcast %261 : vector<1x16x128xf32> to vector<2x16x128xf32>
      %269 = arith.addf %268, %267 : vector<2x16x128xf32>
      %c0_136 = arith.constant 0 : index
      %c0_137 = arith.constant 0 : index
      %c0_138 = arith.constant 0 : index
      %270 = vector.load %arg38[%c0_136, %c0_137, %c0_138] : memref<2x16x128xf32, #tpu.memory_space<vmem>>, vector<2x16x128xf32>
      tpu.vector_store %arg38[%c0_136, %c0_137, %c0_138], %269 {strides = array<i32>} : memref<2x16x128xf32, #tpu.memory_space<vmem>>, vector<2x16x128xf32>,
    } else {
    }
    %c0_3 = arith.constant 0 : index
    %c0_4 = arith.constant 0 : index
    %c0_5 = arith.constant 0 : index
    %4 = vector.load %arg38[%c0_3, %c0_4, %c0_5] : memref<2x16x128xf32, #tpu.memory_space<vmem>>, vector<2x16x128xf32>
    %5 = vector.shape_cast %4 : vector<2x16x128xf32> to vector<32x128xf32>
    %c0_6 = arith.constant 0 : index
    %c0_7 = arith.constant 0 : index
    %c0_8 = arith.constant 0 : index
    %6 = vector.load %arg4[%c0_6, %c0_7, %c0_8] : memref<2x1x16xf32, #tpu.memory_space<vmem>>, vector<2x1x16xf32>
    %cst = arith.constant dense<0.000000e+00> : vector<32xf32>
    %7 = vector.multi_reduction <add>, %5, %cst [1] : vector<32x128xf32> to vector<32xf32>
    %8 = vector.shape_cast %7 : vector<32xf32> to vector<32x1xf32>
    %cst_9 = arith.constant 3.125000e-02 : f32
    %9 = vector.broadcast %cst_9 : f32 to vector<32x1xf32>
    %10 = arith.mulf %8, %9 : vector<32x1xf32>
    %11 = arith.mulf %5, %5 : vector<32x128xf32>
    %cst_10 = arith.constant dense<0.000000e+00> : vector<32xf32>
    %12 = vector.multi_reduction <add>, %11, %cst_10 [1] : vector<32x128xf32> to vector<32xf32>
    %13 = vector.shape_cast %12 : vector<32xf32> to vector<32x1xf32>
    %cst_11 = arith.constant 3.125000e-02 : f32
    %14 = vector.broadcast %cst_11 : f32 to vector<32x1xf32>
    %15 = arith.mulf %13, %14 : vector<32x1xf32>
    %16 = arith.mulf %10, %10 : vector<32x1xf32>
    %17 = arith.subf %15, %16 : vector<32x1xf32>
    %cst_12 = arith.constant 0.000000e+00 : f32
    %18 = vector.broadcast %cst_12 : f32 to vector<32x1xf32>
    %19 = arith.maximumf %17, %18 : vector<32x1xf32>
    %20 = vector.broadcast %10 : vector<32x1xf32> to vector<32x128xf32>
    %21 = arith.subf %5, %20 : vector<32x128xf32>
    %cst_13 = arith.constant 9.99999974E-6 : f32
    %22 = vector.broadcast %cst_13 : f32 to vector<32x1xf32>
    %23 = arith.addf %19, %22 : vector<32x1xf32>
    %24 = math.rsqrt %23 : vector<32x1xf32>
    %25 = vector.broadcast %24 : vector<32x1xf32> to vector<32x128xf32>
    %26 = arith.mulf %21, %25 : vector<32x128xf32>
    %c0_14 = arith.constant 0 : index
    %c0_15 = arith.constant 0 : index
    %c0_16 = arith.constant 0 : index
    %27 = vector.load %arg13[%c0_14, %c0_15, %c0_16] : memref<1x1x128xf32, #tpu.memory_space<vmem>>, vector<1x1x128xf32>
    %28 = vector.shape_cast %27 : vector<1x1x128xf32> to vector<1x128xf32>
    %29 = vector.broadcast %28 : vector<1x128xf32> to vector<32x128xf32>
    %30 = arith.mulf %26, %29 : vector<32x128xf32>
    %c0_17 = arith.constant 0 : index
    %c0_18 = arith.constant 0 : index
    %c0_19 = arith.constant 0 : index
    %31 = vector.load %arg14[%c0_17, %c0_18, %c0_19] : memref<1x1x128xf32, #tpu.memory_space<vmem>>, vector<1x1x128xf32>
    %32 = vector.shape_cast %31 : vector<1x1x128xf32> to vector<1x128xf32>
    %33 = vector.broadcast %32 : vector<1x128xf32> to vector<32x128xf32>
    %34 = arith.addf %30, %33 : vector<32x128xf32>
    %35 = arith.truncf %34 : vector<32x128xf32> to vector<32x128xbf16>
    %c0_20 = arith.constant 0 : index
    %c0_21 = arith.constant 0 : index
    %c0_22 = arith.constant 0 : index
    %36 = vector.load %arg15[%c0_20, %c0_21, %c0_22] : memref<1x128x384xbf16, #tpu.memory_space<vmem>>, vector<1x128x384xbf16>
    %37 = vector.shape_cast %36 : vector<1x128x384xbf16> to vector<128x384xbf16>
    %cst_23 = arith.constant dense<0.000000e+00> : vector<32x384xf32>
    %38 = tpu.matmul %35, %37, %cst_23 {dimension_numbers = #tpu.dot_dimension_numbers<[1], [0], [0], [1], [0, 0, 1, 1], [], []>} : vector<32x128xbf16>, vector<128x384xbf16>, vector<32x384xf32> -> vector<32x384xf32>
    %c0_24 = arith.constant 0 : index
    %c0_25 = arith.constant 0 : index
    %c0_26 = arith.constant 0 : index
    %39 = vector.load %arg16[%c0_24, %c0_25, %c0_26] : memref<1x1x384xf32, #tpu.memory_space<vmem>>, vector<1x1x384xf32>
    %40 = vector.shape_cast %39 : vector<1x1x384xf32> to vector<1x384xf32>
    %41 = vector.broadcast %40 : vector<1x384xf32> to vector<32x384xf32>
    %42 = arith.addf %38, %41 : vector<32x384xf32>
    %43 = vector.extract_strided_slice %42 {offsets = [0, 0], sizes = [32, 128], strides = [1, 1]} : vector<32x384xf32> to vector<32x128xf32>
    %44 = vector.shape_cast %43 : vector<32x128xf32> to vector<2x16x128xf32>
    %45 = vector.extract_strided_slice %42 {offsets = [0, 128], sizes = [32, 128], strides = [1, 1]} : vector<32x384xf32> to vector<32x128xf32>
    %46 = vector.shape_cast %45 : vector<32x128xf32> to vector<2x16x128xf32>
    %47 = vector.extract_strided_slice %42 {offsets = [0, 256], sizes = [32, 128], strides = [1, 1]} : vector<32x384xf32> to vector<32x128xf32>
    %48 = vector.shape_cast %47 : vector<32x128xf32> to vector<2x16x128xf32>
    %49 = tpu.concatenate %44, %44, %44, %44 in 1 : vector<2x16x128xf32>, vector<2x16x128xf32>, vector<2x16x128xf32>, vector<2x16x128xf32> -> vector<2x64x128xf32>
    %50 = vector.broadcast %0 : vector<1x64x128xf32> to vector<2x64x128xf32>
    %51 = arith.mulf %49, %50 : vector<2x64x128xf32>
    "tpu.trace_start"() <{level = 10 : i32, message = "bqd,bkd->bqk"}> : () -> ()
    %cst_27 = arith.constant dense<0.000000e+00> : vector<2x64x16xf32>
    %52 = tpu.matmul %51, %46, %cst_27 {dimension_numbers = #tpu.dot_dimension_numbers<[2], [2], [1], [1], [0, 0, 0, 1, 1, 1], [0], [0]>} : vector<2x64x128xf32>, vector<2x16x128xf32>, vector<2x64x16xf32> -> vector<2x64x16xf32>
    "tpu.trace_stop"() : () -> ()
    %cst_28 = arith.constant 0.353553385 : f32
    %53 = vector.broadcast %cst_28 : f32 to vector<2x64x16xf32>
    %54 = arith.mulf %52, %53 : vector<2x64x16xf32>
    %55 = vector.broadcast %6 : vector<2x1x16xf32> to vector<2x64x16xf32>
    %56 = arith.addf %54, %55 : vector<2x64x16xf32>
    %cst_29 = arith.constant dense<0xFF800000> : vector<2x64xf32>
    %57 = vector.multi_reduction <maximumf>, %56, %cst_29 [2] : vector<2x64x16xf32> to vector<2x64xf32>
    %58 = vector.shape_cast %57 : vector<2x64xf32> to vector<2x64x1xf32>
    %59 = vector.broadcast %58 : vector<2x64x1xf32> to vector<2x64x16xf32>
    %60 = arith.subf %56, %59 : vector<2x64x16xf32>
    %61 = math.exp %60 : vector<2x64x16xf32>
    %cst_30 = arith.constant dense<0.000000e+00> : vector<2x64xf32>
    %62 = vector.multi_reduction <add>, %61, %cst_30 [2] : vector<2x64x16xf32> to vector<2x64xf32>
    %63 = vector.shape_cast %62 : vector<2x64xf32> to vector<2x64x1xf32>
    %64 = tpu.reciprocal %63 {approx = true} : vector<2x64x1xf32> -> vector<2x64x1xf32>
    %65 = vector.broadcast %64 : vector<2x64x1xf32> to vector<2x64x16xf32>
    %66 = arith.mulf %61, %65 : vector<2x64x16xf32>
    "tpu.trace_start"() <{level = 10 : i32, message = "bqk,bkd->bqd"}> : () -> ()
    %cst_31 = arith.constant dense<0.000000e+00> : vector<2x64x128xf32>
    %67 = tpu.matmul %66, %48, %cst_31 {dimension_numbers = #tpu.dot_dimension_numbers<[2], [1], [1], [2], [0, 0, 0, 1, 1, 2], [0], [0]>} : vector<2x64x16xf32>, vector<2x16x128xf32>, vector<2x64x128xf32> -> vector<2x64x128xf32>
    "tpu.trace_stop"() : () -> ()
    %68 = vector.broadcast %0 : vector<1x64x128xf32> to vector<2x64x128xf32>
    %69 = arith.mulf %67, %68 : vector<2x64x128xf32>
    %70 = vector.extract_strided_slice %69 {offsets = [0, 0, 0], sizes = [2, 16, 128], strides = [1, 1, 1]} : vector<2x64x128xf32> to vector<2x16x128xf32>
    %71 = vector.extract_strided_slice %69 {offsets = [0, 16, 0], sizes = [2, 16, 128], strides = [1, 1, 1]} : vector<2x64x128xf32> to vector<2x16x128xf32>
    %72 = arith.addf %70, %71 : vector<2x16x128xf32>
    %73 = vector.extract_strided_slice %69 {offsets = [0, 32, 0], sizes = [2, 16, 128], strides = [1, 1, 1]} : vector<2x64x128xf32> to vector<2x16x128xf32>
    %74 = arith.addf %72, %73 : vector<2x16x128xf32>
    %75 = vector.extract_strided_slice %69 {offsets = [0, 48, 0], sizes = [2, 16, 128], strides = [1, 1, 1]} : vector<2x64x128xf32> to vector<2x16x128xf32>
    %76 = arith.addf %74, %75 : vector<2x16x128xf32>
    %77 = vector.shape_cast %76 : vector<2x16x128xf32> to vector<32x128xf32>
    %78 = arith.truncf %77 : vector<32x128xf32> to vector<32x128xbf16>
    %c0_32 = arith.constant 0 : index
    %c0_33 = arith.constant 0 : index
    %c0_34 = arith.constant 0 : index
    %79 = vector.load %arg17[%c0_32, %c0_33, %c0_34] : memref<1x128x128xbf16, #tpu.memory_space<vmem>>, vector<1x128x128xbf16>
    %80 = vector.shape_cast %79 : vector<1x128x128xbf16> to vector<128x128xbf16>
    %cst_35 = arith.constant dense<0.000000e+00> : vector<32x128xf32>
    %81 = tpu.matmul %78, %80, %cst_35 {dimension_numbers = #tpu.dot_dimension_numbers<[1], [0], [0], [1], [0, 0, 1, 1], [], []>} : vector<32x128xbf16>, vector<128x128xbf16>, vector<32x128xf32> -> vector<32x128xf32>
    %c0_36 = arith.constant 0 : index
    %c0_37 = arith.constant 0 : index
    %c0_38 = arith.constant 0 : index
    %82 = vector.load %arg18[%c0_36, %c0_37, %c0_38] : memref<1x1x128xf32, #tpu.memory_space<vmem>>, vector<1x1x128xf32>
    %83 = vector.shape_cast %82 : vector<1x1x128xf32> to vector<1x128xf32>
    %84 = vector.broadcast %83 : vector<1x128xf32> to vector<32x128xf32>
    %85 = arith.addf %81, %84 : vector<32x128xf32>
    %86 = arith.addf %5, %85 : vector<32x128xf32>
    %cst_39 = arith.constant dense<0.000000e+00> : vector<32xf32>
    %87 = vector.multi_reduction <add>, %86, %cst_39 [1] : vector<32x128xf32> to vector<32xf32>
    %88 = vector.shape_cast %87 : vector<32xf32> to vector<32x1xf32>
    %cst_40 = arith.constant 3.125000e-02 : f32
    %89 = vector.broadcast %cst_40 : f32 to vector<32x1xf32>
    %90 = arith.mulf %88, %89 : vector<32x1xf32>
    %91 = arith.mulf %86, %86 : vector<32x128xf32>
    %cst_41 = arith.constant dense<0.000000e+00> : vector<32xf32>
    %92 = vector.multi_reduction <add>, %91, %cst_41 [1] : vector<32x128xf32> to vector<32xf32>
    %93 = vector.shape_cast %92 : vector<32xf32> to vector<32x1xf32>
    %cst_42 = arith.constant 3.125000e-02 : f32
    %94 = vector.broadcast %cst_42 : f32 to vector<32x1xf32>
    %95 = arith.mulf %93, %94 : vector<32x1xf32>
    %96 = arith.mulf %90, %90 : vector<32x1xf32>
    %97 = arith.subf %95, %96 : vector<32x1xf32>
    %cst_43 = arith.constant 0.000000e+00 : f32
    %98 = vector.broadcast %cst_43 : f32 to vector<32x1xf32>
    %99 = arith.maximumf %97, %98 : vector<32x1xf32>
    %100 = vector.broadcast %90 : vector<32x1xf32> to vector<32x128xf32>
    %101 = arith.subf %86, %100 : vector<32x128xf32>
    %cst_44 = arith.constant 9.99999974E-6 : f32
    %102 = vector.broadcast %cst_44 : f32 to vector<32x1xf32>
    %103 = arith.addf %99, %102 : vector<32x1xf32>
    %104 = math.rsqrt %103 : vector<32x1xf32>
    %105 = vector.broadcast %104 : vector<32x1xf32> to vector<32x128xf32>
    %106 = arith.mulf %101, %105 : vector<32x128xf32>
    %c0_45 = arith.constant 0 : index
    %c0_46 = arith.constant 0 : index
    %c0_47 = arith.constant 0 : index
    %107 = vector.load %arg19[%c0_45, %c0_46, %c0_47] : memref<1x1x128xf32, #tpu.memory_space<vmem>>, vector<1x1x128xf32>
    %108 = vector.shape_cast %107 : vector<1x1x128xf32> to vector<1x128xf32>
    %109 = vector.broadcast %108 : vector<1x128xf32> to vector<32x128xf32>
    %110 = arith.mulf %106, %109 : vector<32x128xf32>
    %c0_48 = arith.constant 0 : index
    %c0_49 = arith.constant 0 : index
    %c0_50 = arith.constant 0 : index
    %111 = vector.load %arg20[%c0_48, %c0_49, %c0_50] : memref<1x1x128xf32, #tpu.memory_space<vmem>>, vector<1x1x128xf32>
    %112 = vector.shape_cast %111 : vector<1x1x128xf32> to vector<1x128xf32>
    %113 = vector.broadcast %112 : vector<1x128xf32> to vector<32x128xf32>
    %114 = arith.addf %110, %113 : vector<32x128xf32>
    %115 = arith.truncf %114 : vector<32x128xf32> to vector<32x128xbf16>
    %c0_51 = arith.constant 0 : index
    %c0_52 = arith.constant 0 : index
    %c0_53 = arith.constant 0 : index
    %116 = vector.load %arg21[%c0_51, %c0_52, %c0_53] : memref<1x128x128xbf16, #tpu.memory_space<vmem>>, vector<1x128x128xbf16>
    %117 = vector.shape_cast %116 : vector<1x128x128xbf16> to vector<128x128xbf16>
    %cst_54 = arith.constant dense<0.000000e+00> : vector<32x128xf32>
    %118 = tpu.matmul %115, %117, %cst_54 {dimension_numbers = #tpu.dot_dimension_numbers<[1], [0], [0], [1], [0, 0, 1, 1], [], []>} : vector<32x128xbf16>, vector<128x128xbf16>, vector<32x128xf32> -> vector<32x128xf32>
    %c0_55 = arith.constant 0 : index
    %c0_56 = arith.constant 0 : index
    %c0_57 = arith.constant 0 : index
    %119 = vector.load %arg22[%c0_55, %c0_56, %c0_57] : memref<1x1x128xf32, #tpu.memory_space<vmem>>, vector<1x1x128xf32>
    %120 = vector.shape_cast %119 : vector<1x1x128xf32> to vector<1x128xf32>
    %121 = vector.broadcast %120 : vector<1x128xf32> to vector<32x128xf32>
    %122 = arith.addf %118, %121 : vector<32x128xf32>
    %123 = vector.shape_cast %122 : vector<32x128xf32> to vector<2x16x128xf32>
    %c0_58 = arith.constant 0 : index
    %c0_59 = arith.constant 0 : index
    %c0_60 = arith.constant 0 : index
    %124 = vector.load %arg7[%c0_58, %c0_59, %c0_60] : memref<2x16x128xbf16, #tpu.memory_space<vmem>>, vector<2x16x128xbf16>
    %125 = vector.shape_cast %124 : vector<2x16x128xbf16> to vector<32x128xbf16>
    %c0_61 = arith.constant 0 : index
    %c0_62 = arith.constant 0 : index
    %c0_63 = arith.constant 0 : index
    %126 = vector.load %arg23[%c0_61, %c0_62, %c0_63] : memref<1x128x256xbf16, #tpu.memory_space<vmem>>, vector<1x128x256xbf16>
    %127 = vector.shape_cast %126 : vector<1x128x256xbf16> to vector<128x256xbf16>
    %cst_64 = arith.constant dense<0.000000e+00> : vector<32x256xf32>
    %128 = tpu.matmul %125, %127, %cst_64 {dimension_numbers = #tpu.dot_dimension_numbers<[1], [0], [0], [1], [0, 0, 1, 1], [], []>} : vector<32x128xbf16>, vector<128x256xbf16>, vector<32x256xf32> -> vector<32x256xf32>
    %c0_65 = arith.constant 0 : index
    %c0_66 = arith.constant 0 : index
    %c0_67 = arith.constant 0 : index
    %129 = vector.load %arg24[%c0_65, %c0_66, %c0_67] : memref<1x1x256xf32, #tpu.memory_space<vmem>>, vector<1x1x256xf32>
    %130 = vector.shape_cast %129 : vector<1x1x256xf32> to vector<1x256xf32>
    %131 = vector.broadcast %130 : vector<1x256xf32> to vector<32x256xf32>
    %132 = arith.addf %128, %131 : vector<32x256xf32>
    %133 = vector.extract_strided_slice %132 {offsets = [0, 0], sizes = [32, 128], strides = [1, 1]} : vector<32x256xf32> to vector<32x128xf32>
    %134 = vector.shape_cast %133 : vector<32x128xf32> to vector<2x16x128xf32>
    %135 = vector.extract_strided_slice %132 {offsets = [0, 128], sizes = [32, 128], strides = [1, 1]} : vector<32x256xf32> to vector<32x128xf32>
    %136 = vector.shape_cast %135 : vector<32x128xf32> to vector<2x16x128xf32>
    %c0_68 = arith.constant 0 : index
    %c0_69 = arith.constant 0 : index
    %c0_70 = arith.constant 0 : index
    %137 = vector.load %arg8[%c0_68, %c0_69, %c0_70] : memref<2x1x16xf32, #tpu.memory_space<vmem>>, vector<2x1x16xf32>
    %138 = tpu.concatenate %123, %123, %123, %123 in 1 : vector<2x16x128xf32>, vector<2x16x128xf32>, vector<2x16x128xf32>, vector<2x16x128xf32> -> vector<2x64x128xf32>
    %139 = vector.broadcast %0 : vector<1x64x128xf32> to vector<2x64x128xf32>
    %140 = arith.mulf %138, %139 : vector<2x64x128xf32>
    "tpu.trace_start"() <{level = 10 : i32, message = "bqd,bkd->bqk"}> : () -> ()
    %cst_71 = arith.constant dense<0.000000e+00> : vector<2x64x16xf32>
    %141 = tpu.matmul %140, %134, %cst_71 {dimension_numbers = #tpu.dot_dimension_numbers<[2], [2], [1], [1], [0, 0, 0, 1, 1, 1], [0], [0]>} : vector<2x64x128xf32>, vector<2x16x128xf32>, vector<2x64x16xf32> -> vector<2x64x16xf32>
    "tpu.trace_stop"() : () -> ()
    %cst_72 = arith.constant 0.353553385 : f32
    %142 = vector.broadcast %cst_72 : f32 to vector<2x64x16xf32>
    %143 = arith.mulf %141, %142 : vector<2x64x16xf32>
    %144 = vector.broadcast %137 : vector<2x1x16xf32> to vector<2x64x16xf32>
    %145 = arith.addf %143, %144 : vector<2x64x16xf32>
    %cst_73 = arith.constant dense<0xFF800000> : vector<2x64xf32>
    %146 = vector.multi_reduction <maximumf>, %145, %cst_73 [2] : vector<2x64x16xf32> to vector<2x64xf32>
    %147 = vector.shape_cast %146 : vector<2x64xf32> to vector<2x64x1xf32>
    %148 = vector.broadcast %147 : vector<2x64x1xf32> to vector<2x64x16xf32>
    %149 = arith.subf %145, %148 : vector<2x64x16xf32>
    %150 = math.exp %149 : vector<2x64x16xf32>
    %cst_74 = arith.constant dense<0.000000e+00> : vector<2x64xf32>
    %151 = vector.multi_reduction <add>, %150, %cst_74 [2] : vector<2x64x16xf32> to vector<2x64xf32>
    %152 = vector.shape_cast %151 : vector<2x64xf32> to vector<2x64x1xf32>
    %153 = tpu.reciprocal %152 {approx = true} : vector<2x64x1xf32> -> vector<2x64x1xf32>
    %154 = vector.broadcast %153 : vector<2x64x1xf32> to vector<2x64x16xf32>
    %155 = arith.mulf %150, %154 : vector<2x64x16xf32>
    "tpu.trace_start"() <{level = 10 : i32, message = "bqk,bkd->bqd"}> : () -> ()
    %cst_75 = arith.constant dense<0.000000e+00> : vector<2x64x128xf32>
    %156 = tpu.matmul %155, %136, %cst_75 {dimension_numbers = #tpu.dot_dimension_numbers<[2], [1], [1], [2], [0, 0, 0, 1, 1, 2], [0], [0]>} : vector<2x64x16xf32>, vector<2x16x128xf32>, vector<2x64x128xf32> -> vector<2x64x128xf32>
    "tpu.trace_stop"() : () -> ()
    %157 = vector.broadcast %0 : vector<1x64x128xf32> to vector<2x64x128xf32>
    %158 = arith.mulf %156, %157 : vector<2x64x128xf32>
    %159 = vector.extract_strided_slice %158 {offsets = [0, 0, 0], sizes = [2, 16, 128], strides = [1, 1, 1]} : vector<2x64x128xf32> to vector<2x16x128xf32>
    %160 = vector.extract_strided_slice %158 {offsets = [0, 16, 0], sizes = [2, 16, 128], strides = [1, 1, 1]} : vector<2x64x128xf32> to vector<2x16x128xf32>
    %161 = arith.addf %159, %160 : vector<2x16x128xf32>
    %162 = vector.extract_strided_slice %158 {offsets = [0, 32, 0], sizes = [2, 16, 128], strides = [1, 1, 1]} : vector<2x64x128xf32> to vector<2x16x128xf32>
    %163 = arith.addf %161, %162 : vector<2x16x128xf32>
    %164 = vector.extract_strided_slice %158 {offsets = [0, 48, 0], sizes = [2, 16, 128], strides = [1, 1, 1]} : vector<2x64x128xf32> to vector<2x16x128xf32>
    %165 = arith.addf %163, %164 : vector<2x16x128xf32>
    %166 = vector.shape_cast %165 : vector<2x16x128xf32> to vector<32x128xf32>
    %167 = arith.truncf %166 : vector<32x128xf32> to vector<32x128xbf16>
    %c0_76 = arith.constant 0 : index
    %c0_77 = arith.constant 0 : index
    %c0_78 = arith.constant 0 : index
    %168 = vector.load %arg25[%c0_76, %c0_77, %c0_78] : memref<1x128x128xbf16, #tpu.memory_space<vmem>>, vector<1x128x128xbf16>
    %169 = vector.shape_cast %168 : vector<1x128x128xbf16> to vector<128x128xbf16>
    %cst_79 = arith.constant dense<0.000000e+00> : vector<32x128xf32>
    %170 = tpu.matmul %167, %169, %cst_79 {dimension_numbers = #tpu.dot_dimension_numbers<[1], [0], [0], [1], [0, 0, 1, 1], [], []>} : vector<32x128xbf16>, vector<128x128xbf16>, vector<32x128xf32> -> vector<32x128xf32>
    %c0_80 = arith.constant 0 : index
    %c0_81 = arith.constant 0 : index
    %c0_82 = arith.constant 0 : index
    %171 = vector.load %arg26[%c0_80, %c0_81, %c0_82] : memref<1x1x128xf32, #tpu.memory_space<vmem>>, vector<1x1x128xf32>
    %172 = vector.shape_cast %171 : vector<1x1x128xf32> to vector<1x128xf32>
    %173 = vector.broadcast %172 : vector<1x128xf32> to vector<32x128xf32>
    %174 = arith.addf %170, %173 : vector<32x128xf32>
    %175 = arith.addf %86, %174 : vector<32x128xf32>
    %cst_83 = arith.constant dense<0.000000e+00> : vector<32xf32>
    %176 = vector.multi_reduction <add>, %175, %cst_83 [1] : vector<32x128xf32> to vector<32xf32>
    %177 = vector.shape_cast %176 : vector<32xf32> to vector<32x1xf32>
    %cst_84 = arith.constant 3.125000e-02 : f32
    %178 = vector.broadcast %cst_84 : f32 to vector<32x1xf32>
    %179 = arith.mulf %177, %178 : vector<32x1xf32>
    %180 = arith.mulf %175, %175 : vector<32x128xf32>
    %cst_85 = arith.constant dense<0.000000e+00> : vector<32xf32>
    %181 = vector.multi_reduction <add>, %180, %cst_85 [1] : vector<32x128xf32> to vector<32xf32>
    %182 = vector.shape_cast %181 : vector<32xf32> to vector<32x1xf32>
    %cst_86 = arith.constant 3.125000e-02 : f32
    %183 = vector.broadcast %cst_86 : f32 to vector<32x1xf32>
    %184 = arith.mulf %182, %183 : vector<32x1xf32>
    %185 = arith.mulf %179, %179 : vector<32x1xf32>
    %186 = arith.subf %184, %185 : vector<32x1xf32>
    %cst_87 = arith.constant 0.000000e+00 : f32
    %187 = vector.broadcast %cst_87 : f32 to vector<32x1xf32>
    %188 = arith.maximumf %186, %187 : vector<32x1xf32>
    %189 = vector.broadcast %179 : vector<32x1xf32> to vector<32x128xf32>
    %190 = arith.subf %175, %189 : vector<32x128xf32>
    %cst_88 = arith.constant 9.99999974E-6 : f32
    %191 = vector.broadcast %cst_88 : f32 to vector<32x1xf32>
    %192 = arith.addf %188, %191 : vector<32x1xf32>
    %193 = math.rsqrt %192 : vector<32x1xf32>
    %194 = vector.broadcast %193 : vector<32x1xf32> to vector<32x128xf32>
    %195 = arith.mulf %190, %194 : vector<32x128xf32>
    %c0_89 = arith.constant 0 : index
    %c0_90 = arith.constant 0 : index
    %c0_91 = arith.constant 0 : index
    %196 = vector.load %arg27[%c0_89, %c0_90, %c0_91] : memref<1x1x128xf32, #tpu.memory_space<vmem>>, vector<1x1x128xf32>
    %197 = vector.shape_cast %196 : vector<1x1x128xf32> to vector<1x128xf32>
    %198 = vector.broadcast %197 : vector<1x128xf32> to vector<32x128xf32>
    %199 = arith.mulf %195, %198 : vector<32x128xf32>
    %c0_92 = arith.constant 0 : index
    %c0_93 = arith.constant 0 : index
    %c0_94 = arith.constant 0 : index
    %200 = vector.load %arg28[%c0_92, %c0_93, %c0_94] : memref<1x1x128xf32, #tpu.memory_space<vmem>>, vector<1x1x128xf32>
    %201 = vector.shape_cast %200 : vector<1x1x128xf32> to vector<1x128xf32>
    %202 = vector.broadcast %201 : vector<1x128xf32> to vector<32x128xf32>
    %203 = arith.addf %199, %202 : vector<32x128xf32>
    %204 = arith.truncf %203 : vector<32x128xf32> to vector<32x128xbf16>
    %c0_95 = arith.constant 0 : index
    %c0_96 = arith.constant 0 : index
    %c0_97 = arith.constant 0 : index
    %205 = vector.load %arg29[%c0_95, %c0_96, %c0_97] : memref<1x128x128xbf16, #tpu.memory_space<vmem>>, vector<1x128x128xbf16>
    %206 = vector.shape_cast %205 : vector<1x128x128xbf16> to vector<128x128xbf16>
    %cst_98 = arith.constant dense<0.000000e+00> : vector<32x128xf32>
    %207 = tpu.matmul %204, %206, %cst_98 {dimension_numbers = #tpu.dot_dimension_numbers<[1], [0], [0], [1], [0, 0, 1, 1], [], []>} : vector<32x128xbf16>, vector<128x128xbf16>, vector<32x128xf32> -> vector<32x128xf32>
    %c0_99 = arith.constant 0 : index
    %c0_100 = arith.constant 0 : index
    %c0_101 = arith.constant 0 : index
    %208 = vector.load %arg30[%c0_99, %c0_100, %c0_101] : memref<1x1x128xf32, #tpu.memory_space<vmem>>, vector<1x1x128xf32>
    %209 = vector.shape_cast %208 : vector<1x1x128xf32> to vector<1x128xf32>
    %210 = vector.broadcast %209 : vector<1x128xf32> to vector<32x128xf32>
    %211 = arith.addf %207, %210 : vector<32x128xf32>
    %212 = arith.mulf %211, %211 : vector<32x128xf32>
    %213 = arith.mulf %211, %212 : vector<32x128xf32>
    %cst_102 = arith.constant 4.471500e-02 : f32
    %214 = vector.broadcast %cst_102 : f32 to vector<32x128xf32>
    %215 = arith.mulf %214, %213 : vector<32x128xf32>
    %216 = arith.addf %211, %215 : vector<32x128xf32>
    %cst_103 = arith.constant 0.797884583 : f32
    %217 = vector.broadcast %cst_103 : f32 to vector<32x128xf32>
    %218 = arith.mulf %217, %216 : vector<32x128xf32>
    %219 = math.tanh %218 : vector<32x128xf32>
    %cst_104 = arith.constant 1.000000e+00 : f32
    %220 = vector.broadcast %cst_104 : f32 to vector<32x128xf32>
    %221 = arith.addf %220, %219 : vector<32x128xf32>
    %cst_105 = arith.constant 5.000000e-01 : f32
    %222 = vector.broadcast %cst_105 : f32 to vector<32x128xf32>
    %223 = arith.mulf %222, %221 : vector<32x128xf32>
    %224 = arith.mulf %211, %223 : vector<32x128xf32>
    %225 = arith.truncf %224 : vector<32x128xf32> to vector<32x128xbf16>
    %c0_106 = arith.constant 0 : index
    %c0_107 = arith.constant 0 : index
    %c0_108 = arith.constant 0 : index
    %226 = vector.load %arg31[%c0_106, %c0_107, %c0_108] : memref<1x128x128xbf16, #tpu.memory_space<vmem>>, vector<1x128x128xbf16>
    %227 = vector.shape_cast %226 : vector<1x128x128xbf16> to vector<128x128xbf16>
    %cst_109 = arith.constant dense<0.000000e+00> : vector<32x128xf32>
    %228 = tpu.matmul %225, %227, %cst_109 {dimension_numbers = #tpu.dot_dimension_numbers<[1], [0], [0], [1], [0, 0, 1, 1], [], []>} : vector<32x128xbf16>, vector<128x128xbf16>, vector<32x128xf32> -> vector<32x128xf32>
    %c0_110 = arith.constant 0 : index
    %c0_111 = arith.constant 0 : index
    %c0_112 = arith.constant 0 : index
    %229 = vector.load %arg32[%c0_110, %c0_111, %c0_112] : memref<1x1x128xf32, #tpu.memory_space<vmem>>, vector<1x1x128xf32>
    %230 = vector.shape_cast %229 : vector<1x1x128xf32> to vector<1x128xf32>
    %231 = vector.broadcast %230 : vector<1x128xf32> to vector<32x128xf32>
    %232 = arith.addf %228, %231 : vector<32x128xf32>
    %233 = arith.addf %175, %232 : vector<32x128xf32>
    %234 = vector.shape_cast %233 : vector<32x128xf32> to vector<2x16x128xf32>
    %c0_113 = arith.constant 0 : index
    %c0_114 = arith.constant 0 : index
    %c0_115 = arith.constant 0 : index
    %235 = vector.load %arg38[%c0_113, %c0_114, %c0_115] : memref<2x16x128xf32, #tpu.memory_space<vmem>>, vector<2x16x128xf32>
    tpu.vector_store %arg38[%c0_113, %c0_114, %c0_115], %234 {strides = array<i32>} : memref<2x16x128xf32, #tpu.memory_space<vmem>>, vector<2x16x128xf32>,
    %c1_i32 = arith.constant 1 : i32
    %236 = arith.cmpi eq, %arg1, %c1_i32 : i32
    %237 = arith.extui %236 : i1 to i32
    %c0_i32_116 = arith.constant 0 : i32
    %238 = arith.cmpi ne, %237, %c0_i32_116 : i32
    scf.if %238 {
      %cst_117 = arith.constant dense<0.000000e+00> : vector<32xf32>
      %239 = vector.multi_reduction <add>, %233, %cst_117 [1] : vector<32x128xf32> to vector<32xf32>
      %240 = vector.shape_cast %239 : vector<32xf32> to vector<32x1xf32>
      %cst_118 = arith.constant 3.125000e-02 : f32
      %241 = vector.broadcast %cst_118 : f32 to vector<32x1xf32>
      %242 = arith.mulf %240, %241 : vector<32x1xf32>
      %243 = arith.mulf %233, %233 : vector<32x128xf32>
      %cst_119 = arith.constant dense<0.000000e+00> : vector<32xf32>
      %244 = vector.multi_reduction <add>, %243, %cst_119 [1] : vector<32x128xf32> to vector<32xf32>
      %245 = vector.shape_cast %244 : vector<32xf32> to vector<32x1xf32>
      %cst_120 = arith.constant 3.125000e-02 : f32
      %246 = vector.broadcast %cst_120 : f32 to vector<32x1xf32>
      %247 = arith.mulf %245, %246 : vector<32x1xf32>
      %248 = arith.mulf %242, %242 : vector<32x1xf32>
      %249 = arith.subf %247, %248 : vector<32x1xf32>
      %cst_121 = arith.constant 0.000000e+00 : f32
      %250 = vector.broadcast %cst_121 : f32 to vector<32x1xf32>
      %251 = arith.maximumf %249, %250 : vector<32x1xf32>
      %252 = vector.broadcast %242 : vector<32x1xf32> to vector<32x128xf32>
      %253 = arith.subf %233, %252 : vector<32x128xf32>
      %cst_122 = arith.constant 9.99999974E-6 : f32
      %254 = vector.broadcast %cst_122 : f32 to vector<32x1xf32>
      %255 = arith.addf %251, %254 : vector<32x1xf32>
      %256 = math.rsqrt %255 : vector<32x1xf32>
      %257 = vector.broadcast %256 : vector<32x1xf32> to vector<32x128xf32>
      %258 = arith.mulf %253, %257 : vector<32x128xf32>
      %c0_123 = arith.constant 0 : index
      %c0_124 = arith.constant 0 : index
      %259 = vector.load %arg33[%c0_123, %c0_124] : memref<1x128xf32, #tpu.memory_space<vmem>>, vector<1x128xf32>
      %260 = vector.broadcast %259 : vector<1x128xf32> to vector<32x128xf32>
      %261 = arith.mulf %258, %260 : vector<32x128xf32>
      %c0_125 = arith.constant 0 : index
      %c0_126 = arith.constant 0 : index
      %262 = vector.load %arg34[%c0_125, %c0_126] : memref<1x128xf32, #tpu.memory_space<vmem>>, vector<1x128xf32>
      %263 = vector.broadcast %262 : vector<1x128xf32> to vector<32x128xf32>
      %264 = arith.addf %261, %263 : vector<32x128xf32>
      %265 = arith.truncf %264 : vector<32x128xf32> to vector<32x128xbf16>
      %c0_127 = arith.constant 0 : index
      %c0_128 = arith.constant 0 : index
      %266 = vector.load %arg35[%c0_127, %c0_128] : memref<128x128xbf16, #tpu.memory_space<vmem>>, vector<128x128xbf16>
      %cst_129 = arith.constant dense<0.000000e+00> : vector<32x128xf32>
      %267 = tpu.matmul %265, %266, %cst_129 {dimension_numbers = #tpu.dot_dimension_numbers<[1], [0], [0], [1], [0, 0, 1, 1], [], []>} : vector<32x128xbf16>, vector<128x128xbf16>, vector<32x128xf32> -> vector<32x128xf32>
      %c0_130 = arith.constant 0 : index
      %c0_131 = arith.constant 0 : index
      %268 = vector.load %arg36[%c0_130, %c0_131] : memref<1x128xf32, #tpu.memory_space<vmem>>, vector<1x128xf32>
      %269 = vector.broadcast %268 : vector<1x128xf32> to vector<32x128xf32>
      %270 = arith.addf %267, %269 : vector<32x128xf32>
      %271 = vector.shape_cast %270 : vector<32x128xf32> to vector<2x16x128xf32>
      %c0_132 = arith.constant 0 : index
      %c0_133 = arith.constant 0 : index
      %c0_134 = arith.constant 0 : index
      %272 = vector.load %arg37[%c0_132, %c0_133, %c0_134] : memref<2x16x128xf32, #tpu.memory_space<vmem>>, vector<2x16x128xf32>
      tpu.vector_store %arg37[%c0_132, %c0_133, %c0_134], %271 {strides = array<i32>} : memref<2x16x128xf32, #tpu.memory_space<vmem>>, vector<2x16x128xf32>,
    } else {
    }
    return
  }
  func.func @transform_0(%arg0: i32, %arg1: i32) -> (i32, i32, i32) {
    %c0_i32 = arith.constant 0 : i32
    %c0_i32_0 = arith.constant 0 : i32
    %c0_i32_1 = arith.constant 0 : i32
    return %arg0, %c0_i32, %c0_i32_0 : i32, i32, i32
  }
  func.func @transform_1(%arg0: i32, %arg1: i32) -> (i32, i32) {
    %c0_i32 = arith.constant 0 : i32
    %c0_i32_0 = arith.constant 0 : i32
    %c0_i32_1 = arith.constant 0 : i32
    return %c0_i32, %c0_i32_0 : i32, i32
  }
  func.func @transform_2(%arg0: i32, %arg1: i32) -> (i32, i32, i32) {
    %c0_i32 = arith.constant 0 : i32
    %c0_i32_0 = arith.constant 0 : i32
    %c0_i32_1 = arith.constant 0 : i32
    return %arg0, %c0_i32, %c0_i32_0 : i32, i32, i32
  }
  func.func @transform_3(%arg0: i32, %arg1: i32) -> (i32, i32, i32) {
    %c0_i32 = arith.constant 0 : i32
    %c0_i32_0 = arith.constant 0 : i32
    %c0_i32_1 = arith.constant 0 : i32
    %c0_i32_2 = arith.constant 0 : i32
    return %c0_i32, %c0_i32_0, %c0_i32_1 : i32, i32, i32
  }
  func.func @transform_4(%arg0: i32, %arg1: i32) -> (i32, i32, i32) {
    %c0_i32 = arith.constant 0 : i32
    %c0_i32_0 = arith.constant 0 : i32
    %c0_i32_1 = arith.constant 0 : i32
    return %arg0, %c0_i32, %c0_i32_0 : i32, i32, i32
  }
  func.func @transform_5(%arg0: i32, %arg1: i32) -> (i32, i32, i32) {
    %c0_i32 = arith.constant 0 : i32
    %c0_i32_0 = arith.constant 0 : i32
    %c0_i32_1 = arith.constant 0 : i32
    return %arg0, %c0_i32, %c0_i32_0 : i32, i32, i32
  }
  func.func @transform_6(%arg0: i32, %arg1: i32) -> (i32, i32, i32) {
    %c0_i32 = arith.constant 0 : i32
    %c0_i32_0 = arith.constant 0 : i32
    %c0_i32_1 = arith.constant 0 : i32
    return %arg0, %c0_i32, %c0_i32_0 : i32, i32, i32
  }
  func.func @transform_7(%arg0: i32, %arg1: i32) -> (i32, i32) {
    %c0_i32 = arith.constant 0 : i32
    %c0_i32_0 = arith.constant 0 : i32
    %c0_i32_1 = arith.constant 0 : i32
    return %c0_i32, %c0_i32_0 : i32, i32
  }
  func.func @transform_8(%arg0: i32, %arg1: i32) -> (i32, i32) {
    %c0_i32 = arith.constant 0 : i32
    %c0_i32_0 = arith.constant 0 : i32
    %c0_i32_1 = arith.constant 0 : i32
    return %c0_i32, %c0_i32_0 : i32, i32
  }
  func.func @transform_9(%arg0: i32, %arg1: i32) -> (i32, i32) {
    %c0_i32 = arith.constant 0 : i32
    %c0_i32_0 = arith.constant 0 : i32
    %c0_i32_1 = arith.constant 0 : i32
    return %c0_i32, %c0_i32_0 : i32, i32
  }
  func.func @transform_10(%arg0: i32, %arg1: i32) -> (i32, i32) {
    %c0_i32 = arith.constant 0 : i32
    %c0_i32_0 = arith.constant 0 : i32
    %c0_i32_1 = arith.constant 0 : i32
    return %c0_i32, %c0_i32_0 : i32, i32
  }
  func.func @transform_11(%arg0: i32, %arg1: i32) -> (i32, i32, i32) {
    %c0_i32 = arith.constant 0 : i32
    %c0_i32_0 = arith.constant 0 : i32
    %c0_i32_1 = arith.constant 0 : i32
    return %arg1, %c0_i32, %c0_i32_0 : i32, i32, i32
  }
  func.func @transform_12(%arg0: i32, %arg1: i32) -> (i32, i32, i32) {
    %c0_i32 = arith.constant 0 : i32
    %c0_i32_0 = arith.constant 0 : i32
    %c0_i32_1 = arith.constant 0 : i32
    return %arg1, %c0_i32, %c0_i32_0 : i32, i32, i32
  }
  func.func @transform_13(%arg0: i32, %arg1: i32) -> (i32, i32, i32) {
    %c0_i32 = arith.constant 0 : i32
    %c0_i32_0 = arith.constant 0 : i32
    %c0_i32_1 = arith.constant 0 : i32
    return %arg1, %c0_i32, %c0_i32_0 : i32, i32, i32
  }
  func.func @transform_14(%arg0: i32, %arg1: i32) -> (i32, i32, i32) {
    %c0_i32 = arith.constant 0 : i32
    %c0_i32_0 = arith.constant 0 : i32
    %c0_i32_1 = arith.constant 0 : i32
    return %arg1, %c0_i32, %c0_i32_0 : i32, i32, i32
  }
  func.func @transform_15(%arg0: i32, %arg1: i32) -> (i32, i32, i32) {
    %c0_i32 = arith.constant 0 : i32
    %c0_i32_0 = arith.constant 0 : i32
    %c0_i32_1 = arith.constant 0 : i32
    return %arg1, %c0_i32, %c0_i32_0 : i32, i32, i32
  }
  func.func @transform_16(%arg0: i32, %arg1: i32) -> (i32, i32, i32) {
    %c0_i32 = arith.constant 0 : i32
    %c0_i32_0 = arith.constant 0 : i32
    %c0_i32_1 = arith.constant 0 : i32
    return %arg1, %c0_i32, %c0_i32_0 : i32, i32, i32
  }
  func.func @transform_17(%arg0: i32, %arg1: i32) -> (i32, i32, i32) {
    %c0_i32 = arith.constant 0 : i32
    %c0_i32_0 = arith.constant 0 : i32
    %c0_i32_1 = arith.constant 0 : i32
    return %arg1, %c0_i32, %c0_i32_0 : i32, i32, i32
  }
  func.func @transform_18(%arg0: i32, %arg1: i32) -> (i32, i32, i32) {
    %c0_i32 = arith.constant 0 : i32
    %c0_i32_0 = arith.constant 0 : i32
    %c0_i32_1 = arith.constant 0 : i32
    return %arg1, %c0_i32, %c0_i32_0 : i32, i32, i32
  }
  func.func @transform_19(%arg0: i32, %arg1: i32) -> (i32, i32, i32) {
    %c0_i32 = arith.constant 0 : i32
    %c0_i32_0 = arith.constant 0 : i32
    %c0_i32_1 = arith.constant 0 : i32
    return %arg1, %c0_i32, %c0_i32_0 : i32, i32, i32
  }
  func.func @transform_20(%arg0: i32, %arg1: i32) -> (i32, i32, i32) {
    %c0_i32 = arith.constant 0 : i32
    %c0_i32_0 = arith.constant 0 : i32
    %c0_i32_1 = arith.constant 0 : i32
    return %arg1, %c0_i32, %c0_i32_0 : i32, i32, i32
  }
  func.func @transform_21(%arg0: i32, %arg1: i32) -> (i32, i32, i32) {
    %c0_i32 = arith.constant 0 : i32
    %c0_i32_0 = arith.constant 0 : i32
    %c0_i32_1 = arith.constant 0 : i32
    return %arg1, %c0_i32, %c0_i32_0 : i32, i32, i32
  }
  func.func @transform_22(%arg0: i32, %arg1: i32) -> (i32, i32, i32) {
    %c0_i32 = arith.constant 0 : i32
    %c0_i32_0 = arith.constant 0 : i32
    %c0_i32_1 = arith.constant 0 : i32
    return %arg1, %c0_i32, %c0_i32_0 : i32, i32, i32
  }
  func.func @transform_23(%arg0: i32, %arg1: i32) -> (i32, i32, i32) {
    %c0_i32 = arith.constant 0 : i32
    %c0_i32_0 = arith.constant 0 : i32
    %c0_i32_1 = arith.constant 0 : i32
    return %arg1, %c0_i32, %c0_i32_0 : i32, i32, i32
  }
  func.func @transform_24(%arg0: i32, %arg1: i32) -> (i32, i32, i32) {
    %c0_i32 = arith.constant 0 : i32
    %c0_i32_0 = arith.constant 0 : i32
    %c0_i32_1 = arith.constant 0 : i32
    return %arg1, %c0_i32, %c0_i32_0 : i32, i32, i32
  }
  func.func @transform_25(%arg0: i32, %arg1: i32) -> (i32, i32, i32) {
    %c0_i32 = arith.constant 0 : i32
    %c0_i32_0 = arith.constant 0 : i32
    %c0_i32_1 = arith.constant 0 : i32
    return %arg1, %c0_i32, %c0_i32_0 : i32, i32, i32
  }
  func.func @transform_26(%arg0: i32, %arg1: i32) -> (i32, i32, i32) {
    %c0_i32 = arith.constant 0 : i32
    %c0_i32_0 = arith.constant 0 : i32
    %c0_i32_1 = arith.constant 0 : i32
    return %arg1, %c0_i32, %c0_i32_0 : i32, i32, i32
  }
  func.func @transform_27(%arg0: i32, %arg1: i32) -> (i32, i32, i32) {
    %c0_i32 = arith.constant 0 : i32
    %c0_i32_0 = arith.constant 0 : i32
    %c0_i32_1 = arith.constant 0 : i32
    return %arg1, %c0_i32, %c0_i32_0 : i32, i32, i32
  }
  func.func @transform_28(%arg0: i32, %arg1: i32) -> (i32, i32, i32) {
    %c0_i32 = arith.constant 0 : i32
    %c0_i32_0 = arith.constant 0 : i32
    %c0_i32_1 = arith.constant 0 : i32
    return %arg1, %c0_i32, %c0_i32_0 : i32, i32, i32
  }
  func.func @transform_29(%arg0: i32, %arg1: i32) -> (i32, i32, i32) {
    %c0_i32 = arith.constant 0 : i32
    %c0_i32_0 = arith.constant 0 : i32
    %c0_i32_1 = arith.constant 0 : i32
    return %arg1, %c0_i32, %c0_i32_0 : i32, i32, i32
  }
  func.func @transform_30(%arg0: i32, %arg1: i32) -> (i32, i32, i32) {
    %c0_i32 = arith.constant 0 : i32
    %c0_i32_0 = arith.constant 0 : i32
    %c0_i32_1 = arith.constant 0 : i32
    return %arg1, %c0_i32, %c0_i32_0 : i32, i32, i32
  }
  func.func @transform_31(%arg0: i32, %arg1: i32) -> (i32, i32) {
    %c0_i32 = arith.constant 0 : i32
    %c0_i32_0 = arith.constant 0 : i32
    %c0_i32_1 = arith.constant 0 : i32
    return %c0_i32, %c0_i32_0 : i32, i32
  }
  func.func @transform_32(%arg0: i32, %arg1: i32) -> (i32, i32) {
    %c0_i32 = arith.constant 0 : i32
    %c0_i32_0 = arith.constant 0 : i32
    %c0_i32_1 = arith.constant 0 : i32
    return %c0_i32, %c0_i32_0 : i32, i32
  }
  func.func @transform_33(%arg0: i32, %arg1: i32) -> (i32, i32) {
    %c0_i32 = arith.constant 0 : i32
    %c0_i32_0 = arith.constant 0 : i32
    %c0_i32_1 = arith.constant 0 : i32
    return %c0_i32, %c0_i32_0 : i32, i32
  }
  func.func @transform_34(%arg0: i32, %arg1: i32) -> (i32, i32) {
    %c0_i32 = arith.constant 0 : i32
    %c0_i32_0 = arith.constant 0 : i32
    %c0_i32_1 = arith.constant 0 : i32
    return %c0_i32, %c0_i32_0 : i32, i32
  }
  func.func @transform_35(%arg0: i32, %arg1: i32) -> (i32, i32, i32) {
    %c0_i32 = arith.constant 0 : i32
    %c0_i32_0 = arith.constant 0 : i32
    %c0_i32_1 = arith.constant 0 : i32
    return %arg0, %c0_i32, %c0_i32_0 : i32, i32, i32
  }
}

</mosaic_0001>

<bundles_post_ra>
// kernel: _lambda_.2
= control target key start
LH: loop header
LB: loop body
LE: loop exit
PB: predicated region body
PF: predicated region fallthrough
CT: control target
= control target key end

     0   :  { %s3838_s28 = smov 0   ;;  %s3840_s29 = smov 0   ;;  %s4437_s0 = inlined_call_operand.vmem [shape: f32[2,16,128], index: 0, kind: input, shape index: {}]   ;;  %s4438_s1 = inlined_call_operand.vmem [shape: f32[16,128], index: 1, kind: input, shape index: {}]   ;;  %s4439_s2 = inlined_call_operand.vmem [shape: f32[2,1,16], index: 2, kind: input, shape index: {}]   ;;  %s4440_s3 = inlined_call_operand.vmem [shape: f32[1,64,128], index: 3, kind: input, shape index: {}]   ;;  %s4441_s4 = inlined_call_operand.vmem [shape: bf16[128,128], index: 4, kind: input, shape index: {}]   ;;  %s4442_s5 = inlined_call_operand.vmem [shape: f32[1,128], index: 5, kind: input, shape index: {}]   ;;  %s4443_s6 = inlined_call_operand.vmem [shape: f32[2,1,128], index: 6, kind: input, shape index: {}, may-alias: {6,12}]   ;;  %s4444_s7 = inlined_call_operand.vmem [shape: f32[2,1,128], index: 7, kind: input, shape index: {}, may-alias: {7,13}]   ;;  %s4445_s8 = inlined_call_operand.vmem [shape: bf16[2,128,384], index: 8, kind: input, shape index: {}]   ;;  %s4446_s9 = inlined_call_operand.vmem [shape: f32[2,1,384], index: 9, kind: input, shape index: {}]   ;;  %s4447_s10 = inlined_call_operand.vmem [shape: bf16[2,128,128], index: 10, kind: input, shape index: {}]   ;;  %s4448_s11 = inlined_call_operand.vmem [shape: f32[2,1,128], index: 11, kind: input, shape index: {}]   ;;  %s4449_s12 = inlined_call_operand.vmem [shape: f32[2,1,128], index: 12, kind: input, shape index: {}, may-alias: {6,12}]   ;;  %s4450_s13 = inlined_call_operand.vmem [shape: f32[2,1,128], index: 13, kind: input, shape index: {}, may-alias: {7,13}]   ;;  %s4451_s14 = inlined_call_operand.vmem [shape: bf16[2,128,128], index: 14, kind: input, shape index: {}]   ;;  %s4452_s15 = inlined_call_operand.vmem [shape: f32[2,1,128], index: 15, kind: input, shape index: {}]   ;;  %s4453_s16 = inlined_call_operand.vmem [shape: bf16[2,128,128], index: 16, kind: input, shape index: {}]   ;;  %s4454_s17 = inlined_call_operand.vmem [shape: f32[2,1,128], index: 17, kind: input, shape index: {}]   ;;  %s4455_s18 = inlined_call_operand.vmem [shape: f32[1,128], index: 18, kind: input, shape index: {}]   ;;  %s4456_s19 = inlined_call_operand.vmem [shape: f32[1,128], index: 19, kind: input, shape index: {}]   ;;  %s4457_s20 = inlined_call_operand.vmem [shape: bf16[128,128], index: 20, kind: input, shape index: {}]   ;;  %s4458_s21 = inlined_call_operand.vmem [shape: f32[1,128], index: 21, kind: input, shape index: {}]   ;;  %s4459_s22 = inlined_call_operand.vmem [shape: f32[2,16,128], index: 22, kind: output, shape index: {}]  }
   0x1   :  { %4470 = sst [smem:[#allocation6_spill]] %s4437_s0 }
   0x2   :  { %4471 = sst [smem:[#allocation7_spill]] %s4438_s1 }
   0x3   :  { %4472 = sst [smem:[#allocation8_spill]] %s4439_s2 }
   0x4   :  { %4473 = sst [smem:[#allocation9_spill]] %s4440_s3  ;;  %s3836_s3 = smov 0  }
   0x5   :  { %4474 = sst [smem:[#allocation10_spill]] %s4441_s4 }
   0x6   :  { %4475 = sst [smem:[#allocation11_spill]] %s4442_s5 }
   0x7   :  { %4476 = sst [smem:[#allocation12_spill]] %s4443_s6 }
   0x8   :  { %4477 = sst [smem:[#allocation13_spill]] %s4447_s10 }
   0x9   :  { %4478 = sst [smem:[#allocation14_spill]] %s4455_s18 }
   0xa   :  { %4479 = sst [smem:[#allocation15_spill]] %s4456_s19 }
   0xb   :  { %4480 = sst [smem:[#allocation16_spill]] %s4457_s20 }
   0xc   :  { %4481 = sst [smem:[#allocation17_spill]] %s4458_s21 }
   0xd   :  { %4482 = sst [smem:[#allocation18_spill]] %s4459_s22 }
   0xe LB: > { %4483 = sst [smem:[#allocation3_spill]] %s3714_s28  ;;  %s41_s30 = sadd.s32 1, %s3714_s28  ;;  %s3718_s29 = sphi %s3840_s29, %s32_s29   ;;  %s3714_s28 = sphi %s3838_s28, %s4507_s28   ;;  %s3710_s3 = sphi %s3836_s3, %s4506_s3  }
   0xf   : > { %4484 = sst [smem:[#allocation4_spill]] %s3718_s29  ;;  %p3085_p0 = scmp.ge.s32.totalorder %s3718_s29, 1 }
  0x10   : > { %p42_p1 = scmp.ge.s32.totalorder %s41_s30, 2  ;;  %p741_p2 = scmp.lt.s32.totalorder %s3718_s29, 3 }
  0x12   : > { %s4509_s30 = smov (%p42_p1, %s41_s30), 0  ;;  %p742_p3 = pnand %p3085_p0, %p741_p2 }
  0x13   : > { %4485 = sst [smem:[#allocation5_spill]] %s4509_s30  ;;  %p866_p4 = scmp.lt.s32.totalorder (!%p742_p3), %s3710_s3, 1 }
  0x14   : > { %745 = sbr.rel (%p742_p3) target bundleno = 2736 (0xab0), region = 108  ;;  %s4486_s23 = sld [smem:[#allocation9_spill]] (!%p742_p3) }
  0x15   : > { %s4488_s10 = sld [smem:[#allocation13_spill]] (!%p742_p3)  ;;  %p3093_p5 = scmp.ne.s32.totalorder (!%p742_p3), %s3710_s3, 0 }
  0x1a   : > { %v3860_v0 = vld [vmem:[%s4486_s23] sm:$0xff] (!%p742_p3)  ;;  %v3865_v1 = vld [vmem:[%s4486_s23 + $0x8] sm:$0xff] (!%p742_p3)  ;;  %v3870_v2 = vld [vmem:[%s4486_s23 + $0x10] sm:$0xff] (!%p742_p3) }
  0x1b   : > { %v3875_v3 = vld [vmem:[%s4486_s23 + $0x18] sm:$0xff]  ;;  %v3880_v4 = vld [vmem:[%s4486_s23 + $0x20] sm:$0xff]  ;;  %v3885_v5 = vld [vmem:[%s4486_s23 + $0x28] sm:$0xff]  ;;  %s3888_s1 = scalar_select %p866_p4, %s3710_s3, 1 }
  0x1c   : > { %v3893_v6 = vld [vmem:[%s4486_s23 + $0x30] sm:$0xff]  ;;  %v3898_v7 = vld [vmem:[%s4486_s23 + $0x38] sm:$0xff]  ;;  %930 = sbr.rel (%p3093_p5) target bundleno = 287 (0x11f), region = 112  ;;  %s4489_s6 = sld [smem:[#allocation10_spill]] (!%p3093_p5)  ;;  %v1057_v22 = vlaneseq (!%p3093_p5) }
  0x1d   : > { %s3497_s30 = smul.u32 192, %s3888_s1  ;;  %s3192_s28 = sshll.u32 %s3888_s1, 6 }
  0x1e   : > { %s3498_s29 = smul.u32 3, %s3888_s1  ;;  %s3914_s19 = scalar_lea.vmem %s4488_s10, %s3192_s28  ;;  %v1058_v23 = vshrl.u32 (!%p3093_p5), %v1057_v22, 7 }
  0x1f   : > { %s3919_s23 = scalar_lea.vmem %s4445_s8, %s3497_s30  ;;  %s3941_s25 = scalar_lea.vmem %s4451_s14, %s3192_s28 }
  0x20   : > { %s3928_s5 = scalar_lea.vmem %s4446_s9, %s3498_s29  ;;  %s902_s2 = scalar_lea.vmem %s4452_s15, %s3888_s1  ;;  %vm1062_vm0 = vcmp.ge.s32.totalorder (!%p3093_p5), %v1058_v23, 2 }
  0x21   : > { %s3950_s0 = scalar_lea.vmem %s4453_s16, %s3192_s28  ;;  %s910_s21 = scalar_lea.vmem %s4454_s17, %s3888_s1 }
  0x22   : > { %v3524_v8 = vld [vmem:[%s4489_s6] sm:$0xff] (!%p3093_p5)   ;;  %v3525_v9 = vld [vmem:[%s4489_s6 + $0x8] sm:$0xff] (!%p3093_p5)   ;;  %v3526_v10 = vld [vmem:[%s4489_s6 + $0x10] sm:$0xff] (!%p3093_p5)   ;;  %s4490_s24 = sld [smem:[#allocation6_spill]] (!%p3093_p5)  ;;  %s4491_s26 = sld [smem:[#allocation11_spill]] (!%p3093_p5) }
  0x23   : > { %3295 = vmatprep.subr.bf16.mxu0 %v3524_v8  ;;  %v3527_v11 = vld [vmem:[%s4489_s6 + $0x18] sm:$0xff]   ;;  %v3528_v15 = vld [vmem:[%s4489_s6 + $0x20] sm:$0xff]   ;;  %v3529_v16 = vld [vmem:[%s4489_s6 + $0x28] sm:$0xff]   ;;  %s4492_s4 = sld [smem:[#allocation7_spill]] }
  0x24   : > { %3296 = vmatpush3.bf16.msra.mxu0 %v3524_v8  ;;  %v3530_v17 = vld [vmem:[%s4489_s6 + $0x30] sm:$0xff]   ;;  %v3531_v18 = vld [vmem:[%s4489_s6 + $0x38] sm:$0xff]  }
  0x25   : > { %3297 = vmatprep.subr.bf16.mxu0 %v3525_v9 }
  0x28   : > { %3298 = vmatpush3.bf16.msra.mxu0 %v3525_v9  ;;  %v931_v12 = vld [vmem:[%s4490_s24] sm:$0xff]  ;;  %v932_v13 = vld [vmem:[%s4490_s24 + $0x8] sm:$0xff]  ;;  %v933_v19 = vld [vmem:[%s4490_s24 + $0x10] sm:$0xff] }
  0x29   : > { %3299 = vmatprep.subr.bf16.mxu0 %v3526_v10  ;;  %v935_v14 = vpack.c.bf16 %v932_v13, %v931_v12  ;;  %v934_v20 = vld [vmem:[%s4490_s24 + $0x18] sm:$0xff]  ;;  %v3094_v24 = vld [vmem:[%s4491_s26] ss:$0 sm:$0xff]  ;;  %v1061_v31 = vld [vmem:[%s4492_s4 + $0x8] sm:$0xff] }
  0x2a   : > { %v936_v21 = vpack.c.bf16 %v934_v20, %v933_v19  ;;  %v1060_v27 = vld [vmem:[%s4492_s4] sm:$0xff] }
  0x2b   : > { %3311 = vmatprep.mubr.bf16.mxu0 %v935_v14 }
  0x2c   : > { %3300 = vmatpush3.bf16.msra.mxu0 %v3526_v10 }
  0x2d   : > { %3301 = vmatprep.subr.bf16.mxu0 %v3527_v11 }
  0x30   : > { %3302 = vmatpush3.bf16.msra.mxu0 %v3527_v11 }
  0x31   : > { %3303 = vmatprep.subr.bf16.mxu0 %v3528_v15 }
  0x34   : > { %3304 = vmatpush3.bf16.msra.mxu0 %v3528_v15 }
  0x35   : > { %3305 = vmatprep.subr.bf16.mxu0 %v3529_v16 }
  0x38   : > { %3306 = vmatpush3.bf16.msra.mxu0 %v3529_v16 }
  0x39   : > { %3307 = vmatprep.subr.bf16.mxu0 %v3530_v17 }
  0x3c   : > { %3308 = vmatpush3.bf16.msra.mxu0 %v3530_v17 }
  0x3d   : > { %3309 = vmatprep.subr.bf16.mxu0 %v3531_v18 }
  0x40   : > { %3310 = vmatpush3.bf16.msra.mxu0 %v3531_v18 }
  0x43   : > { %3312 = vmatmul.mubr.bf16.vlgmr.msra.gmra.mrb[0].mxu0 %v936_v21 }
 0x116   : > { %v3313_v25 = vpop.f32.mrb[0].mxu0 }
 0x117   : > { %v1051_v26 = vadd.f32 %v3313_v25, %v3094_v24  ;;  %v1042_v28 = vpop.f32.mrb[1].mxu0 }
 0x118   : > { %v1043_v29 = vadd.f32 %v3094_v24, %v1042_v28  ;;  %v3314_v30 = vpop.f32.mrb[2].mxu0 }
 0x119   : > { %v1070_v32 = vsel %vm1062_vm0, %v1051_v26, 0.0  ;;  %v1054_v33 = vadd.f32 %v3314_v30, %v3094_v24  ;;  %v1045_v34 = vpop.f32.mrb[3].mxu0 }
 0x11a   : > { %v1074_v35 = vadd.f32 %v1070_v32, %v1060_v27  ;;  %v1068_v36 = vsel %vm1062_vm0, %v1043_v29, 0.0  ;;  %v1046_v37 = vadd.f32 %v3094_v24, %v1045_v34 }
 0x11b   : > { %v1072_v38 = vadd.f32 %v1068_v36, %v1060_v27  ;;  %v1075_v39 = vadd.f32 %v1061_v31, %v1054_v33 }
 0x11c   : > { %1078 = vst [vmem:[#allocation2 + $0x10] sm:$0xff] %v1074_v35  ;;  %v1073_v40 = vadd.f32 %v1061_v31, %v1046_v37 }
 0x11d   : > { %1076 = vst [vmem:[#allocation2] sm:$0xff] %v1072_v38  ;;  %1079 = vst [vmem:[#allocation2 + $0x18] sm:$0xff] %v1075_v39 }
 0x11e   : > { %1077 = vst [vmem:[#allocation2 + $0x8] sm:$0xff] %v1073_v40 }
 0x11f PF: > { %v3532_v49 = vld [vmem:[%s3919_s23 + $0x4] ss:$12 sps:$4 sm:$0xff]   ;;  %v3534_v50 = vld [vmem:[%s3919_s23] ss:$12 sps:$4 sm:$0xff]   ;;  %v3535_v51 = vld [vmem:[%s3919_s23 + $0x1c] ss:$12 sps:$4 sm:$0xff]   ;;  %s4495_s27 = scalar_lea.vmem %s4444_s7, %s3888_s1  ;;  %s4498_s18 = scalar_lea.vmem %s4449_s12, %s3888_s1 }
 0x120   : > { %1343 = vmatprep.subr.bf16.mxu0 %v3532_v49  ;;  %v3537_v52 = vld [vmem:[%s3919_s23 + $0x18] ss:$12 sps:$4 sm:$0xff]   ;;  %v3538_v53 = vld [vmem:[%s3919_s23 + $0x34] ss:$12 sps:$4 sm:$0xff]   ;;  %v3541_v55 = vld [vmem:[%s3919_s23 + $0x30] ss:$12 sps:$4 sm:$0xff]  }
 0x121   : > { %1344 = vmatpush1.bf16.msra.mxu0 %v3534_v50  ;;  %v3540_v54 = vld [vmem:[%s3919_s23 + $0x8] ss:$12 sps:$4 sm:$0xff]   ;;  %v3542_v56 = vld [vmem:[%s3919_s23 + $0x4c] ss:$12 sps:$4 sm:$0xff]   ;;  %v3546_v59 = vld [vmem:[%s3919_s23 + $0x64] ss:$12 sps:$4 sm:$0xff]  }
 0x122   : > { %1345 = vmatprep.subr.bf16.mxu0 %v3535_v51  ;;  %3315 = vmatprep.subr.bf16.mxu1 %v3540_v54  ;;  %v3544_v57 = vld [vmem:[%s3919_s23 + $0x20] ss:$12 sps:$4 sm:$0xff]   ;;  %v3545_v58 = vld [vmem:[%s3919_s23 + $0x48] ss:$12 sps:$4 sm:$0xff]   ;;  %v3548_v60 = vld [vmem:[%s3919_s23 + $0x38] ss:$12 sps:$4 sm:$0xff]  }
 0x123   : > { %v4011_v45 = vld [vmem:[#allocation2 + $0x10] sm:$0xff]  ;;  %3316 = vmatpush3.bf16.msra.mxu1 %v3540_v54  ;;  %v3549_v61 = vld [vmem:[%s3919_s23 + $0x60] ss:$12 sps:$4 sm:$0xff]   ;;  %v3550_v62 = vld [vmem:[%s3919_s23 + $0x7c] ss:$12 sps:$4 sm:$0xff]   ;;  %v3720_v14 = vmov 0  }
 0x124   : > { %v4002_v41 = vld [vmem:[#allocation2] sm:$0xff]  ;;  %v4014_v46 = vld [vmem:[#allocation2 + $0x18] sm:$0xff]  ;;  %v1100_v47 = vmul.f32 %v4011_v45, %v4011_v45  ;;  %3317 = vmatprep.subr.bf16.mxu1 %v3544_v57  ;;  %v3556_v10 = vld [vmem:[%s3919_s23 + $0x68] ss:$12 sps:$4 sm:$0xff]   ;;  %1375 = vmatprep.mubr.bf16.mxu0 %v3720_v14  ;;  %s4493_s30 = sld [smem:[#allocation12_spill]]  ;;  %s4496_s10 = sld [smem:[#allocation8_spill]] }
 0x125   : > { %v4004_v42 = vld [vmem:[#allocation2 + $0x8] sm:$0xff]  ;;  %1086 = vadd.xlane.f32.xlu0 %v4002_v41  ;;  %v1098_v43 = vmul.f32 %v4002_v41, %v4002_v41  ;;  %v1101_v48 = vmul.f32 %v4014_v46, %v4014_v46  ;;  %1346 = vmatpush1.bf16.msra.mxu0 %v3537_v52  ;;  %v3552_v63 = vld [vmem:[%s3919_s23 + $0x50] ss:$12 sps:$4 sm:$0xff]   ;;  %v3553_v8 = vld [vmem:[%s3919_s23 + $0x78] ss:$12 sps:$4 sm:$0xff]   ;;  %vm1715_vm1 = vcmask 130048  }
 0x126   : > { %v1099_v44 = vmul.f32 %v4004_v42, %v4004_v42  ;;  %1347 = vmatprep.subr.bf16.mxu0 %v3538_v53  ;;  %v3554_v9 = vld [vmem:[%s3919_s23 + $0x94] ss:$12 sps:$4 sm:$0xff]   ;;  %v3557_v11 = vld [vmem:[%s3919_s23 + $0x90] ss:$12 sps:$4 sm:$0xff]   ;;  %v3558_v12 = vld [vmem:[%s3919_s23 + $0xac] ss:$12 sps:$4 sm:$0xff]  }
 0x127   : > { %1102 = vadd.xlane.f32.xlu1 %v1098_v43  ;;  %3318 = vmatpush3.bf16.msra.mxu1 %v3544_v57  ;;  %v3560_v13 = vld [vmem:[%s3919_s23 + $0x80] ss:$12 sps:$4 sm:$0xff]   ;;  %v3561_v15 = vld [vmem:[%s3919_s23 + $0xa8] ss:$12 sps:$4 sm:$0xff]   ;;  %v3562_v16 = vld [vmem:[%s3919_s23 + $0x98] ss:$12 sps:$4 sm:$0xff]  }
 0x128   : > { %3319 = vmatprep.subr.bf16.mxu1 %v3548_v60  ;;  %v3563_v17 = vld [vmem:[%s3919_s23 + $0xb0] ss:$12 sps:$4 sm:$0xff]   ;;  %p3176_p6 = scmp.ne.s32.totalorder %s3710_s3, 1 }
 0x129   : > { %1088 = vadd.xlane.f32.xlu0 %v4004_v42  ;;  %1348 = vmatpush1.bf16.msra.mxu0 %v3541_v55  ;;  %s4501_s23 = sld [smem:[#allocation14_spill]] (!%p3176_p6) }
 0x12a   : > { %1349 = vmatprep.subr.bf16.mxu0 %v3542_v56  ;;  %s4494_s28 = scalar_lea.vmem %s4493_s30, %s3888_s1  ;;  %s4497_s30 = scalar_lea.vmem %s4448_s11, %s3888_s1 }
 0x12b   : > { %1104 = vadd.xlane.f32.xlu1 %v1099_v44  ;;  %3320 = vmatpush3.bf16.msra.mxu1 %v3548_v60  ;;  %v3103_v57 = vld [vmem:[%s4494_s28] ss:$0 sm:$0xff] }
 0x12c   : > { %3321 = vmatprep.subr.bf16.mxu1 %v3552_v63 }
 0x12d   : > { %1090 = vadd.xlane.f32.xlu0 %v4011_v45  ;;  %1350 = vmatpush1.bf16.msra.mxu0 %v3545_v58 }
 0x12e   : > { %1351 = vmatprep.subr.bf16.mxu0 %v3546_v59 }
 0x12f   : > { %1092 = vadd.xlane.f32.xlu1 %v4014_v46  ;;  %3322 = vmatpush3.bf16.msra.mxu1 %v3552_v63 }
 0x130   : > { %3323 = vmatprep.subr.bf16.mxu1 %v3556_v10 }
 0x131   : > { %1106 = vadd.xlane.f32.xlu0 %v1100_v47  ;;  %1352 = vmatpush1.bf16.msra.mxu0 %v3549_v61 }
 0x132   : > { %1353 = vmatprep.subr.bf16.mxu0 %v3550_v62 }
 0x133   : > { %1108 = vadd.xlane.f32.xlu1 %v1101_v48  ;;  %3324 = vmatpush3.bf16.msra.mxu1 %v3556_v10 }
 0x134   : > { %3325 = vmatprep.subr.bf16.mxu1 %v3560_v13 }
 0x135   : > { %1354 = vmatpush1.bf16.msra.mxu0 %v3553_v8 }
 0x136   : > { %1355 = vmatprep.subr.bf16.mxu0 %v3554_v9 }
 0x137   : > { %3326 = vmatpush3.bf16.msra.mxu1 %v3560_v13 }
 0x138   : > { %3327 = vmatprep.subr.bf16.mxu1 %v3562_v16 }
 0x139   : > { %1356 = vmatpush1.bf16.msra.mxu0 %v3557_v11 }
 0x13a   : > { %1357 = vmatprep.subr.bf16.mxu0 %v3558_v12 }
 0x13b   : > { %3328 = vmatpush3.bf16.msra.mxu1 %v3562_v16 }
 0x13c   : > { %3329 = vmatprep.subr.bf16.mxu1 %v3563_v17 }
 0x13d   : > { %1358 = vmatpush1.bf16.msra.mxu0 %v3561_v15 }
 0x13f   : > { %3330 = vmatpush3.bf16.msra.mxu1 %v3563_v17 }
 0x1b2   : > { %v1087_v18 = vpop.xlane.xlu0 %1086 }
 0x1b3   : > { %v1094_v19 = vmul.f32 0.03125, %v1087_v18 }
 0x1b4   : > { %v1103_v20 = vpop.xlane.xlu1 %1102 }
 0x1b5   : > { %v1114_v21 = vmul.f32 %v1094_v19, %v1094_v19  ;;  %v1110_v22 = vmul.f32 0.03125, %v1103_v20  ;;  %v1126_v53 = vsub.f32 %v4002_v41, %v1094_v19  ;;  %v3104_v41 = vld [vmem:[%s4495_s27] ss:$0 sm:$0xff] }
 0x1b6   : > { %v1089_v23 = vpop.xlane.xlu0 %1088 }
 0x1b7   : > { %v1118_v24 = vsub.f32 %v1110_v22, %v1114_v21  ;;  %v1095_v25 = vmul.f32 0.03125, %v1089_v23 }
 0x1b8   : > { %v1105_v26 = vpop.xlane.xlu1 %1104 }
 0x1b9   : > { %v1122_v27 = vmax.f32 %v1118_v24, 0.0  ;;  %v1115_v28 = vmul.f32 %v1095_v25, %v1095_v25  ;;  %v1111_v29 = vmul.f32 0.03125, %v1105_v26  ;;  %v1127_v58 = vsub.f32 %v4004_v42, %v1095_v25 }
 0x1ba   : > { %v1091_v30 = vpop.xlane.xlu0 %1090 }
 0x1bb   : > { %v1130_v31 = vadd.f32 1e-05, %v1122_v27  ;;  %v1119_v32 = vsub.f32 %v1111_v29, %v1115_v28  ;;  %v1096_v33 = vmul.f32 0.03125, %v1091_v30 }
 0x1bc   : > { %v1093_v34 = vpop.xlane.xlu1 %1092 }
 0x1bd   : > { %3588 = vrsqrt.f32 %v1130_v31  ;;  %v1123_v35 = vmax.f32 %v1119_v32, 0.0  ;;  %v1116_v36 = vmul.f32 %v1096_v33, %v1096_v33  ;;  %v1097_v37 = vmul.f32 0.03125, %v1093_v34 }
 0x1be   : > { %v1107_v38 = vpop.xlane.xlu0 %1106  ;;  %v1128_v63 = vsub.f32 %v4011_v45, %v1096_v33  ;;  %v1200_v45 = vlaneseq }
 0x1bf   : > { %v1131_v39 = vadd.f32 1e-05, %v1123_v35  ;;  %v1112_v40 = vmul.f32 0.03125, %v1107_v38  ;;  %v1117_v43 = vmul.f32 %v1097_v37, %v1097_v37  ;;  %v1129_v11 = vsub.f32 %v4014_v46, %v1097_v37  ;;  %v1198_v46 = vld [vmem:[%s3928_s5] sm:$0x7]  ;;  %s4499_s5 = scalar_lea.vmem %s4450_s13, %s3888_s1 }
 0x1c0   : > { %v1109_v44 = vpop.xlane.xlu1 %1108  ;;  %v1201_v21 = vshrl.u32 %v1200_v45, 7 }
 0x1c1   : > { %3590 = vrsqrt.f32 %v1131_v39  ;;  %v1120_v47 = vsub.f32 %v1112_v40, %v1116_v36  ;;  %v1113_v48 = vmul.f32 0.03125, %v1109_v44 }
 0x1c2   : > { %v1202_v22 = vsub.s32 0, %v1201_v21  ;;  %v1206_v23 = vsub.s32 1, %v1201_v21  ;;  %v1210_v32 = vsub.s32 2, %v1201_v21 }
 0x1c3   : > { %v1124_v49 = vmax.f32 %v1120_v47, 0.0  ;;  %v1121_v50 = vsub.f32 %v1113_v48, %v1117_v43 }
 0x1c4   : > { %v1203_v24 = vrot.slane %v1198_v46, %v1202_v22  ;;  %v1207_v26 = vrot.slane %v1198_v46, %v1206_v23  ;;  %v1211_v36 = vrot.slane %v1198_v46, %v1210_v32 }
 0x1c5   : > { %v1132_v51 = vadd.f32 1e-05, %v1124_v49  ;;  %v1125_v52 = vmax.f32 %v1121_v50, 0.0 }
 0x1c7   : > { %v3589_v54 = vpop.eup %3588  ;;  %3592 = vrsqrt.f32 %v1132_v51  ;;  %v1133_v55 = vadd.f32 1e-05, %v1125_v52 }
 0x1c8   : > { %v1138_v56 = vmul.f32 %v3589_v54, %v1126_v53 }
 0x1c9   : > { %3594 = vrsqrt.f32 %v1133_v55 }
 0x1ca   : > { %v1149_v61 = vmul.f32 %v3103_v57, %v1138_v56 }
 0x1cb   : > { %v3591_v59 = vpop.eup %3590 }
 0x1cc   : > { %v1139_v60 = vmul.f32 %v3591_v59, %v1127_v58  ;;  %v1160_v8 = vadd.f32 %v3104_v41, %v1149_v61 }
 0x1ce   : > { %v1150_v62 = vmul.f32 %v3103_v57, %v1139_v60 }
 0x1d0   : > { %v1161_v9 = vadd.f32 %v3104_v41, %v1150_v62 }
 0x1d1   : > { %v3593_v10 = vpop.eup %3592 }
 0x1d2   : > { %v1164_v12 = vpack.c.bf16 %v1161_v9, %v1160_v8  ;;  %v1140_v13 = vmul.f32 %v3593_v10, %v1128_v63 }
 0x1d3   : > { %v3595_v42 = vpop.eup %3594 }
 0x1d4   : > { %1376 = vmatmul.mubr.bf16.vlgmr.msra.gmra.mrb[0].mxu0 %v1164_v12  ;;  %3331 = vmatprep.mubr.bf16.mxu1 %v1164_v12  ;;  %v1141_v15 = vmul.f32 %v3595_v42, %v1129_v11  ;;  %v1151_v16 = vmul.f32 %v3103_v57, %v1140_v13 }
 0x1d5   : > { %1385 = vmatprep.mubr.bf16.mxu0 %v3720_v14 }
 0x1d6   : > { %v1152_v17 = vmul.f32 %v3103_v57, %v1141_v15  ;;  %v1162_v18 = vadd.f32 %v3104_v41, %v1151_v16 }
 0x1d8   : > { %v1163_v19 = vadd.f32 %v3104_v41, %v1152_v17 }
 0x1da   : > { %v1165_v20 = vpack.c.bf16 %v1163_v19, %v1162_v18 }
 0x1dc   : > { %1386 = vmatmul.mubr.bf16.gmra.mrb[4].mxu0 %v1165_v20  ;;  %3332 = vmatmul.mubr.bf16.vlgmr.msra.gmra.mrb[0].mxu1 %v1165_v20  ;;  %v3129_v20 = vld [vmem:[%s4496_s10] ss:$0 sm:$0xff] }
 0x2a7   : > { %v1377_v25 = vpop.f32.mrb[0].mxu0 }
 0x2a8   : > { %v1378_v27 = vadd.f32 %v1377_v25, %v1203_v24  ;;  %v1379_v28 = vpop.f32.mrb[1].mxu0 }
 0x2a9   : > { %v1381_v29 = vpop.f32.mrb[2].mxu0  ;;  %v1380_v33 = vadd.f32 %v1379_v28, %v1207_v26 }
 0x2aa   : > { %v1383_v30 = vpop.f32.mrb[3].mxu0  ;;  %v1445_v14 = vmul.f32 %v1378_v27, %v3860_v0  ;;  %v1451_v31 = vmul.f32 %v1378_v27, %v3893_v6  ;;  %v1382_v43 = vadd.f32 %v1381_v29, %v1203_v24  ;;  %v1447_v61 = vmul.f32 %v1378_v27, %v3870_v2 }
 0x2ab   : > { %v1384_v34 = vadd.f32 %v1383_v30, %v1207_v26  ;;  %v1449_v63 = vmul.f32 %v1378_v27, %v3880_v4 }
 0x2ac   : > { %3339 = vmatprep.mubr.f32.mxu0 %v1445_v14  ;;  %3348 = vmatprep.mubr.f32.mxu1 %v1451_v31  ;;  %v1446_v57 = vmul.f32 %v1382_v43, %v3865_v1  ;;  %v1452_v60 = vmul.f32 %v1382_v43, %v3898_v7  ;;  %v1448_v41 = vmul.f32 %v1382_v43, %v3875_v3 }
 0x2ad   : > { %v3479_v35 = vpack.c.bf16 %v1384_v34, %v1380_v33  ;;  %v1450_v9 = vmul.f32 %v1382_v43, %v3885_v5 }
 0x2af   : > { %v1387_v37 = vpop.f32.mrb[4].mxu0  ;;  %v3333_v38 = vpop.f32.mrb[0].mxu1  ;;  %3480 = vmatprep.subr.bf16.mxu0 %v3479_v35  ;;  %3495 = vmatprep.subr.bf16.mxu1 %v3479_v35 }
 0x2b0   : > { %v1389_v39 = vpop.f32.mrb[5].mxu0  ;;  %v1430_v40 = vpop.f32.mrb[1].mxu1  ;;  %3482 = vmatpush3.bf16.xpose.msra.mxu0 %v3479_v35  ;;  %3496 = vmatpush3.bf16.xpose.msra.mxu1 %v3479_v35  ;;  %v1439_v48 = vadd.f32 %v3333_v38, %v1211_v36  ;;  %v1388_v62 = vadd.f32 %v1387_v37, %v1203_v24 }
 0x2b1   : > { %v1391_v44 = vpop.f32.mrb[6].mxu0  ;;  %v3334_v47 = vpop.f32.mrb[2].mxu1  ;;  %v1390_v52 = vadd.f32 %v1389_v39, %v1207_v26  ;;  %v1431_v53 = vadd.f32 %v1430_v40, %v1211_v36 }
 0x2b2   : > { %v1442_v49 = vadd.f32 %v3334_v47, %v1211_v36  ;;  %v1393_v50 = vpop.f32.mrb[7].mxu0  ;;  %v1433_v51 = vpop.f32.mrb[3].mxu1  ;;  %v1392_v8 = vadd.f32 %v1391_v44, %v1203_v24  ;;  %v1453_v10 = vmul.f32 %v1388_v62, %v3860_v0  ;;  %v1455_v12 = vmul.f32 %v1388_v62, %v3870_v2 }
 0x2b3   : > { %v1394_v54 = vadd.f32 %v1393_v50, %v1207_v26  ;;  %v1434_v55 = vadd.f32 %v1433_v51, %v1211_v36  ;;  %v1457_v42 = vmul.f32 %v1388_v62, %v3880_v4  ;;  %v1459_v16 = vmul.f32 %v1388_v62, %v3893_v6 }
 0x2b4   : > { %v3491_v56 = vpack.c.bf16 %v1442_v49, %v1439_v48  ;;  %v1454_v11 = vmul.f32 %v1392_v8, %v3865_v1  ;;  %v1456_v13 = vmul.f32 %v1392_v8, %v3875_v3  ;;  %v1458_v15 = vmul.f32 %v1392_v8, %v3885_v5 }
 0x2b5   : > { %v3483_v58 = vpack.c.bf16 %v1394_v54, %v1390_v52  ;;  %v3487_v59 = vpack.c.bf16 %v1434_v55, %v1431_v53  ;;  %v1460_v17 = vmul.f32 %v1392_v8, %v3898_v7  ;;  %v3130_v54 = vld [vmem:[%s4496_s10 + $0x1] ss:$0 sm:$0xff] }
 0x2b7   : > { %3340 = vmatmul.mubr.f32.vlgmr.msra.gmra.mrb[8].mxu0 %v1446_v57  ;;  %3349 = vmatmul.mubr.f32.vlgmr.msra.gmra.mrb[4].mxu1 %v1452_v60 }
 0x2b8   : > { %3484 = vmatprep.subr.bf16.mxu0 %v3483_v58  ;;  %3488 = vmatprep.subr.bf16.mxu1 %v3487_v59 }
 0x2b9   : > { %3342 = vmatprep.mubr.f32.mxu0 %v1447_v61  ;;  %3486 = vmatpush3.bf16.xpose.msra.mxu0 %v3483_v58 }
 0x2ba   : > { %3490 = vmatpush3.bf16.msra.mxu1 %v3487_v59  ;;  %3492 = vmatprep.subr.bf16.mxu0 %v3491_v56 }
 0x2bb   : > { %3343 = vmatmul.mubr.f32.gmra.mrb[10].mxu0 %v1448_v41 }
 0x2bc   : > { %3345 = vmatprep.mubr.f32.mxu0 %v1449_v63 }
 0x2bf   : > { %3346 = vmatmul.mubr.f32.gmra.mrb[12].mxu0 %v1450_v9 }
 0x2c0   : > { %3355 = vmatprep.mubr.f32.mxu0 %v1453_v10 }
 0x2c3   : > { %3356 = vmatmul.mubr.f32.vlgmr.msra.gmra.mrb[14].mxu0 %v1454_v11 }
 0x2c4   : > { %3494 = vmatpush3.bf16.msra.mxu0 %v3491_v56  ;;  %3358 = vmatprep.mubr.f32.mxu0 %v1455_v12 }
 0x2c7   : > { %3359 = vmatmul.mubr.f32.gmra.mrb[16].mxu0 %v1456_v13 }
 0x2c8   : > { %3361 = vmatprep.mubr.f32.mxu0 %v1457_v42 }
 0x2cb   : > { %3362 = vmatmul.mubr.f32.gmra.mrb[18].mxu0 %v1458_v15 }
 0x2cc   : > { %3364 = vmatprep.mubr.f32.mxu0 %v1459_v16 }
 0x2cf   : > { %3365 = vmatmul.mubr.f32.gmra.mrb[20].mxu0 %v1460_v17 }
 0x38a   : > { %v3341_v18 = vpop.f32.mrb[8].mxu0  ;;  %v3350_v19 = vpop.f32.mrb[4].mxu1 }
 0x38b   : > { %v1672_v45 = vmul.f32 0.35355338, %v3341_v18  ;;  %v1678_v21 = vmul.f32 0.35355338, %v3350_v19  ;;  %v1527_v22 = vpop.f32.mrb[9].mxu0  ;;  %v1557_v46 = vpop.f32.mrb[5].mxu1 }
 0x38c   : > { %v1671_v23 = vmul.f32 0.35355338, %v1527_v22  ;;  %v1677_v24 = vmul.f32 0.35355338, %v1557_v46 }
 0x38d   : > { %v4082_v25 = vadd.f32 %v3129_v20, %v1672_v45  ;;  %v4088_v14 = vadd.f32 %v3129_v20, %v1678_v21 }
 0x38e   : > { %v3344_v26 = vpop.f32.mrb[10].mxu0  ;;  %v4084_v27 = vadd.f32 %v3129_v20, %v1671_v23  ;;  %v4092_v33 = vadd.f32 %v3129_v20, %v1677_v24 }
 0x38f   : > { %v1674_v28 = vmul.f32 0.35355338, %v3344_v26  ;;  %v1537_v29 = vpop.f32.mrb[11].mxu0  ;;  %v1719_v30 = vsel %vm1715_vm1, %v4082_v25, -inf  ;;  %v1737_v37 = vsel %vm1715_vm1, %v4088_v14, -inf }
 0x390   : > { %v1673_v31 = vmul.f32 0.35355338, %v1537_v29  ;;  %1720 = vmax.xlane.f32.xlu1 %v1719_v30  ;;  %v1716_v32 = vsel %vm1715_vm1, %v4084_v27, -inf  ;;  %v1734_v40 = vsel %vm1715_vm1, %v4092_v33, -inf }
 0x391   : > { %1717 = vmax.xlane.f32.xlu0 %v1716_v32  ;;  %v4096_v38 = vadd.f32 %v3129_v20, %v1674_v28 }
 0x392   : > { %v3347_v34 = vpop.f32.mrb[12].mxu0  ;;  %v4100_v43 = vadd.f32 %v3129_v20, %v1673_v31 }
 0x393   : > { %v1676_v35 = vmul.f32 0.35355338, %v3347_v34  ;;  %v1547_v36 = vpop.f32.mrb[13].mxu0  ;;  %v1725_v49 = vsel %vm1715_vm1, %v4096_v38, -inf }
 0x394   : > { %v1675_v39 = vmul.f32 0.35355338, %v1547_v36  ;;  %1738 = vmax.xlane.f32.xlu1 %v1737_v37  ;;  %v1722_v52 = vsel %vm1715_vm1, %v4100_v43, -inf }
 0x395   : > { %1735 = vmax.xlane.f32.xlu0 %v1734_v40  ;;  %v4104_v50 = vadd.f32 %v3129_v20, %v1676_v35 }
 0x396   : > { %v3357_v44 = vpop.f32.mrb[14].mxu0  ;;  %v4108_v53 = vadd.f32 %v3129_v20, %v1675_v39 }
 0x397   : > { %v1680_v47 = vmul.f32 0.35355338, %v3357_v44  ;;  %v1632_v48 = vpop.f32.mrb[15].mxu0  ;;  %v1731_v58 = vsel %vm1715_vm1, %v4104_v50, -inf }
 0x398   : > { %v1679_v51 = vmul.f32 0.35355338, %v1632_v48  ;;  %1726 = vmax.xlane.f32.xlu1 %v1725_v49  ;;  %v1728_v61 = vsel %vm1715_vm1, %v4108_v53, -inf }
 0x399   : > { %1723 = vmax.xlane.f32.xlu0 %v1722_v52  ;;  %v4115_v59 = vadd.f32 %v3130_v54, %v1680_v47 }
 0x39a   : > { %v3360_v55 = vpop.f32.mrb[16].mxu0  ;;  %v4119_v41 = vadd.f32 %v3130_v54, %v1679_v51 }
 0x39b   : > { %v1682_v56 = vmul.f32 0.35355338, %v3360_v55  ;;  %v1642_v57 = vpop.f32.mrb[17].mxu0  ;;  %v1743_v9 = vsel %vm1715_vm1, %v4115_v59, -inf }
 0x39c   : > { %v1681_v60 = vmul.f32 0.35355338, %v1642_v57  ;;  %1732 = vmax.xlane.f32.xlu1 %v1731_v58  ;;  %v1740_v12 = vsel %vm1715_vm1, %v4119_v41, -inf }
 0x39d   : > { %1729 = vmax.xlane.f32.xlu0 %v1728_v61  ;;  %v4123_v10 = vadd.f32 %v3130_v54, %v1682_v56 }
 0x39e   : > { %v3363_v62 = vpop.f32.mrb[18].mxu0  ;;  %v4127_v13 = vadd.f32 %v3130_v54, %v1681_v60 }
 0x39f   : > { %v1684_v63 = vmul.f32 0.35355338, %v3363_v62  ;;  %v1652_v8 = vpop.f32.mrb[19].mxu0  ;;  %v1749_v17 = vsel %vm1715_vm1, %v4123_v10, -inf }
 0x3a0   : > { %v1683_v11 = vmul.f32 0.35355338, %v1652_v8  ;;  %1744 = vmax.xlane.f32.xlu1 %v1743_v9  ;;  %v1746_v20 = vsel %vm1715_vm1, %v4127_v13, -inf }
 0x3a1   : > { %1741 = vmax.xlane.f32.xlu0 %v1740_v12  ;;  %v4131_v18 = vadd.f32 %v3130_v54, %v1684_v63 }
 0x3a2   : > { %v3366_v42 = vpop.f32.mrb[20].mxu0  ;;  %v4135_v45 = vadd.f32 %v3130_v54, %v1683_v11 }
 0x3a3   : > { %v1686_v15 = vmul.f32 0.35355338, %v3366_v42  ;;  %v1662_v16 = vpop.f32.mrb[21].mxu0  ;;  %v1755_v21 = vsel %vm1715_vm1, %v4131_v18, -inf }
 0x3a4   : > { %v1685_v19 = vmul.f32 0.35355338, %v1662_v16  ;;  %1750 = vmax.xlane.f32.xlu1 %v1749_v17  ;;  %v1752_v46 = vsel %vm1715_vm1, %v4135_v45, -inf }
 0x3a5   : > { %1747 = vmax.xlane.f32.xlu0 %v1746_v20  ;;  %v4139_v22 = vadd.f32 %v3130_v54, %v1686_v15 }
 0x3a6   : > { %v4143_v23 = vadd.f32 %v3130_v54, %v1685_v19 }
 0x3a7   : > { %v1761_v24 = vsel %vm1715_vm1, %v4139_v22, -inf }
 0x3a8   : > { %1756 = vmax.xlane.f32.xlu1 %v1755_v21  ;;  %v1758_v26 = vsel %vm1715_vm1, %v4143_v23, -inf }
 0x3a9   : > { %1753 = vmax.xlane.f32.xlu0 %v1752_v46 }
 0x3ac   : > { %1762 = vmax.xlane.f32.xlu1 %v1761_v24 }
 0x3ad   : > { %1759 = vmax.xlane.f32.xlu0 %v1758_v26 }
 0x41d   : > { %v1721_v28 = vpop.xlane.xlu1 %1720 }
 0x41e   : > { %v1765_v29 = vsub.f32 %v4082_v25, %v1721_v28  ;;  %v1718_v30 = vpop.xlane.xlu0 %1717 }
 0x41f   : > { %v1764_v31 = vsub.f32 %v4084_v27, %v1718_v30 }
 0x420   : > { %v1782_v32 = vmul.f32 1.442695, %v1765_v29 }
 0x421   : > { %v1780_v34 = vmul.f32 1.442695, %v1764_v31  ;;  %v1739_v35 = vpop.xlane.xlu1 %1738 }
 0x422   : > { %3596 = vpow2.f32 %v1782_v32  ;;  %v1771_v36 = vsub.f32 %v4088_v14, %v1739_v35  ;;  %v1736_v37 = vpop.xlane.xlu0 %1735 }
 0x423   : > { %3598 = vpow2.f32 %v1780_v34  ;;  %v1770_v39 = vsub.f32 %v4092_v33, %v1736_v37 }
 0x424   : > { %v1794_v40 = vmul.f32 1.442695, %v1771_v36 }
 0x425   : > { %v1792_v44 = vmul.f32 1.442695, %v1770_v39  ;;  %v1727_v47 = vpop.xlane.xlu1 %1726 }
 0x426   : > { %3600 = vpow2.f32 %v1794_v40  ;;  %v1767_v48 = vsub.f32 %v4096_v38, %v1727_v47  ;;  %v1724_v25 = vpop.xlane.xlu0 %1723 }
 0x427   : > { %3602 = vpow2.f32 %v1792_v44  ;;  %v1766_v27 = vsub.f32 %v4100_v43, %v1724_v25 }
 0x428   : > { %v1786_v49 = vmul.f32 1.442695, %v1767_v48 }
 0x429   : > { %v1784_v51 = vmul.f32 1.442695, %v1766_v27  ;;  %v1733_v52 = vpop.xlane.xlu1 %1732 }
 0x42a   : > { %3604 = vpow2.f32 %v1786_v49  ;;  %v1769_v14 = vsub.f32 %v4104_v50, %v1733_v52  ;;  %v1730_v54 = vpop.xlane.xlu0 %1729 }
 0x42b   : > { %3606 = vpow2.f32 %v1784_v51  ;;  %v1768_v33 = vsub.f32 %v4108_v53, %v1730_v54 }
 0x42c   : > { %v4157_v55 = vpop.eup %3596  ;;  %v1790_v56 = vmul.f32 1.442695, %v1769_v14 }
 0x42d   : > { %v4159_v57 = vpop.eup %3598  ;;  %v1788_v38 = vmul.f32 1.442695, %v1768_v33  ;;  %v1745_v58 = vpop.xlane.xlu1 %1744  ;;  %v1815_v43 = vsel %vm1715_vm1, %v4157_v55, 0.0 }
 0x42e   : > { %3608 = vpow2.f32 %v1790_v56  ;;  %v1773_v60 = vsub.f32 %v4115_v59, %v1745_v58  ;;  %v1742_v61 = vpop.xlane.xlu0 %1741  ;;  %1816 = vadd.xlane.f32.xlu1 %v1815_v43  ;;  %v1812_v50 = vsel %vm1715_vm1, %v4159_v57, 0.0 }
 0x42f   : > { %3610 = vpow2.f32 %v1788_v38  ;;  %v1772_v53 = vsub.f32 %v4119_v41, %v1742_v61  ;;  %1813 = vadd.xlane.f32.xlu0 %v1812_v50 }
 0x430   : > { %v4167_v62 = vpop.eup %3600  ;;  %v1798_v63 = vmul.f32 1.442695, %v1773_v60 }
 0x431   : > { %v4169_v8 = vpop.eup %3602  ;;  %v1796_v9 = vmul.f32 1.442695, %v1772_v53  ;;  %v1751_v11 = vpop.xlane.xlu1 %1750  ;;  %v1833_v12 = vsel %vm1715_vm1, %v4167_v62, 0.0 }
 0x432   : > { %3612 = vpow2.f32 %v1798_v63  ;;  %v1775_v59 = vsub.f32 %v4123_v10, %v1751_v11  ;;  %v1748_v42 = vpop.xlane.xlu0 %1747  ;;  %1834 = vadd.xlane.f32.xlu1 %v1833_v12  ;;  %v1830_v15 = vsel %vm1715_vm1, %v4169_v8, 0.0 }
 0x433   : > { %3614 = vpow2.f32 %v1796_v9  ;;  %v1774_v41 = vsub.f32 %v4127_v13, %v1748_v42  ;;  %1831 = vadd.xlane.f32.xlu0 %v1830_v15 }
 0x434   : > { %v4177_v16 = vpop.eup %3604  ;;  %v1802_v17 = vmul.f32 1.442695, %v1775_v59 }
 0x435   : > { %v4179_v19 = vpop.eup %3606  ;;  %v1800_v20 = vmul.f32 1.442695, %v1774_v41  ;;  %v1757_v21 = vpop.xlane.xlu1 %1756  ;;  %v1821_v46 = vsel %vm1715_vm1, %v4177_v16, 0.0 }
 0x436   : > { %3616 = vpow2.f32 %v1802_v17  ;;  %v1777_v10 = vsub.f32 %v4131_v18, %v1757_v21  ;;  %v1754_v24 = vpop.xlane.xlu0 %1753  ;;  %1822 = vadd.xlane.f32.xlu1 %v1821_v46  ;;  %v1818_v26 = vsel %vm1715_vm1, %v4179_v19, 0.0 }
 0x437   : > { %3618 = vpow2.f32 %v1800_v20  ;;  %v1776_v13 = vsub.f32 %v4135_v45, %v1754_v24  ;;  %1819 = vadd.xlane.f32.xlu0 %v1818_v26 }
 0x438   : > { %v4187_v28 = vpop.eup %3608  ;;  %v1806_v29 = vmul.f32 1.442695, %v1777_v10 }
 0x439   : > { %v4189_v30 = vpop.eup %3610  ;;  %v1804_v31 = vmul.f32 1.442695, %v1776_v13  ;;  %v1763_v32 = vpop.xlane.xlu1 %1762  ;;  %v1827_v34 = vsel %vm1715_vm1, %v4187_v28, 0.0 }
 0x43a   : > { %3620 = vpow2.f32 %v1806_v29  ;;  %v1779_v18 = vsub.f32 %v4139_v22, %v1763_v32  ;;  %1828 = vadd.xlane.f32.xlu1 %v1827_v34  ;;  %v1760_v35 = vpop.xlane.xlu0 %1759  ;;  %v1824_v36 = vsel %vm1715_vm1, %v4189_v30, 0.0 }
 0x43b   : > { %3622 = vpow2.f32 %v1804_v31  ;;  %v1778_v45 = vsub.f32 %v4143_v23, %v1760_v35  ;;  %1825 = vadd.xlane.f32.xlu0 %v1824_v36 }
 0x43c   : > { %v4197_v37 = vpop.eup %3612  ;;  %v1810_v39 = vmul.f32 1.442695, %v1779_v18 }
 0x43d   : > { %v4199_v40 = vpop.eup %3614  ;;  %v1808_v44 = vmul.f32 1.442695, %v1778_v45  ;;  %v1839_v47 = vsel %vm1715_vm1, %v4197_v37, 0.0 }
 0x43e   : > { %3624 = vpow2.f32 %v1810_v39  ;;  %1840 = vadd.xlane.f32.xlu1 %v1839_v47  ;;  %v1836_v22 = vsel %vm1715_vm1, %v4199_v40, 0.0 }
 0x43f   : > { %3626 = vpow2.f32 %v1808_v44  ;;  %1837 = vadd.xlane.f32.xlu0 %v1836_v22 }
 0x440   : > { %v4205_v48 = vpop.eup %3616 }
 0x441   : > { %v4207_v23 = vpop.eup %3618  ;;  %v1845_v25 = vsel %vm1715_vm1, %v4205_v48, 0.0 }
 0x442   : > { %1846 = vadd.xlane.f32.xlu1 %v1845_v25  ;;  %v1842_v27 = vsel %vm1715_vm1, %v4207_v23, 0.0 }
 0x443   : > { %1843 = vadd.xlane.f32.xlu0 %v1842_v27 }
 0x444   : > { %v4213_v49 = vpop.eup %3620 }
 0x445   : > { %v4215_v51 = vpop.eup %3622  ;;  %v1851_v52 = vsel %vm1715_vm1, %v4213_v49, 0.0 }
 0x446   : > { %1852 = vadd.xlane.f32.xlu1 %v1851_v52  ;;  %v1848_v14 = vsel %vm1715_vm1, %v4215_v51, 0.0  ;;  %v3566_v52 = vld [vmem:[%s3914_s19 + $0x10] sm:$0xff]  }
 0x447   : > { %1849 = vadd.xlane.f32.xlu0 %v1848_v14  ;;  %v3567_v14 = vld [vmem:[%s3914_s19 + $0x18] sm:$0xff]  }
 0x448   : > { %v4221_v54 = vpop.eup %3624 }
 0x449   : > { %v4223_v33 = vpop.eup %3626  ;;  %v1857_v56 = vsel %vm1715_vm1, %v4221_v54, 0.0 }
 0x44a   : > { %1858 = vadd.xlane.f32.xlu1 %v1857_v56  ;;  %v1854_v38 = vsel %vm1715_vm1, %v4223_v33, 0.0  ;;  %v3570_v56 = vld [vmem:[%s3914_s19 + $0x30] sm:$0xff]  }
 0x44b   : > { %1855 = vadd.xlane.f32.xlu0 %v1854_v38  ;;  %v3571_v38 = vld [vmem:[%s3914_s19 + $0x38] sm:$0xff]  }
 0x4bb   : > { %v1817_v58 = vpop.xlane.xlu1 %1816 }
 0x4bc   : > { %3628 = vrcp.f32 %v1817_v58  ;;  %v1814_v43 = vpop.xlane.xlu0 %1813 }
 0x4bd   : > { %3630 = vrcp.f32 %v1814_v43 }
 0x4bf   : > { %v1835_v60 = vpop.xlane.xlu1 %1834 }
 0x4c0   : > { %v1832_v61 = vpop.xlane.xlu0 %1831 }
 0x4c3   : > { %v1823_v50 = vpop.xlane.xlu1 %1822 }
 0x4c4   : > { %3632 = vrcp.f32 %v1823_v50  ;;  %v1820_v53 = vpop.xlane.xlu0 %1819 }
 0x4c5   : > { %3634 = vrcp.f32 %v1820_v53 }
 0x4c6   : > { %v3629_v63 = vpop.eup %3628  ;;  %3636 = vrcp.f32 %v1832_v61 }
 0x4c7   : > { %v3631_v9 = vpop.eup %3630  ;;  %v1829_v11 = vpop.xlane.xlu1 %1828  ;;  %v1877_v42 = vmul.f32 %v3629_v63, %v4157_v55 }
 0x4c8   : > { %3638 = vrcp.f32 %v1829_v11  ;;  %v1826_v12 = vpop.xlane.xlu0 %1825  ;;  %v1876_v59 = vmul.f32 %v3631_v9, %v4159_v57 }
 0x4c9   : > { %3640 = vrcp.f32 %v1826_v12 }
 0x4ca   : > { %3371 = vmatprep.mubr.msk.f32.mxu1 %vm1715_vm1, %v1876_v59  ;;  %3642 = vrcp.f32 %v1835_v60 }
 0x4cb   : > { %v1841_v15 = vpop.xlane.xlu1 %1840  ;;  %3372 = vmatmul.mubr.msk.f32.vlgmr.msra.gmra.mrb[6].mxu1 %vm1715_vm1, %v1877_v42 }
 0x4cc   : > { %3644 = vrcp.f32 %v1841_v15  ;;  %v1838_v41 = vpop.xlane.xlu0 %1837 }
 0x4cd   : > { %3646 = vrcp.f32 %v1838_v41 }
 0x4ce   : > { %v3633_v17 = vpop.eup %3632 }
 0x4cf   : > { %v3635_v20 = vpop.eup %3634  ;;  %v1847_v21 = vpop.xlane.xlu1 %1846  ;;  %v1879_v55 = vmul.f32 %v3633_v17, %v4177_v16 }
 0x4d0   : > { %3648 = vrcp.f32 %v1847_v21  ;;  %v1844_v46 = vpop.xlane.xlu0 %1843  ;;  %v1878_v10 = vmul.f32 %v3635_v20, %v4179_v19  ;;  %v3637_v57 = vpop.eup %3636 }
 0x4d1   : > { %3650 = vrcp.f32 %v1844_v46  ;;  %v1882_v16 = vmul.f32 %v3637_v57, %v4169_v8 }
 0x4d2   : > { %v3639_v24 = vpop.eup %3638  ;;  %3374 = vmatprep.mubr.msk.f32.mxu1 %vm1715_vm1, %v1878_v10 }
 0x4d3   : > { %v3641_v26 = vpop.eup %3640  ;;  %v1853_v13 = vpop.xlane.xlu1 %1852  ;;  %3375 = vmatmul.mubr.msk.f32.gmra.mrb[8].mxu1 %vm1715_vm1, %v1879_v55  ;;  %v1881_v34 = vmul.f32 %v3639_v24, %v4187_v28 }
 0x4d4   : > { %3652 = vrcp.f32 %v1853_v13  ;;  %v1850_v29 = vpop.xlane.xlu0 %1849  ;;  %v1880_v31 = vmul.f32 %v3641_v26, %v4189_v30  ;;  %v3643_v32 = vpop.eup %3642 }
 0x4d5   : > { %3654 = vrcp.f32 %v1850_v29  ;;  %v1883_v28 = vmul.f32 %v3643_v32, %v4167_v62 }
 0x4d6   : > { %v3645_v19 = vpop.eup %3644  ;;  %3377 = vmatprep.mubr.msk.f32.mxu1 %vm1715_vm1, %v1880_v31 }
 0x4d7   : > { %v3647_v18 = vpop.eup %3646  ;;  %v1859_v35 = vpop.xlane.xlu1 %1858  ;;  %3378 = vmatmul.mubr.msk.f32.gmra.mrb[10].mxu1 %vm1715_vm1, %v1881_v34  ;;  %v1885_v30 = vmul.f32 %v3645_v19, %v4197_v37 }
 0x4d8   : > { %3656 = vrcp.f32 %v1859_v35  ;;  %3380 = vmatprep.mubr.msk.f32.mxu1 %vm1715_vm1, %v1882_v16  ;;  %v1856_v36 = vpop.xlane.xlu0 %1855  ;;  %v1884_v45 = vmul.f32 %v3647_v18, %v4199_v40 }
 0x4d9   : > { %3658 = vrcp.f32 %v1856_v36 }
 0x4da   : > { %v3649_v39 = vpop.eup %3648  ;;  %3387 = vmatprep.mubr.msk.f32.mxu0 %vm1715_vm1, %v1884_v45 }
 0x4db   : > { %v3651_v44 = vpop.eup %3650  ;;  %3381 = vmatmul.mubr.msk.f32.gmra.mrb[12].mxu1 %vm1715_vm1, %v1883_v28  ;;  %3388 = vmatmul.mubr.msk.f32.vlgmr.msra.gmra.mrb[22].mxu0 %vm1715_vm1, %v1885_v30  ;;  %v1887_v47 = vmul.f32 %v3649_v39, %v4205_v48 }
 0x4dc   : > { %v1886_v8 = vmul.f32 %v3651_v44, %v4207_v23 }
 0x4de   : > { %v3653_v22 = vpop.eup %3652  ;;  %3390 = vmatprep.mubr.msk.f32.mxu0 %vm1715_vm1, %v1886_v8 }
 0x4df   : > { %v3655_v37 = vpop.eup %3654  ;;  %3391 = vmatmul.mubr.msk.f32.gmra.mrb[24].mxu0 %vm1715_vm1, %v1887_v47  ;;  %v1889_v40 = vmul.f32 %v3653_v22, %v4213_v49  ;;  %v3565_v49 = vld [vmem:[%s3914_s19 + $0x8] sm:$0xff]  }
 0x4e0   : > { %v1888_v62 = vmul.f32 %v3655_v37, %v4215_v51  ;;  %v3564_v51 = vld [vmem:[%s3914_s19] sm:$0xff]  }
 0x4e1   : > { %3399 = vmatprep.subr.bf16.mxu1 %v3564_v51 }
 0x4e2   : > { %v3657_v25 = vpop.eup %3656  ;;  %3393 = vmatprep.mubr.msk.f32.mxu0 %vm1715_vm1, %v1888_v62  ;;  %3400 = vmatpush3.bf16.msra.mxu1 %v3564_v51 }
 0x4e3   : > { %v3659_v23 = vpop.eup %3658  ;;  %3394 = vmatmul.mubr.msk.f32.gmra.mrb[26].mxu0 %vm1715_vm1, %v1889_v40  ;;  %v1891_v27 = vmul.f32 %v3657_v25, %v4221_v54  ;;  %3401 = vmatprep.subr.bf16.mxu1 %v3565_v49  ;;  %v3568_v54 = vld [vmem:[%s3914_s19 + $0x20] sm:$0xff]  }
 0x4e4   : > { %v1890_v48 = vmul.f32 %v3659_v23, %v4223_v33  ;;  %v3569_v33 = vld [vmem:[%s3914_s19 + $0x28] sm:$0xff]   ;;  %v3676_v23 = vld [vmem:[#allocation2 + $0x10] sm:$0xff] }
 0x4e6   : > { %3396 = vmatprep.mubr.msk.f32.mxu0 %vm1715_vm1, %v1890_v48  ;;  %3402 = vmatpush3.bf16.msra.mxu1 %v3565_v49 }
 0x4e7   : > { %3397 = vmatmul.mubr.msk.f32.gmra.mrb[28].mxu0 %vm1715_vm1, %v1891_v27  ;;  %3403 = vmatprep.subr.bf16.mxu1 %v3566_v52 }
 0x4ea   : > { %3404 = vmatpush3.bf16.msra.mxu1 %v3566_v52 }
 0x4eb   : > { %3405 = vmatprep.subr.bf16.mxu1 %v3567_v14 }
 0x4ee   : > { %3406 = vmatpush3.bf16.msra.mxu1 %v3567_v14  ;;  %v3678_v14 = vld [vmem:[#allocation2] sm:$0xff] }
 0x4ef   : > { %3407 = vmatprep.subr.bf16.mxu1 %v3568_v54 }
 0x4f2   : > { %3408 = vmatpush3.bf16.msra.mxu1 %v3568_v54 }
 0x4f3   : > { %3409 = vmatprep.subr.bf16.mxu1 %v3569_v33 }
 0x4f6   : > { %3410 = vmatpush3.bf16.msra.mxu1 %v3569_v33  ;;  %v3679_v33 = vld [vmem:[#allocation2 + $0x8] sm:$0xff] }
 0x4f7   : > { %3411 = vmatprep.subr.bf16.mxu1 %v3570_v56 }
 0x4fa   : > { %3412 = vmatpush3.bf16.msra.mxu1 %v3570_v56 }
 0x4fb   : > { %3413 = vmatprep.subr.bf16.mxu1 %v3571_v38 }
 0x4fe   : > { %3414 = vmatpush3.bf16.msra.mxu1 %v3571_v38 }
 0x59e   : > { %v3373_v58 = vpop.f32.mrb[6].mxu1 }
 0x59f   : > { %v1982_v43 = vpop.f32.mrb[7].mxu1  ;;  %v2151_v61 = vmul.f32 %v3373_v58, %v3865_v1 }
 0x5a0   : > { %v2150_v63 = vmul.f32 %v1982_v43, %v3860_v0 }
 0x5a6   : > { %v3376_v60 = vpop.f32.mrb[8].mxu1 }
 0x5a7   : > { %v2153_v50 = vmul.f32 %v3376_v60, %v3875_v3  ;;  %v1992_v53 = vpop.f32.mrb[9].mxu1 }
 0x5a8   : > { %v2152_v9 = vmul.f32 %v1992_v53, %v3870_v2  ;;  %v3574_v53 = vld [vmem:[%s3941_s25 + $0x10] sm:$0xff]  }
 0x5a9   : > { %v2167_v11 = vadd.f32 %v2153_v50, %v2151_v61  ;;  %v3572_v61 = vld [vmem:[%s3941_s25] sm:$0xff]   ;;  %v3573_v50 = vld [vmem:[%s3941_s25 + $0x8] sm:$0xff]  }
 0x5aa   : > { %v2166_v12 = vadd.f32 %v2152_v9, %v2150_v63  ;;  %v3379_v59 = vpop.f32.mrb[10].mxu1  ;;  %3419 = vmatprep.subr.bf16.mxu0 %v3572_v61  ;;  %v3575_v63 = vld [vmem:[%s3941_s25 + $0x18] sm:$0xff]   ;;  %v3576_v9 = vld [vmem:[%s3941_s25 + $0x20] sm:$0xff]  }
 0x5ab   : > { %v2155_v42 = vmul.f32 %v3379_v59, %v3885_v5  ;;  %v2002_v15 = vpop.f32.mrb[11].mxu1  ;;  %3420 = vmatpush3.bf16.msra.mxu0 %v3572_v61  ;;  %v3579_v59 = vld [vmem:[%s3941_s25 + $0x38] sm:$0xff]  }
 0x5ac   : > { %v2154_v41 = vmul.f32 %v2002_v15, %v3880_v4  ;;  %3421 = vmatprep.subr.bf16.mxu0 %v3573_v50 }
 0x5ad   : > { %v2171_v17 = vadd.f32 %v2167_v11, %v2155_v42  ;;  %v3577_v11 = vld [vmem:[%s3941_s25 + $0x28] sm:$0xff]  }
 0x5ae   : > { %v2170_v20 = vadd.f32 %v2166_v12, %v2154_v41  ;;  %v3382_v21 = vpop.f32.mrb[12].mxu1  ;;  %v3389_v46 = vpop.f32.mrb[22].mxu0  ;;  %v3578_v12 = vld [vmem:[%s3941_s25 + $0x30] sm:$0xff]  }
 0x5af   : > { %v2157_v10 = vmul.f32 %v3382_v21, %v3898_v7  ;;  %v2012_v57 = vpop.f32.mrb[13].mxu1  ;;  %v2111_v55 = vpop.f32.mrb[23].mxu0  ;;  %v2159_v31 = vmul.f32 %v3389_v46, %v3865_v1  ;;  %3422 = vmatpush3.bf16.msra.mxu0 %v3573_v50 }
 0x5b0   : > { %v2156_v24 = vmul.f32 %v2012_v57, %v3893_v6  ;;  %v2158_v19 = vmul.f32 %v2111_v55, %v3860_v0  ;;  %3423 = vmatprep.subr.bf16.mxu0 %v3574_v53 }
 0x5b1   : > { %v2175_v26 = vadd.f32 %v2171_v17, %v2157_v10 }
 0x5b2   : > { %v2174_v13 = vadd.f32 %v2170_v20, %v2156_v24  ;;  %v3392_v29 = vpop.f32.mrb[24].mxu0 }
 0x5b3   : > { %v2161_v32 = vmul.f32 %v3392_v29, %v3875_v3  ;;  %v2121_v34 = vpop.f32.mrb[25].mxu0  ;;  %3424 = vmatpush3.bf16.msra.mxu0 %v3574_v53 }
 0x5b4   : > { %v2160_v16 = vmul.f32 %v2121_v34, %v3870_v2  ;;  %v2178_v18 = vpack.c.bf16 %v2175_v26, %v2174_v13  ;;  %3425 = vmatprep.subr.bf16.mxu0 %v3575_v63 }
 0x5b5   : > { %v2169_v35 = vadd.f32 %v2161_v32, %v2159_v31 }
 0x5b6   : > { %v2168_v36 = vadd.f32 %v2160_v16, %v2158_v19  ;;  %v3395_v45 = vpop.f32.mrb[26].mxu0  ;;  %3415 = vmatprep.mubr.bf16.mxu1 %v2178_v18 }
 0x5b7   : > { %v2163_v30 = vmul.f32 %v3395_v45, %v3885_v5  ;;  %v2131_v28 = vpop.f32.mrb[27].mxu0  ;;  %v3147_v5 = vld [vmem:[%s4497_s30] ss:$0 sm:$0xff]  ;;  %3426 = vmatpush3.bf16.msra.mxu0 %v3575_v63  ;;  %s4502_s30 = sld [smem:[#allocation15_spill]] (!%p3176_p6) }
 0x5b8   : > { %v2162_v39 = vmul.f32 %v2131_v28, %v3880_v4  ;;  %3427 = vmatprep.subr.bf16.mxu0 %v3576_v9 }
 0x5b9   : > { %v2173_v44 = vadd.f32 %v2169_v35, %v2163_v30 }
 0x5ba   : > { %v2172_v1 = vadd.f32 %v2168_v36, %v2162_v39  ;;  %v3398_v8 = vpop.f32.mrb[28].mxu0 }
 0x5bb   : > { %v2165_v3 = vmul.f32 %v3398_v8, %v3898_v7  ;;  %v2141_v47 = vpop.f32.mrb[29].mxu0  ;;  %3428 = vmatpush3.bf16.msra.mxu0 %v3576_v9  ;;  %v3580_v9 = vld [vmem:[%s3950_s0] sm:$0xff]  }
 0x5bc   : > { %v2164_v0 = vmul.f32 %v2141_v47, %v3893_v6  ;;  %v3677_v6 = vld [vmem:[#allocation2 + $0x18] sm:$0xff]  ;;  %3429 = vmatprep.subr.bf16.mxu0 %v3577_v11  ;;  %3439 = vmatprep.subr.bf16.mxu1 %v3580_v9 }
 0x5bd   : > { %v2177_v2 = vadd.f32 %v2173_v44, %v2165_v3 }
 0x5be   : > { %v2176_v22 = vadd.f32 %v2172_v1, %v2164_v0 }
 0x5bf   : > { %3430 = vmatpush3.bf16.msra.mxu0 %v3577_v11  ;;  %v3581_v11 = vld [vmem:[%s3950_s0 + $0x8] sm:$0xff]  }
 0x5c0   : > { %v2179_v37 = vpack.c.bf16 %v2177_v2, %v2176_v22  ;;  %3431 = vmatprep.subr.bf16.mxu0 %v3578_v12 }
 0x5c2   : > { %3416 = vmatmul.mubr.bf16.vlgmr.msra.gmra.mrb[16].mxu1 %v2179_v37  ;;  %v3156_v37 = vld [vmem:[%s4498_s18] ss:$0 sm:$0xff]  ;;  %s4503_s18 = sld [smem:[#allocation17_spill]] (!%p3176_p6) }
 0x5c3   : > { %3432 = vmatpush3.bf16.msra.mxu0 %v3578_v12  ;;  %3440 = vmatpush3.bf16.msra.mxu1 %v3580_v9  ;;  %v3582_v12 = vld [vmem:[%s3950_s0 + $0x10] sm:$0xff]  }
 0x5c4   : > { %3433 = vmatprep.subr.bf16.mxu0 %v3579_v59  ;;  %3441 = vmatprep.subr.bf16.mxu1 %v3581_v11 }
 0x5c7   : > { %3434 = vmatpush3.bf16.msra.mxu0 %v3579_v59  ;;  %3442 = vmatpush3.bf16.msra.mxu1 %v3581_v11  ;;  %v3583_v59 = vld [vmem:[%s3950_s0 + $0x18] sm:$0xff]  }
 0x5c8   : > { %3443 = vmatprep.subr.bf16.mxu1 %v3582_v12 }
 0x5cb   : > { %3444 = vmatpush3.bf16.msra.mxu1 %v3582_v12 }
 0x5cc   : > { %3445 = vmatprep.subr.bf16.mxu1 %v3583_v59 }
 0x5cf   : > { %3446 = vmatpush3.bf16.msra.mxu1 %v3583_v59 }
 0x695   : > { %v3417_v62 = vpop.f32.mrb[16].mxu1 }
 0x696   : > { %v2294_v40 = vadd.f32 %v3417_v62, %v3147_v5  ;;  %v2285_v4 = vpop.f32.mrb[17].mxu1 }
 0x697   : > { %v3418_v25 = vpop.f32.mrb[18].mxu1  ;;  %v2286_v7 = vadd.f32 %v3147_v5, %v2285_v4 }
 0x698   : > { %v4290_v48 = vadd.f32 %v3676_v23, %v2294_v40  ;;  %v2297_v27 = vadd.f32 %v3418_v25, %v3147_v5  ;;  %v2288_v51 = vpop.f32.mrb[19].mxu1 }
 0x699   : > { %v2289_v52 = vadd.f32 %v3147_v5, %v2288_v51  ;;  %v4295_v54 = vadd.f32 %v3678_v14, %v2286_v7 }
 0x69a   : > { %v4292_v49 = vadd.f32 %v3677_v6, %v2297_v27  ;;  %2308 = vadd.xlane.f32.xlu0 %v4290_v48  ;;  %v2318_v43 = vmul.f32 %v4290_v48, %v4290_v48  ;;  %v3157_v27 = vld [vmem:[%s4499_s5] ss:$0 sm:$0xff]  ;;  %s4504_s5 = sld [smem:[#allocation18_spill]] (!%p3176_p6) }
 0x69b   : > { %v4298_v56 = vadd.f32 %v3679_v33, %v2289_v52  ;;  %v2316_v38 = vmul.f32 %v4295_v54, %v4295_v54 }
 0x69c   : > { %2310 = vadd.xlane.f32.xlu1 %v4292_v49  ;;  %v2319_v60 = vmul.f32 %v4292_v49, %v4292_v49 }
 0x69d   : > { %v2317_v58 = vmul.f32 %v4298_v56, %v4298_v56 }
 0x69e   : > { %2304 = vadd.xlane.f32.xlu0 %v4295_v54 }
 0x6a0   : > { %2306 = vadd.xlane.f32.xlu1 %v4298_v56 }
 0x6a2   : > { %2320 = vadd.xlane.f32.xlu0 %v2316_v38 }
 0x6a4   : > { %2322 = vadd.xlane.f32.xlu1 %v2317_v58 }
 0x6a6   : > { %2324 = vadd.xlane.f32.xlu0 %v2318_v43 }
 0x6a8   : > { %2326 = vadd.xlane.f32.xlu1 %v2319_v60 }
 0x727   : > { %v2309_v42 = vpop.xlane.xlu0 %2308 }
 0x728   : > { %v2314_v10 = vmul.f32 0.03125, %v2309_v42  ;;  %v3584_v42 = vld [vmem:[%s3950_s0 + $0x20] sm:$0xff]  }
 0x729   : > { %v2311_v15 = vpop.xlane.xlu1 %2310  ;;  %3447 = vmatprep.subr.bf16.mxu1 %v3584_v42 }
 0x72a   : > { %v2315_v24 = vmul.f32 0.03125, %v2311_v15  ;;  %v2334_v34 = vmul.f32 %v2314_v10, %v2314_v10  ;;  %v2346_v4 = vsub.f32 %v4290_v48, %v2314_v10  ;;  %3448 = vmatpush3.bf16.msra.mxu1 %v3584_v42  ;;  %v3585_v15 = vld [vmem:[%s3950_s0 + $0x28] sm:$0xff]  }
 0x72b   : > { %v2305_v41 = vpop.xlane.xlu0 %2304  ;;  %3449 = vmatprep.subr.bf16.mxu1 %v3585_v15 }
 0x72c   : > { %v2312_v17 = vmul.f32 0.03125, %v2305_v41  ;;  %v2335_v35 = vmul.f32 %v2315_v24, %v2315_v24  ;;  %v2347_v51 = vsub.f32 %v4292_v49, %v2315_v24  ;;  %v3586_v41 = vld [vmem:[%s3950_s0 + $0x30] sm:$0xff]  }
 0x72d   : > { %v2307_v20 = vpop.xlane.xlu1 %2306 }
 0x72e   : > { %v2313_v21 = vmul.f32 0.03125, %v2307_v20  ;;  %v2332_v57 = vmul.f32 %v2312_v17, %v2312_v17  ;;  %v2344_v2 = vsub.f32 %v4295_v54, %v2312_v17  ;;  %3450 = vmatpush3.bf16.msra.mxu1 %v3585_v15  ;;  %v3587_v17 = vld [vmem:[%s3950_s0 + $0x38] sm:$0xff]   ;;  %v3158_v20 = vld [vmem:[%s902_s2] ss:$0 sm:$0xff] }
 0x72f   : > { %v2321_v46 = vpop.xlane.xlu0 %2320  ;;  %3451 = vmatprep.subr.bf16.mxu1 %v3586_v41 }
 0x730   : > { %v2328_v55 = vmul.f32 0.03125, %v2321_v46  ;;  %v2333_v13 = vmul.f32 %v2313_v21, %v2313_v21  ;;  %v2345_v5 = vsub.f32 %v4298_v56, %v2313_v21 }
 0x731   : > { %v2323_v26 = vpop.xlane.xlu1 %2322 }
 0x732   : > { %v2336_v29 = vsub.f32 %v2328_v55, %v2332_v57  ;;  %v2329_v31 = vmul.f32 0.03125, %v2323_v26  ;;  %3452 = vmatpush3.bf16.msra.mxu1 %v3586_v41 }
 0x733   : > { %v2325_v32 = vpop.xlane.xlu0 %2324  ;;  %3453 = vmatprep.subr.bf16.mxu1 %v3587_v17 }
 0x734   : > { %v2340_v19 = vmax.f32 %v2336_v29, 0.0  ;;  %v2337_v16 = vsub.f32 %v2329_v31, %v2333_v13  ;;  %v2330_v18 = vmul.f32 0.03125, %v2325_v32 }
 0x735   : > { %v2327_v36 = vpop.xlane.xlu1 %2326 }
 0x736   : > { %v2348_v45 = vadd.f32 1e-05, %v2340_v19  ;;  %v2341_v30 = vmax.f32 %v2337_v16, 0.0  ;;  %v2338_v28 = vsub.f32 %v2330_v18, %v2334_v34  ;;  %v2331_v39 = vmul.f32 0.03125, %v2327_v36  ;;  %3454 = vmatpush3.bf16.msra.mxu1 %v3587_v17 }
 0x738   : > { %3660 = vrsqrt.f32 %v2348_v45  ;;  %v2349_v44 = vadd.f32 1e-05, %v2341_v30  ;;  %v2342_v1 = vmax.f32 %v2338_v28, 0.0  ;;  %v2339_v8 = vsub.f32 %v2331_v39, %v2335_v35 }
 0x73a   : > { %3662 = vrsqrt.f32 %v2349_v44  ;;  %v2350_v3 = vadd.f32 1e-05, %v2342_v1  ;;  %v2343_v47 = vmax.f32 %v2339_v8, 0.0 }
 0x73c   : > { %3664 = vrsqrt.f32 %v2350_v3  ;;  %v2351_v0 = vadd.f32 1e-05, %v2343_v47 }
 0x73e   : > { %3666 = vrsqrt.f32 %v2351_v0 }
 0x742   : > { %v3661_v22 = vpop.eup %3660 }
 0x743   : > { %v2356_v62 = vmul.f32 %v3661_v22, %v2344_v2 }
 0x744   : > { %v3663_v40 = vpop.eup %3662 }
 0x745   : > { %v2357_v25 = vmul.f32 %v3663_v40, %v2345_v5  ;;  %v2367_v23 = vmul.f32 %v3156_v37, %v2356_v62 }
 0x746   : > { %v3665_v7 = vpop.eup %3664 }
 0x747   : > { %v2358_v6 = vmul.f32 %v3665_v7, %v2346_v4  ;;  %v2368_v52 = vmul.f32 %v3156_v37, %v2357_v25  ;;  %v2378_v38 = vadd.f32 %v3157_v27, %v2367_v23 }
 0x748   : > { %v3667_v14 = vpop.eup %3666 }
 0x749   : > { %v2359_v33 = vmul.f32 %v3667_v14, %v2347_v51  ;;  %v2379_v58 = vadd.f32 %v3157_v27, %v2368_v52  ;;  %v2369_v43 = vmul.f32 %v3156_v37, %v2358_v6 }
 0x74b   : > { %v2382_v60 = vpack.c.bf16 %v2379_v58, %v2378_v38  ;;  %v2370_v61 = vmul.f32 %v3156_v37, %v2359_v33  ;;  %v2380_v50 = vadd.f32 %v3157_v27, %v2369_v43 }
 0x74d   : > { %3435 = vmatprep.mubr.bf16.mxu0 %v2382_v60  ;;  %v2381_v53 = vadd.f32 %v3157_v27, %v2370_v61  ;;  %v3167_v60 = vld [vmem:[%s910_s21] ss:$0 sm:$0xff]  ;;  %s4500_s21 = sld [smem:[#allocation16_spill]] (!%p3176_p6) }
 0x74f   : > { %v2383_v63 = vpack.c.bf16 %v2381_v53, %v2380_v50 }
 0x751   : > { %3436 = vmatmul.mubr.bf16.vlgmr.msra.gmra.mrb[32].mxu0 %v2383_v63 }
 0x824   : > { %v3437_v21 = vpop.f32.mrb[32].mxu0 }
 0x825   : > { %v2498_v46 = vadd.f32 %v3437_v21, %v3158_v20  ;;  %v2489_v10 = vpop.f32.mrb[33].mxu0  ;;  %v3681_v21 = vld [vmem:[%s4500_s21 + $0x8] sm:$0xff] (!%p3176_p6)  }
 0x826   : > { %v2490_v57 = vadd.f32 %v3158_v20, %v2489_v10  ;;  %v3438_v55 = vpop.f32.mrb[34].mxu0  ;;  %v3683_v10 = vld [vmem:[%s4500_s21 + $0x18] sm:$0xff] (!%p3176_p6)  }
 0x827   : > { %v2506_v24 = vmul.f32 %v2498_v46, %v2498_v46  ;;  %v2501_v26 = vadd.f32 %v3438_v55, %v3158_v20  ;;  %v2492_v13 = vpop.f32.mrb[35].mxu0  ;;  %v3685_v55 = vld [vmem:[%s4500_s21 + $0x28] sm:$0xff] (!%p3176_p6)  }
 0x828   : > { %v2504_v29 = vmul.f32 %v2490_v57, %v2490_v57  ;;  %v2493_v31 = vadd.f32 %v3158_v20, %v2492_v13  ;;  %v3680_v20 = vld [vmem:[%s4500_s21] sm:$0xff] (!%p3176_p6)  }
 0x829   : > { %v2510_v32 = vmul.f32 %v2506_v24, %v2498_v46  ;;  %v2507_v34 = vmul.f32 %v2501_v26, %v2501_v26  ;;  %3459 = vmatprep.subr.bf16.mxu0 (!%p3176_p6), %v3680_v20  ;;  %v3686_v24 = vld [vmem:[%s4500_s21 + $0x30] sm:$0xff] (!%p3176_p6)  }
 0x82a   : > { %v2508_v19 = vmul.f32 %v2504_v29, %v2490_v57  ;;  %v2505_v16 = vmul.f32 %v2493_v31, %v2493_v31  ;;  %3460 = vmatpush3.bf16.msra.mxu0 (!%p3176_p6), %v3680_v20 }
 0x82b   : > { %v2514_v18 = vmul.f32 0.044715, %v2510_v32  ;;  %v2511_v35 = vmul.f32 %v2507_v34, %v2501_v26  ;;  %3461 = vmatprep.subr.bf16.mxu0 (!%p3176_p6), %v3681_v21 }
 0x82c   : > { %v2512_v36 = vmul.f32 0.044715, %v2508_v19  ;;  %v2509_v45 = vmul.f32 %v2505_v16, %v2493_v31 }
 0x82d   : > { %v2518_v30 = vadd.f32 %v2514_v18, %v2498_v46  ;;  %v2515_v28 = vmul.f32 0.044715, %v2511_v35 }
 0x82e   : > { %v2516_v39 = vadd.f32 %v2512_v36, %v2490_v57  ;;  %v2513_v44 = vmul.f32 0.044715, %v2509_v45  ;;  %3462 = vmatpush3.bf16.msra.mxu0 (!%p3176_p6), %v3681_v21 }
 0x82f   : > { %v2522_v1 = vmul.f32 0.7978846, %v2518_v30  ;;  %v2519_v8 = vadd.f32 %v2515_v28, %v2501_v26 }
 0x830   : > { %v2520_v3 = vmul.f32 0.7978846, %v2516_v39  ;;  %v2517_v47 = vadd.f32 %v2513_v44, %v2493_v31 }
 0x831   : > { %3668 = vtanh.f32 %v2522_v1  ;;  %v2523_v0 = vmul.f32 0.7978846, %v2519_v8 }
 0x832   : > { %3670 = vtanh.f32 %v2520_v3  ;;  %v2521_v2 = vmul.f32 0.7978846, %v2517_v47 }
 0x833   : > { %3672 = vtanh.f32 %v2523_v0 }
 0x834   : > { %3674 = vtanh.f32 %v2521_v2 }
 0x83b   : > { %v3669_v22 = vpop.eup %3668 }
 0x83c   : > { %v3671_v37 = vpop.eup %3670  ;;  %v2530_v5 = vadd.f32 1.0, %v3669_v22 }
 0x83d   : > { %v3673_v62 = vpop.eup %3672  ;;  %v2528_v40 = vadd.f32 1.0, %v3671_v37 }
 0x83e   : > { %v3675_v4 = vpop.eup %3674  ;;  %v2534_v25 = vmul.f32 0.5, %v2530_v5  ;;  %v2531_v23 = vadd.f32 1.0, %v3673_v62 }
 0x83f   : > { %v2529_v7 = vadd.f32 1.0, %v3675_v4  ;;  %v2532_v27 = vmul.f32 0.5, %v2528_v40 }
 0x840   : > { %v2535_v51 = vmul.f32 0.5, %v2531_v23  ;;  %v2538_v52 = vmul.f32 %v2534_v25, %v2498_v46  ;;  %v3682_v46 = vld [vmem:[%s4500_s21 + $0x10] sm:$0xff] (!%p3176_p6)  }
 0x841   : > { %v2533_v6 = vmul.f32 0.5, %v2529_v7  ;;  %v2536_v33 = vmul.f32 %v2532_v27, %v2490_v57  ;;  %3463 = vmatprep.subr.bf16.mxu0 (!%p3176_p6), %v3682_v46  ;;  %v3684_v57 = vld [vmem:[%s4500_s21 + $0x20] sm:$0xff] (!%p3176_p6)  }
 0x842   : > { %v2539_v14 = vmul.f32 %v2535_v51, %v2501_v26  ;;  %3464 = vmatpush3.bf16.msra.mxu0 (!%p3176_p6), %v3682_v46  ;;  %v3687_v26 = vld [vmem:[%s4500_s21 + $0x38] sm:$0xff] (!%p3176_p6)  }
 0x843   : > { %v2537_v38 = vmul.f32 %v2533_v6, %v2493_v31  ;;  %3465 = vmatprep.subr.bf16.mxu0 (!%p3176_p6), %v3683_v10 }
 0x844   : > { %v2541_v58 = vpack.c.bf16 %v2539_v14, %v2538_v52 }
 0x845   : > { %v2540_v43 = vpack.c.bf16 %v2537_v38, %v2536_v33  ;;  %v3177_v33 = vld [vmem:[%s4501_s23] ss:$0 sm:$0xff] (!%p3176_p6) }
 0x846   : > { %3466 = vmatpush3.bf16.msra.mxu0 (!%p3176_p6), %v3683_v10 }
 0x847   : > { %3455 = vmatprep.mubr.bf16.mxu1 %v2540_v43  ;;  %3467 = vmatprep.subr.bf16.mxu0 (!%p3176_p6), %v3684_v57 }
 0x848   : > { %3456 = vmatmul.mubr.bf16.vlgmr.msra.gmra.mrb[20].mxu1 %v2541_v58 }
 0x84a   : > { %3468 = vmatpush3.bf16.msra.mxu0 (!%p3176_p6), %v3684_v57 }
 0x84b   : > { %3469 = vmatprep.subr.bf16.mxu0 (!%p3176_p6), %v3685_v55 }
 0x84e   : > { %3470 = vmatpush3.bf16.msra.mxu0 (!%p3176_p6), %v3685_v55 }
 0x84f   : > { %3471 = vmatprep.subr.bf16.mxu0 (!%p3176_p6), %v3686_v24 }
 0x852   : > { %3472 = vmatpush3.bf16.msra.mxu0 (!%p3176_p6), %v3686_v24 }
 0x853   : > { %3473 = vmatprep.subr.bf16.mxu0 (!%p3176_p6), %v3687_v26 }
 0x856   : > { %3474 = vmatpush3.bf16.msra.mxu0 (!%p3176_p6), %v3687_v26 }
 0x91b   : > { %v3457_v61 = vpop.f32.mrb[20].mxu1 }
 0x91c   : > { %v2656_v50 = vadd.f32 %v3457_v61, %v3167_v60  ;;  %v2647_v53 = vpop.f32.mrb[21].mxu1 }
 0x91d   : > { %v2648_v63 = vadd.f32 %v3167_v60, %v2647_v53  ;;  %v3458_v9 = vpop.f32.mrb[22].mxu1  ;;  %2673 = sbr.rel (%p3176_p6) target bundleno = 2736 (0xab0), region = 116 }
 0x91e   : > { %v4351_v11 = vadd.f32 %v2656_v50, %v4290_v48  ;;  %v2659_v12 = vadd.f32 %v3458_v9, %v3167_v60  ;;  %v2650_v59 = vpop.f32.mrb[23].mxu1 }
 0x91f   : > { %v4354_v42 = vadd.f32 %v2648_v63, %v4295_v54  ;;  %v2651_v15 = vadd.f32 %v3167_v60, %v2650_v59  ;;  %v3178_v60 = vld [vmem:[%s4502_s30] ss:$0 sm:$0xff] (!%p3176_p6) }
 0x920   : > { %2668 = vst [vmem:[#allocation2 + $0x10] sm:$0xff] %v4351_v11  ;;  %v4358_v41 = vadd.f32 %v2659_v12, %v4292_v49  ;;  %2678 = vadd.xlane.f32.xlu1 (!%p3176_p6), %v4351_v11 }
 0x921   : > { %2666 = vst [vmem:[#allocation2] sm:$0xff] %v4354_v42  ;;  %v4362_v17 = vadd.f32 %v2651_v15, %v4298_v56  ;;  %2674 = vadd.xlane.f32.xlu0 (!%p3176_p6), %v4354_v42  ;;  %v2686_v49 = vmul.f32 (!%p3176_p6), %v4354_v42, %v4354_v42  ;;  %v2688_v56 = vmul.f32 (!%p3176_p6), %v4351_v11, %v4351_v11 }
 0x922   : > { %2669 = vst [vmem:[#allocation2 + $0x18] sm:$0xff] %v4358_v41  ;;  %v2689_v54 = vmul.f32 (!%p3176_p6), %v4358_v41, %v4358_v41 }
 0x923   : > { %2667 = vst [vmem:[#allocation2 + $0x8] sm:$0xff] %v4362_v17  ;;  %v2687_v48 = vmul.f32 (!%p3176_p6), %v4362_v17, %v4362_v17 }
 0x924   : > { %2680 = vadd.xlane.f32.xlu1 %v4358_v41 }
 0x925   : > { %2676 = vadd.xlane.f32.xlu0 %v4362_v17 }
 0x928   : > { %2692 = vadd.xlane.f32.xlu1 %v2687_v48 }
 0x929   : > { %2690 = vadd.xlane.f32.xlu0 %v2686_v49 }
 0x92c   : > { %2696 = vadd.xlane.f32.xlu1 %v2689_v54 }
 0x92d   : > { %2694 = vadd.xlane.f32.xlu0 %v2688_v56 }
 0x9ad   : > { %v2679_v13 = vpop.xlane.xlu1 %2678 }
 0x9ae   : > { %v2675_v29 = vpop.xlane.xlu0 %2674  ;;  %v2684_v16 = vmul.f32 0.03125, %v2679_v13 }
 0x9af   : > { %v2682_v34 = vmul.f32 0.03125, %v2675_v29 }
 0x9b0   : > { %v2704_v8 = vmul.f32 %v2684_v16, %v2684_v16  ;;  %v2716_v63 = vsub.f32 %v4351_v11, %v2684_v16 }
 0x9b1   : > { %v2681_v31 = vpop.xlane.xlu1 %2680  ;;  %v2702_v45 = vmul.f32 %v2682_v34, %v2682_v34  ;;  %v2714_v14 = vsub.f32 %v4354_v42, %v2682_v34 }
 0x9b2   : > { %v2677_v32 = vpop.xlane.xlu0 %2676  ;;  %v2685_v18 = vmul.f32 0.03125, %v2681_v31 }
 0x9b3   : > { %v2683_v19 = vmul.f32 0.03125, %v2677_v32 }
 0x9b4   : > { %v2705_v3 = vmul.f32 %v2685_v18, %v2685_v18  ;;  %v2717_v61 = vsub.f32 %v4358_v41, %v2685_v18  ;;  %v3179_v41 = vld [vmem:[%s4503_s18] ss:$0 sm:$0xff] }
 0x9b5   : > { %v2693_v35 = vpop.xlane.xlu1 %2692  ;;  %v2703_v30 = vmul.f32 %v2683_v19, %v2683_v19  ;;  %v2715_v6 = vsub.f32 %v4362_v17, %v2683_v19 }
 0x9b6   : > { %v2691_v36 = vpop.xlane.xlu0 %2690  ;;  %v2699_v28 = vmul.f32 0.03125, %v2693_v35 }
 0x9b7   : > { %v2698_v39 = vmul.f32 0.03125, %v2691_v36 }
 0x9b8   : > { %v2707_v44 = vsub.f32 %v2699_v28, %v2703_v30 }
 0x9b9   : > { %v2706_v1 = vsub.f32 %v2698_v39, %v2702_v45  ;;  %v2697_v47 = vpop.xlane.xlu1 %2696 }
 0x9ba   : > { %v2695_v0 = vpop.xlane.xlu0 %2694  ;;  %v2711_v2 = vmax.f32 %v2707_v44, 0.0  ;;  %v2701_v37 = vmul.f32 0.03125, %v2697_v47 }
 0x9bb   : > { %v2710_v22 = vmax.f32 %v2706_v1, 0.0  ;;  %v2700_v5 = vmul.f32 0.03125, %v2695_v0 }
 0x9bc   : > { %v2719_v62 = vadd.f32 1e-05, %v2711_v2  ;;  %v2709_v4 = vsub.f32 %v2701_v37, %v2705_v3 }
 0x9bd   : > { %v2718_v40 = vadd.f32 1e-05, %v2710_v22  ;;  %v2708_v25 = vsub.f32 %v2700_v5, %v2704_v8 }
 0x9be   : > { %3688 = vrsqrt.f32 %v2719_v62  ;;  %v2713_v23 = vmax.f32 %v2709_v4, 0.0 }
 0x9bf   : > { %v2712_v7 = vmax.f32 %v2708_v25, 0.0  ;;  %3690 = vrsqrt.f32 %v2718_v40 }
 0x9c0   : > { %v2721_v27 = vadd.f32 1e-05, %v2713_v23 }
 0x9c1   : > { %v2720_v51 = vadd.f32 1e-05, %v2712_v7 }
 0x9c2   : > { %3692 = vrsqrt.f32 %v2721_v27 }
 0x9c3   : > { %3694 = vrsqrt.f32 %v2720_v51 }
 0x9c8   : > { %v3689_v52 = vpop.eup %3688 }
 0x9c9   : > { %v3691_v38 = vpop.eup %3690  ;;  %v2727_v58 = vmul.f32 %v3689_v52, %v2715_v6 }
 0x9ca   : > { %v2726_v43 = vmul.f32 %v3691_v38, %v2714_v14 }
 0x9cb   : > { %v2738_v50 = vmul.f32 %v3177_v33, %v2727_v58 }
 0x9cc   : > { %v3693_v53 = vpop.eup %3692  ;;  %v2737_v9 = vmul.f32 %v3177_v33, %v2726_v43 }
 0x9cd   : > { %v3695_v12 = vpop.eup %3694  ;;  %v2749_v59 = vadd.f32 %v3178_v60, %v2738_v50  ;;  %v2729_v42 = vmul.f32 %v3693_v53, %v2717_v61 }
 0x9ce   : > { %v2748_v15 = vadd.f32 %v3178_v60, %v2737_v9  ;;  %v2728_v17 = vmul.f32 %v3695_v12, %v2716_v63 }
 0x9cf   : > { %v2740_v48 = vmul.f32 %v3177_v33, %v2729_v42 }
 0x9d0   : > { %v2752_v49 = vpack.c.bf16 %v2749_v59, %v2748_v15  ;;  %v2739_v54 = vmul.f32 %v3177_v33, %v2728_v17 }
 0x9d1   : > { %v2751_v56 = vadd.f32 %v3178_v60, %v2740_v48 }
 0x9d2   : > { %3475 = vmatprep.mubr.bf16.mxu0 %v2752_v49  ;;  %v2750_v20 = vadd.f32 %v3178_v60, %v2739_v54 }
 0x9d4   : > { %v2753_v21 = vpack.c.bf16 %v2751_v56, %v2750_v20 }
 0x9d6   : > { %3476 = vmatmul.mubr.bf16.vlgmr.msra.gmra.mrb[0].mxu0 %v2753_v21 }
 0xaa9   : > { %v3477_v46 = vpop.f32.mrb[0].mxu0 }
 0xaaa   : > { %v2868_v11 = vadd.f32 %v3477_v46, %v3179_v41  ;;  %v2859_v10 = vpop.f32.mrb[1].mxu0 }
 0xaab   : > { %v2860_v57 = vadd.f32 %v3179_v41, %v2859_v10  ;;  %v3478_v55 = vpop.f32.mrb[2].mxu0 }
 0xaac   : > { %2876 = vst [vmem:[%s4504_s5 + $0x10] sm:$0xff] %v2868_v11  ;;  %v2871_v24 = vadd.f32 %v3478_v55, %v3179_v41  ;;  %v2862_v26 = vpop.f32.mrb[3].mxu0 }
 0xaad   : > { %2874 = vst [vmem:[%s4504_s5] sm:$0xff] %v2860_v57  ;;  %v2863_v13 = vadd.f32 %v3179_v41, %v2862_v26 }
 0xaae   : > { %2877 = vst [vmem:[%s4504_s5 + $0x18] sm:$0xff] %v2871_v24 }
 0xaaf   : > { %2875 = vst [vmem:[%s4504_s5 + $0x8] sm:$0xff] %v2863_v13 }
 0xab0 PF: > { %s4505_s23 = sld [smem:[#allocation4_spill]]  ;;  %s4506_s3 = sld [smem:[#allocation3_spill]] }
 0xab1   : > { %s4507_s28 = sld [smem:[#allocation5_spill]] }
 0xab6   : > { %s32_s29 = sadd.s32 1, %s4505_s23  }
 0xab7   : > { %p29_p7 = scmp.ge.s32.totalorder %s32_s29, 4  }
 0xab9   :  { %31 = sbr.rel (!%p29_p7) target bundleno = 14 (0xe), region = 185 }

// kernel: _lambda_.3
= control target key start
LH: loop header
LB: loop body
LE: loop exit
PB: predicated region body
PF: predicated region fallthrough
CT: control target
= control target key end

     0   :  { %s6304_s6 = smov 1   ;;  %s6305_s10 = smov 2   ;;  %s7344_s0 = inlined_call_operand.smem [shape: u32[36], index: -1, kind: input, shape index: {}] }
   0x1   :  { %s6351_s5 = sld [smem:[%s7344_s0]]   ;;  %s6306_s14 = smov 3  }
   0x2   :  { %s6356_s9 = sld [smem:[%s7344_s0 + %s6304_s6]]   ;;  %s6307_s18 = smov 4  }
   0x3   :  { %s6361_s13 = sld [smem:[%s7344_s0 + %s6305_s10]]   ;;  %s6308_s22 = smov 5  }
   0x4   :  { %s6366_s17 = sld [smem:[%s7344_s0 + %s6306_s14]]   ;;  %s6309_s26 = smov 6  }
   0x5   :  { %s6371_s21 = sld [smem:[%s7344_s0 + %s6307_s18]]   ;;  %s6310_s30 = smov 7  }
   0x6   :  { %s6376_s25 = sld [smem:[%s7344_s0 + %s6308_s22]]   ;;  %s6311_s4 = smov 8  }
   0x7   :  { %7361 = sst [smem:[#allocation3_spill]] %s6351_s5  ;;  %s6312_s10 = smov 9  }
   0x8   :  { %7362 = sst [smem:[#allocation4_spill]] %s6356_s9  ;;  %s6313_s15 = smov 10  }
   0x9   :  { %7363 = sst [smem:[#allocation5_spill]] %s6361_s13  ;;  %s6314_s20 = smov 11  }
   0xa   :  { %7364 = sst [smem:[#allocation6_spill]] %s6366_s17  ;;  %s6316_s1 = smov 13  }
   0xb   :  { %7365 = sst [smem:[#allocation7_spill]] %s6371_s21  ;;  %s6317_s7 = smov 14  }
   0xc   :  { %7366 = sst [smem:[#allocation8_spill]] %s6376_s25  ;;  %s6319_s22 = smov 16  }
   0xd   :  { %s6381_s29 = sld [smem:[%s7344_s0 + %s6309_s26]]   ;;  %s6315_s26 = smov 12  }
   0xe   :  { %s6386_s3 = sld [smem:[%s7344_s0 + %s6310_s30]]   ;;  %s6320_s28 = smov 17  }
   0xf   :  { %s6391_s8 = sld [smem:[%s7344_s0 + %s6311_s4]]   ;;  %s6530_s23 = smov 0  }
  0x10   :  { %s6396_s14 = sld [smem:[%s7344_s0 + %s6312_s10]]  }
  0x11   :  { %s6401_s19 = sld [smem:[%s7344_s0 + %s6313_s15]]   ;;  %s6318_s15 = smov 15  }
  0x12   :  { %s6406_s24 = sld [smem:[%s7344_s0 + %s6314_s20]]  }
  0x13   :  { %7367 = sst [smem:[#allocation9_spill]] %s6381_s29 }
  0x14   :  { %7368 = sst [smem:[#allocation10_spill]] %s6386_s3 }
  0x15   :  { %7369 = sst [smem:[#allocation11_spill]] %s6391_s8 }
  0x16   :  { %7370 = sst [smem:[#allocation12_spill]] %s6396_s14 }
  0x17   :  { %7371 = sst [smem:[#allocation13_spill]] %s6401_s19 }
  0x18   :  { %7372 = sst [smem:[#allocation14_spill]] %s6406_s24 }
  0x19   :  { %s6411_s30 = sld [smem:[%s7344_s0 + %s6315_s26]]   ;;  %s6532_s26 = smov 0  }
  0x1a   :  { %s6416_s6 = sld [smem:[%s7344_s0 + %s6316_s1]]  }
  0x1b   :  { %s6421_s12 = sld [smem:[%s7344_s0 + %s6317_s7]]   ;;  %s6321_s7 = smov 18  }
  0x1c   :  { %s6426_s20 = sld [smem:[%s7344_s0 + %s6318_s15]]   ;;  %s6322_s15 = smov 19  }
  0x1d   :  { %s6431_s27 = sld [smem:[%s7344_s0 + %s6319_s22]]   ;;  %s6323_s22 = smov 20  }
  0x1e   :  { %s6436_s4 = sld [smem:[%s7344_s0 + %s6320_s28]]   ;;  %s6324_s28 = smov 21  }
  0x1f   :  { %7373 = sst [smem:[#allocation15_spill]] %s6411_s30 }
  0x20   :  { %7374 = sst [smem:[#allocation16_spill]] %s6416_s6 }
  0x21   :  { %7375 = sst [smem:[#allocation17_spill]] %s6421_s12 }
  0x22   :  { %7376 = sst [smem:[#allocation18_spill]] %s6426_s20 }
  0x23   :  { %7377 = sst [smem:[#allocation19_spill]] %s6431_s27 }
  0x24   :  { %s6441_s29 = sld [smem:[%s7344_s0 + %s6321_s7]]   ;;  %s6325_s7 = smov 22  }
  0x25   :  { %s6446_s25 = sld [smem:[%s7344_s0 + %s6322_s15]]   ;;  %s6326_s15 = smov 23  }
  0x26   :  { %s6451_s13 = sld [smem:[%s7344_s0 + %s6323_s22]]   ;;  %s6327_s22 = smov 24  }
  0x27   :  { %s6456_s9 = sld [smem:[%s7344_s0 + %s6324_s28]]   ;;  %s6328_s28 = smov 25  }
  0x28   :  { %s6461_s8 = sld [smem:[%s7344_s0 + %s6325_s7]]   ;;  %s6329_s7 = smov 26  }
  0x29   :  { %s6466_s19 = sld [smem:[%s7344_s0 + %s6326_s15]]   ;;  %s6330_s15 = smov 27  }
  0x2a   :  { %s6471_s5 = sld [smem:[%s7344_s0 + %s6327_s22]]   ;;  %s6331_s22 = smov 28  }
  0x2b   :  { %s6476_s21 = sld [smem:[%s7344_s0 + %s6328_s28]]   ;;  %s6332_s28 = smov 29  }
  0x2c   :  { %s6481_s3 = sld [smem:[%s7344_s0 + %s6329_s7]]   ;;  %s6333_s7 = smov 30  }
  0x2d   :  { %7378 = sst [smem:[#allocation20_spill]] %s6456_s9 }
  0x2e   :  { %s6486_s14 = sld [smem:[%s7344_s0 + %s6330_s15]]   ;;  %s6334_s15 = smov 31  }
  0x30   :  { %7379 = sst [smem:[#allocation21_spill]] %s6471_s5 }
  0x31   :  { %7380 = sst [smem:[#allocation22_spill]] %s6476_s21 }
  0x32   :  { %7381 = sst [smem:[#allocation23_spill]] %s6481_s3 }
  0x33   :  { %s6491_s5 = sld [smem:[%s7344_s0 + %s6331_s22]]   ;;  %s6335_s22 = smov 32  }
  0x34   :  { %7382 = sst [smem:[#allocation24_spill]] %s6486_s14 }
  0x35   :  { %s6496_s21 = sld [smem:[%s7344_s0 + %s6332_s28]]   ;;  %s6336_s28 = smov 33  }
  0x36   :  { %s6501_s3 = sld [smem:[%s7344_s0 + %s6333_s7]]   ;;  %s6337_s7 = smov 34  }
  0x37   :  { %s6506_s14 = sld [smem:[%s7344_s0 + %s6334_s15]]   ;;  %s6338_s15 = smov 35  }
  0x39   :  { %7383 = sst [smem:[#allocation25_spill]] %s6491_s5 }
  0x3a   :  { %s6511_s5 = sld [smem:[%s7344_s0 + %s6335_s22]]   ;;  %s6528_s22 = smov 0  }
  0x3b   :  { %7384 = sst [smem:[#allocation26_spill]] %s6496_s21 }
  0x3c   :  { %7385 = sst [smem:[#allocation27_spill]] %s6501_s3 }
  0x3d   :  { %7386 = sst [smem:[#allocation28_spill]] %s6506_s14 }
  0x3e   :  { %s6516_s21 = sld [smem:[%s7344_s0 + %s6336_s28]]  }
  0x3f   :  { %s6521_s3 = sld [smem:[%s7344_s0 + %s6337_s7]]  }
  0x40   :  { %7387 = sst [smem:[#allocation29_spill]] %s6511_s5 }
  0x41   :  { %s6526_s14 = sld [smem:[%s7344_s0 + %s6338_s15]]  }
  0x44   :  { %7388 = sst [smem:[#allocation30_spill]] %s6516_s21 }
  0x45   :  { %7389 = sst [smem:[#allocation31_spill]] %s6521_s3 }
  0x47   :  { %7390 = sst [smem:[#allocation32_spill]] %s6526_s14 }
  0x48 LB: > { %s7391_s17 = sld [smem:[#allocation6_spill]]  ;;  %7392 = sst [smem:[#allocation33_spill]] %s6294_s22  ;;  %s6294_s22 = sphi %s6528_s22, %s7450_s22   ;;  %s6302_s26 = sphi %s6532_s26, %s81_s26   ;;  %s6298_s23 = sphi %s6530_s23, %s7451_s23  }
  0x49   : > { %7393 = sst [smem:[#allocation34_spill]] %s6298_s23  ;;  %s90_s0 = sadd.s32 1, %s6298_s23 }
  0x4a   : > { %7394 = sst [smem:[#allocation35_spill]] %s6302_s26  ;;  %p5227_p0 = scmp.ge.s32.totalorder %s6302_s26, 1 }
  0x4b   : > { %p91_p1 = scmp.ge.s32.totalorder %s90_s0, 2  ;;  %p1205_p2 = scmp.lt.s32.totalorder %s6302_s26, 3 }
  0x4d   : > { %s7453_s0 = smov (%p91_p1, %s90_s0), 0  ;;  %p1206_p3 = pnand %p5227_p0, %p1205_p2 }
  0x4e   : > { %7395 = sst [smem:[#allocation36_spill]] %s7453_s0 }
  0x4f   : > { %1209 = sbr.rel (%p1206_p3) target bundleno = 4222 (0x107e), region = 160 }
  0x56   : > { %s7398_s20 = sld [smem:[#allocation18_spill]]  ;;  %p1418_p4 = scmp.lt.s32.totalorder %s6294_s22, 1  ;;  %v6550_v0 = vld [vmem:[%s7391_s17] sm:$0xff]  ;;  %v6553_v1 = vld [vmem:[%s7391_s17 + $0x8] sm:$0xff]  ;;  %v6556_v2 = vld [vmem:[%s7391_s17 + $0x10] sm:$0xff] }
  0x57   : > { %s7399_s6 = sld [smem:[#allocation16_spill]]  ;;  %s7401_s12 = sld [smem:[#allocation17_spill]]  ;;  %v6559_v3 = vld [vmem:[%s7391_s17 + $0x18] sm:$0xff]  ;;  %v6562_v4 = vld [vmem:[%s7391_s17 + $0x20] sm:$0xff]  ;;  %v6565_v5 = vld [vmem:[%s7391_s17 + $0x28] sm:$0xff] }
  0x58   : > { %s6568_s28 = scalar_select %p1418_p4, %s6294_s22, 1  ;;  %v6571_v6 = vld [vmem:[%s7391_s17 + $0x30] sm:$0xff]  ;;  %v6574_v7 = vld [vmem:[%s7391_s17 + $0x38] sm:$0xff] }
  0x59   : > { %s7402_s9 = sld [smem:[#allocation20_spill]]  ;;  %s7403_s10 = sld [smem:[#allocation21_spill]] }
  0x5a   : > { %s5921_s7 = smul.u32 192, %s6568_s28  ;;  %s5406_s11 = sshll.u32 %s6568_s28, 6 }
  0x5b   : > { %s7404_s15 = sld [smem:[#allocation22_spill]]  ;;  %s5922_s16 = smul.u32 3, %s6568_s28 }
  0x5c   : > { %s7405_s18 = sld [smem:[#allocation23_spill]]  ;;  %s6584_s0 = scalar_lea.vmem %s7398_s20, %s5406_s11 }
  0x5d   : > { %7406 = sst [smem:[#allocation37_spill]] %s6584_s0  ;;  %s7407_s23 = sld [smem:[#allocation24_spill]] }
  0x5e   : > { %s6587_s26 = scalar_lea.vmem %s7399_s6, %s5921_s7  ;;  %s7409_s17 = sld [smem:[#allocation25_spill]] }
  0x5f   : > { %7408 = sst [smem:[#allocation38_spill]] %s6587_s26  ;;  %s7410_s14 = sld [smem:[#allocation26_spill]] }
  0x60   : > { %s6592_s2 = scalar_lea.vmem %s7401_s12, %s5922_s16  ;;  %s7412_s3 = sld [smem:[#allocation27_spill]] }
  0x61   : > { %7411 = sst [smem:[#allocation39_spill]] %s6592_s2  ;;  %s6599_s30 = scalar_lea.vmem %s6446_s25, %s5406_s11 }
  0x62   : > { %s5408_s22 = sshll.u32 %s6568_s28, 7  ;;  %s5235_s0 = sshll.u32 %s6568_s28, 1 }
  0x63   : > { %s6605_s20 = scalar_lea.vmem %s7402_s9, %s5408_s22  ;;  %s6609_s6 = scalar_lea.vmem %s6461_s8, %s5235_s0 }
  0x64   : > { %s6612_s7 = scalar_lea.vmem %s6466_s19, %s5406_s11  ;;  %s1471_s26 = scalar_lea.vmem %s7403_s10, %s6568_s28 }
  0x65   : > { %s1474_s1 = scalar_lea.vmem %s7404_s15, %s6568_s28  ;;  %s1477_s27 = scalar_lea.vmem %s7405_s18, %s6568_s28 }
  0x66   : > { %s6621_s16 = scalar_lea.vmem %s7407_s23, %s5406_s11  ;;  %s1485_s12 = scalar_lea.vmem %s7409_s17, %s6568_s28 }
  0x67   : > { %s6626_s2 = scalar_lea.vmem %s7410_s14, %s5406_s11  ;;  %s1493_s21 = scalar_lea.vmem %s7412_s3, %s6568_s28 }
  0x68   : > { %s7413_s5 = sld [smem:[#allocation33_spill]] }
  0x6e   : > { %p5242_p5 = scmp.ne.s32.totalorder %s7413_s5, 0 }
  0x6f   : > { %s7414_s24 = sld [smem:[#allocation12_spill]] (!%p5242_p5)  ;;  %s7415_s22 = sld [smem:[#allocation10_spill]] (!%p5242_p5)  ;;  %v6339_v9 = vmov (!%p5242_p5), 0.0   ;;  %vm6340_vm0 = vmmov (!%p5242_p5), 0   ;;  %vm1672_vm1 = vcmask (!%p5242_p5), 1041409   ;;  %v1768_v42 = vlaneseq (!%p5242_p5) }
  0x70   : > { %1513 = sbr.rel (%p5242_p5) target bundleno = 377 (0x179), region = 164  ;;  %5601 = vmatprep.subr.bf16.mxu1 (!%p5242_p5), %v6339_v9  ;;  %5617 = vmatprep.mubr.msk.bf16.mxu1 (!%p5242_p5), %vm6340_vm0, %v6339_v9  ;;  %s7417_s5 = sld [smem:[#allocation7_spill]] (!%p5242_p5)  ;;  %v6341_v40 = vmov (!%p5242_p5), 1966171168  }
  0x71   : > { %s7418_s17 = sld [smem:[#allocation3_spill]] (!%p5242_p5)  ;;  %s7419_s3 = sld [smem:[#allocation13_spill]] (!%p5242_p5)  ;;  %v1766_v41 = vunpack.c.l.s4 (!%p5242_p5), %v6341_v40  ;;  %v1769_v44 = vshrl.u32 (!%p5242_p5), %v1768_v42, 7 }
  0x72   : > { %s7420_s14 = sld [smem:[#allocation11_spill]] (!%p5242_p5)  ;;  %s7421_s23 = sld [smem:[#allocation4_spill]] (!%p5242_p5) }
  0x73   : > { %v1767_v43 = vunpack.c.0.s8 (!%p5242_p5), %v1766_v41  ;;  %v1789_v54 = vsub.s32 (!%p5242_p5), 0, %v1769_v44  ;;  %vm1806_vm2 = vcmp.ge.s32.totalorder (!%p5242_p5), %v1769_v44, 2 }
  0x75   : > { %s7416_s9 = smov (!%p5242_p5), %s7415_s22  ;;  %v5986_v8 = vld [vmem:[%s7414_s24] sm:$0xff] (!%p5242_p5)   ;;  %v5988_v11 = vld [vmem:[%s7414_s24 + $0x8] sm:$0xff] (!%p5242_p5)   ;;  %v5990_v14 = vld [vmem:[%s7414_s24 + $0x10] sm:$0xff] (!%p5242_p5)   ;;  %v1770_v46 = vsub.s32 (!%p5242_p5), %v1767_v43, %v1769_v44 }
  0x76   : > { %v5987_v10 = vld [vmem:[%s7415_s22] sm:$0xff] (!%p5242_p5)   ;;  %5602 = vmatpush3.bf16.msra.mxu1 (!%p5242_p5), %v5986_v8  ;;  %v5989_v12 = vld [vmem:[%s7416_s9 + $0x8] sm:$0xff] (!%p5242_p5)   ;;  %v5991_v13 = vld [vmem:[%s7416_s9 + $0x10] sm:$0xff] (!%p5242_p5)  }
  0x77   : > { %5581 = vmatprep.subr.bf16.mxu0 %v5987_v10  ;;  %5603 = vmatprep.subr.bf16.mxu1 %v6339_v9  ;;  %v5993_v15 = vld [vmem:[%s7416_s9 + $0x18] sm:$0xff]   ;;  %v5995_v17 = vld [vmem:[%s7416_s9 + $0x20] sm:$0xff]   ;;  %v5997_v22 = vld [vmem:[%s7416_s9 + $0x28] sm:$0xff]  }
  0x78   : > { %5582 = vmatpush3.bf16.msra.mxu0 %v5987_v10  ;;  %v5992_v16 = vld [vmem:[%s7414_s24 + $0x18] sm:$0xff]   ;;  %v5994_v18 = vld [vmem:[%s7414_s24 + $0x20] sm:$0xff]   ;;  %v1515_v24 = vld [vmem:[%s7418_s17 + $0x8] sm:$0xff]  ;;  %s7422_s0 = smov %s7421_s23 }
  0x79   : > { %5583 = vmatprep.subr.bf16.mxu0 %v5989_v12  ;;  %v1640_v19 = vld [vmem:[%s7417_s5] sm:$0x1]  ;;  %v1641_v20 = vld [vmem:[%s7417_s5 + $0x1] sm:$0x1]  ;;  %v5996_v25 = vld [vmem:[%s7414_s24 + $0x28] sm:$0xff]  }
  0x7a   : > { %5604 = vmatpush3.bf16.msra.mxu1 %v5988_v11  ;;  %v1514_v21 = vld [vmem:[%s7418_s17] sm:$0xff]  ;;  %v1643_v23 = vpack.c.bf16 %v1641_v20, %v1641_v20  ;;  %v1642_v26 = vpack.c.bf16 %v1640_v19, %v1640_v19  ;;  %v5999_v29 = vld [vmem:[%s7416_s9 + $0x30] sm:$0xff]   ;;  %v6001_v33 = vld [vmem:[%s7416_s9 + $0x38] sm:$0xff]  }
  0x7b   : > { %5605 = vmatprep.subr.bf16.mxu1 %v6339_v9  ;;  %v1518_v27 = vpack.c.bf16 %v1515_v24, %v1514_v21  ;;  %v5998_v30 = vld [vmem:[%s7414_s24 + $0x30] sm:$0xff]   ;;  %v6000_v34 = vld [vmem:[%s7414_s24 + $0x38] sm:$0xff]   ;;  %v5252_v45 = vld [vmem:[%s7419_s3] ss:$0 sm:$0xff] }
  0x7c   : > { %5584 = vmatpush3.bf16.msra.mxu0 %v5989_v12  ;;  %v1670_v28 = vunpack.c.l.b16 %v1643_v23  ;;  %v1669_v31 = vunpack.c.l.b16 %v1642_v26  ;;  %v1516_v36 = vld [vmem:[%s7418_s17 + $0x10] sm:$0xff]  ;;  %v1517_v37 = vld [vmem:[%s7418_s17 + $0x18] sm:$0xff]  ;;  %v5243_v52 = vld [vmem:[%s7420_s14] ss:$0 sm:$0xff] }
  0x7d   : > { %5585 = vmatprep.subr.bf16.mxu0 %v5991_v13  ;;  %5597 = vmatprep.mubr.bf16.mxu0 %v1518_v27  ;;  %v1519_v39 = vpack.c.bf16 %v1517_v37, %v1516_v36  ;;  %v1805_v10 = vld [vmem:[%s7421_s23 + $0x8] sm:$0xff]  ;;  %v1804_v12 = vld [vmem:[%s7422_s0] sm:$0xff] }
  0x7e   : > { %5606 = vmatpush3.bf16.msra.mxu1 %v5990_v14  ;;  %v1671_v32 = vrot.slane %v1670_v28, 7 }
  0x7f   : > { %5607 = vmatprep.subr.bf16.mxu1 %v6339_v9 }
  0x80   : > { %5586 = vmatpush3.bf16.msra.mxu0 %v5991_v13  ;;  %v1673_v35 = vsel %vm1672_vm1, %v1671_v32, %v1669_v31 }
  0x81   : > { %5587 = vmatprep.subr.bf16.mxu0 %v5993_v15  ;;  %v1674_v38 = vpack.c.b16 %v1673_v35, %v1673_v35 }
  0x82   : > { %5608 = vmatpush3.bf16.msra.mxu1 %v5992_v16 }
  0x83   : > { %5609 = vmatprep.subr.bf16.mxu1 %v6339_v9 }
  0x84   : > { %5588 = vmatpush3.bf16.msra.mxu0 %v5993_v15 }
  0x85   : > { %5589 = vmatprep.subr.bf16.mxu0 %v5995_v17 }
  0x86   : > { %5610 = vmatpush3.bf16.msra.mxu1 %v5994_v18 }
  0x87   : > { %5611 = vmatprep.subr.bf16.mxu1 %v6339_v9 }
  0x88   : > { %5590 = vmatpush3.bf16.msra.mxu0 %v5995_v17 }
  0x89   : > { %5591 = vmatprep.subr.bf16.mxu0 %v5997_v22 }
  0x8a   : > { %5612 = vmatpush3.bf16.msra.mxu1 %v5996_v25 }
  0x8b   : > { %5613 = vmatprep.subr.bf16.mxu1 %v6339_v9 }
  0x8c   : > { %5592 = vmatpush3.bf16.msra.mxu0 %v5997_v22 }
  0x8d   : > { %5593 = vmatprep.subr.bf16.mxu0 %v5999_v29 }
  0x8e   : > { %5614 = vmatpush3.bf16.msra.mxu1 %v5998_v30 }
  0x8f   : > { %5615 = vmatprep.subr.bf16.mxu1 %v6339_v9 }
  0x90   : > { %5594 = vmatpush3.bf16.msra.mxu0 %v5999_v29 }
  0x91   : > { %5595 = vmatprep.subr.bf16.mxu0 %v6001_v33 }
  0x92   : > { %5616 = vmatpush3.bf16.msra.mxu1 %v6000_v34 }
  0x94   : > { %5596 = vmatpush3.bf16.msra.mxu0 %v6001_v33 }
  0x95   : > { %5618 = vmatmul.mubr.bf16.vlgmr.msra.gmra.mrb[0].mxu1 %v1674_v38 }
  0x97   : > { %5598 = vmatmul.mubr.bf16.vlgmr.msra.gmra.mrb[0].mxu0 %v1519_v39 }
 0x168   : > { %v1758_v47 = vpop.f32.mrb[0].mxu1 }
 0x169   : > { %v1759_v48 = vadd.f32 %v5252_v45, %v1758_v47  ;;  %v5619_v49 = vpop.f32.mrb[1].mxu1 }
 0x16a   : > { %v1761_v50 = vpop.f32.mrb[2].mxu1  ;;  %v5599_v51 = vpop.f32.mrb[0].mxu0 }
 0x16b   : > { %v1771_v53 = vrot.slane %v1759_v48, %v1770_v46  ;;  %v5620_v55 = vpop.f32.mrb[3].mxu1  ;;  %v1625_v56 = vpop.f32.mrb[1].mxu0  ;;  %v1634_v9 = vadd.f32 %v5599_v51, %v5243_v52 }
 0x16c   : > { %v5600_v57 = vpop.f32.mrb[2].mxu0  ;;  %v1626_v60 = vadd.f32 %v5243_v52, %v1625_v56 }
 0x16d   : > { %v1772_v58 = vcombine.high %v1771_v53, %v1771_v53  ;;  %v1779_v59 = vrot.slane %v1771_v53, %v1770_v46  ;;  %v1628_v61 = vpop.f32.mrb[3].mxu0  ;;  %v1637_v14 = vadd.f32 %v5600_v57, %v5243_v52 }
 0x16e   : > { %v1629_v62 = vadd.f32 %v5243_v52, %v1628_v61 }
 0x16f   : > { %v1786_v63 = vrot.slane %v1772_v58, %v1770_v46  ;;  %v1790_v8 = vrot.slane %v1779_v59, %v1789_v54 }
 0x171   : > { %v1794_v11 = vrot.slane %v1786_v63, %v1789_v54  ;;  %v1797_v13 = vadd.f32 %v1790_v8, %v1626_v60  ;;  %v1798_v15 = vadd.f32 %v1790_v8, %v1629_v62 }
 0x173   : > { %v1799_v16 = vadd.f32 %v1794_v11, %v1634_v9  ;;  %v1812_v17 = vsel %vm1806_vm2, %v1797_v13, 0.0  ;;  %v1800_v18 = vadd.f32 %v1794_v11, %v1637_v14  ;;  %v1817_v19 = vadd.f32 %v1805_v10, %v1798_v15 }
 0x174   : > { %v1816_v20 = vadd.f32 %v1812_v17, %v1804_v12 }
 0x175   : > { %v1814_v21 = vsel %vm1806_vm2, %v1799_v16, 0.0  ;;  %v1819_v22 = vadd.f32 %v1805_v10, %v1800_v18  ;;  %1821 = vst [vmem:[#allocation2 + $0x8] sm:$0xff] %v1817_v19 }
 0x176   : > { %v1818_v23 = vadd.f32 %v1814_v21, %v1804_v12  ;;  %1820 = vst [vmem:[#allocation2] sm:$0xff] %v1816_v20 }
 0x177   : > { %1823 = vst [vmem:[#allocation2 + $0x18] sm:$0xff] %v1819_v22 }
 0x178   : > { %1822 = vst [vmem:[#allocation2 + $0x10] sm:$0xff] %v1818_v23 }
 0x179 PF: > { %s7423_s10 = sld [smem:[#allocation38_spill]]  ;;  %v6342_v54 = vmov 0   ;;  %s7425_s15 = sld [smem:[#allocation15_spill]]  ;;  %vm2459_vm3 = vcmask 130048  }
 0x17a   : > { %2119 = vmatprep.mubr.bf16.mxu0 %v6342_v54  ;;  %s7424_s11 = sld [smem:[#allocation14_spill]]  ;;  %s7428_s3 = sld [smem:[#allocation39_spill]] }
 0x17b   : > { %s7429_s14 = sld [smem:[#allocation5_spill]] }
 0x17c   : > { %v6659_v25 = vld [vmem:[#allocation2 + $0x8] sm:$0xff]  ;;  %s7430_s23 = sld [smem:[#allocation37_spill]] }
 0x17d   : > { %v6657_v24 = vld [vmem:[#allocation2] sm:$0xff]  ;;  %v1843_v27 = vmul.f32 %v6659_v25, %v6659_v25 }
 0x17e   : > { %1830 = vadd.xlane.f32.xlu0 %v6657_v24  ;;  %v1842_v26 = vmul.f32 %v6657_v24, %v6657_v24  ;;  %v6669_v29 = vld [vmem:[#allocation2 + $0x18] sm:$0xff] }
 0x17f   : > { %v6666_v28 = vld [vmem:[#allocation2 + $0x10] sm:$0xff]  ;;  %v1845_v31 = vmul.f32 %v6669_v29, %v6669_v29  ;;  %v6004_v33 = vld [vmem:[%s7423_s10] ss:$12 sps:$4 sm:$0xff]   ;;  %v6005_v34 = vld [vmem:[%s7423_s10 + $0x1c] ss:$12 sps:$4 sm:$0xff]   ;;  %s7427_s22 = scalar_lea.vmem %s7425_s15, %s6568_s28  ;;  %s7433_s15 = sld [smem:[#allocation8_spill]] }
 0x180   : > { %1846 = vadd.xlane.f32.xlu1 %v1842_v26  ;;  %v1844_v30 = vmul.f32 %v6666_v28, %v6666_v28  ;;  %v6002_v32 = vld [vmem:[%s7423_s10 + $0x4] ss:$12 sps:$4 sm:$0xff]   ;;  %v6008_v36 = vld [vmem:[%s7423_s10 + $0x34] ss:$12 sps:$4 sm:$0xff]   ;;  %v6012_v39 = vld [vmem:[%s7423_s10 + $0x4c] ss:$12 sps:$4 sm:$0xff]   ;;  %s7426_s18 = scalar_lea.vmem %s7424_s11, %s6568_s28 }
 0x181   : > { %2087 = vmatprep.subr.bf16.mxu0 %v6002_v32  ;;  %v6007_v35 = vld [vmem:[%s7423_s10 + $0x18] ss:$12 sps:$4 sm:$0xff]   ;;  %v6010_v37 = vld [vmem:[%s7423_s10 + $0x8] ss:$12 sps:$4 sm:$0xff]   ;;  %v6011_v38 = vld [vmem:[%s7423_s10 + $0x30] ss:$12 sps:$4 sm:$0xff]  }
 0x182   : > { %1832 = vadd.xlane.f32.xlu0 %v6659_v25  ;;  %2088 = vmatpush1.bf16.msra.mxu0 %v6004_v33  ;;  %v6014_v40 = vld [vmem:[%s7423_s10 + $0x20] ss:$12 sps:$4 sm:$0xff]   ;;  %v6015_v41 = vld [vmem:[%s7423_s10 + $0x48] ss:$12 sps:$4 sm:$0xff]   ;;  %v6016_v42 = vld [vmem:[%s7423_s10 + $0x64] ss:$12 sps:$4 sm:$0xff]  }
 0x183   : > { %2089 = vmatprep.subr.bf16.mxu0 %v6005_v34  ;;  %5621 = vmatprep.subr.bf16.mxu1 %v6010_v37  ;;  %v6018_v43 = vld [vmem:[%s7423_s10 + $0x38] ss:$12 sps:$4 sm:$0xff]   ;;  %v6019_v44 = vld [vmem:[%s7423_s10 + $0x60] ss:$12 sps:$4 sm:$0xff]   ;;  %v6020_v45 = vld [vmem:[%s7423_s10 + $0x7c] ss:$12 sps:$4 sm:$0xff]  }
 0x184   : > { %1848 = vadd.xlane.f32.xlu1 %v1843_v27  ;;  %5622 = vmatpush3.bf16.msra.mxu1 %v6010_v37  ;;  %v6022_v46 = vld [vmem:[%s7423_s10 + $0x50] ss:$12 sps:$4 sm:$0xff]   ;;  %v6023_v47 = vld [vmem:[%s7423_s10 + $0x78] ss:$12 sps:$4 sm:$0xff]   ;;  %v6024_v48 = vld [vmem:[%s7423_s10 + $0x94] ss:$12 sps:$4 sm:$0xff]  }
 0x185   : > { %5623 = vmatprep.subr.bf16.mxu1 %v6014_v40  ;;  %v6026_v49 = vld [vmem:[%s7423_s10 + $0x68] ss:$12 sps:$4 sm:$0xff]   ;;  %v6027_v50 = vld [vmem:[%s7423_s10 + $0x90] ss:$12 sps:$4 sm:$0xff]   ;;  %v6028_v51 = vld [vmem:[%s7423_s10 + $0xac] ss:$12 sps:$4 sm:$0xff]  }
 0x186   : > { %1834 = vadd.xlane.f32.xlu0 %v6666_v28  ;;  %2090 = vmatpush1.bf16.msra.mxu0 %v6007_v35  ;;  %v6030_v52 = vld [vmem:[%s7423_s10 + $0x80] ss:$12 sps:$4 sm:$0xff]   ;;  %v6031_v53 = vld [vmem:[%s7423_s10 + $0xa8] ss:$12 sps:$4 sm:$0xff]   ;;  %v6032_v55 = vld [vmem:[%s7423_s10 + $0x98] ss:$12 sps:$4 sm:$0xff]  }
 0x187   : > { %2091 = vmatprep.subr.bf16.mxu0 %v6008_v36  ;;  %v6033_v56 = vld [vmem:[%s7423_s10 + $0xb0] ss:$12 sps:$4 sm:$0xff]   ;;  %s7431_s10 = sld [smem:[#allocation19_spill]] }
 0x188   : > { %1836 = vadd.xlane.f32.xlu1 %v6669_v29  ;;  %5624 = vmatpush3.bf16.msra.mxu1 %v6014_v40  ;;  %v5261_v40 = vld [vmem:[%s7426_s18] ss:$0 sm:$0xff]  ;;  %s7437_s18 = sld [smem:[#allocation9_spill]] }
 0x189   : > { %5625 = vmatprep.subr.bf16.mxu1 %v6018_v43 }
 0x18a   : > { %1850 = vadd.xlane.f32.xlu0 %v1844_v30  ;;  %2092 = vmatpush1.bf16.msra.mxu0 %v6011_v38 }
 0x18b   : > { %2093 = vmatprep.subr.bf16.mxu0 %v6012_v39 }
 0x18c   : > { %1852 = vadd.xlane.f32.xlu1 %v1845_v31  ;;  %5626 = vmatpush3.bf16.msra.mxu1 %v6018_v43 }
 0x18d   : > { %5627 = vmatprep.subr.bf16.mxu1 %v6022_v46  ;;  %s7432_s11 = scalar_lea.vmem %s7431_s10, %s6568_s28 }
 0x18e   : > { %2094 = vmatpush1.bf16.msra.mxu0 %v6015_v41 }
 0x18f   : > { %2095 = vmatprep.subr.bf16.mxu0 %v6016_v42 }
 0x190   : > { %5628 = vmatpush3.bf16.msra.mxu1 %v6022_v46 }
 0x191   : > { %5629 = vmatprep.subr.bf16.mxu1 %v6026_v49 }
 0x192   : > { %2096 = vmatpush1.bf16.msra.mxu0 %v6019_v44 }
 0x193   : > { %2097 = vmatprep.subr.bf16.mxu0 %v6020_v45  ;;  %v5262_v45 = vld [vmem:[%s7427_s22] ss:$0 sm:$0xff] }
 0x194   : > { %5630 = vmatpush3.bf16.msra.mxu1 %v6026_v49 }
 0x195   : > { %5631 = vmatprep.subr.bf16.mxu1 %v6030_v52 }
 0x196   : > { %2098 = vmatpush1.bf16.msra.mxu0 %v6023_v47 }
 0x197   : > { %2099 = vmatprep.subr.bf16.mxu0 %v6024_v48 }
 0x198   : > { %5632 = vmatpush3.bf16.msra.mxu1 %v6030_v52 }
 0x199   : > { %5633 = vmatprep.subr.bf16.mxu1 %v6032_v55 }
 0x19a   : > { %2100 = vmatpush1.bf16.msra.mxu0 %v6027_v50 }
 0x19b   : > { %2101 = vmatprep.subr.bf16.mxu0 %v6028_v51 }
 0x19c   : > { %5634 = vmatpush3.bf16.msra.mxu1 %v6032_v55 }
 0x19d   : > { %5635 = vmatprep.subr.bf16.mxu1 %v6033_v56 }
 0x19e   : > { %2102 = vmatpush1.bf16.msra.mxu0 %v6031_v53 }
 0x1a0   : > { %5636 = vmatpush3.bf16.msra.mxu1 %v6033_v56 }
 0x20b   : > { %v1831_v57 = vpop.xlane.xlu0 %1830 }
 0x20c   : > { %v1838_v58 = vmul.f32 0.03125, %v1831_v57 }
 0x20d   : > { %v1847_v59 = vpop.xlane.xlu1 %1846 }
 0x20e   : > { %v1858_v60 = vmul.f32 %v1838_v58, %v1838_v58  ;;  %v1854_v61 = vmul.f32 0.03125, %v1847_v59  ;;  %v1870_v36 = vsub.f32 %v6657_v24, %v1838_v58 }
 0x20f   : > { %v1833_v62 = vpop.xlane.xlu0 %1832 }
 0x210   : > { %v1862_v63 = vsub.f32 %v1854_v61, %v1858_v60  ;;  %v1839_v8 = vmul.f32 0.03125, %v1833_v62  ;;  %v1942_v61 = vld [vmem:[%s7428_s3] sm:$0x7] }
 0x211   : > { %v1849_v9 = vpop.xlane.xlu1 %1848 }
 0x212   : > { %v1866_v10 = vmax.f32 %v1862_v63, 0.0  ;;  %v1859_v11 = vmul.f32 %v1839_v8, %v1839_v8  ;;  %v1855_v12 = vmul.f32 0.03125, %v1849_v9  ;;  %v1871_v41 = vsub.f32 %v6659_v25, %v1839_v8 }
 0x213   : > { %v1835_v13 = vpop.xlane.xlu0 %1834 }
 0x214   : > { %v1874_v14 = vadd.f32 1e-05, %v1866_v10  ;;  %v1863_v15 = vsub.f32 %v1855_v12, %v1859_v11  ;;  %v1840_v16 = vmul.f32 0.03125, %v1835_v13 }
 0x215   : > { %v1837_v17 = vpop.xlane.xlu1 %1836 }
 0x216   : > { %6100 = vrsqrt.f32 %v1874_v14  ;;  %v1867_v18 = vmax.f32 %v1863_v15, 0.0  ;;  %v1860_v19 = vmul.f32 %v1840_v16, %v1840_v16  ;;  %v1841_v20 = vmul.f32 0.03125, %v1837_v17 }
 0x217   : > { %v1851_v21 = vpop.xlane.xlu0 %1850  ;;  %v1872_v47 = vsub.f32 %v6666_v28, %v1840_v16  ;;  %v1944_v28 = vlaneseq }
 0x218   : > { %v1875_v22 = vadd.f32 1e-05, %v1867_v18  ;;  %v1856_v23 = vmul.f32 0.03125, %v1851_v21  ;;  %v1861_v26 = vmul.f32 %v1841_v20, %v1841_v20  ;;  %v1873_v50 = vsub.f32 %v6669_v29, %v1841_v20 }
 0x219   : > { %v1853_v27 = vpop.xlane.xlu1 %1852  ;;  %v6713_v60 = vshrl.u32 %v1944_v28, 7 }
 0x21a   : > { %6102 = vrsqrt.f32 %v1875_v22  ;;  %v1864_v30 = vsub.f32 %v1856_v23, %v1860_v19  ;;  %v1857_v31 = vmul.f32 0.03125, %v1853_v27 }
 0x21b   : > { %v1946_v29 = vsub.s32 0, %v6713_v60  ;;  %v1950_v62 = vsub.s32 1, %v6713_v60  ;;  %v1954_v15 = vsub.s32 2, %v6713_v60 }
 0x21c   : > { %v1868_v32 = vmax.f32 %v1864_v30, 0.0  ;;  %v1865_v33 = vsub.f32 %v1857_v31, %v1861_v26 }
 0x21d   : > { %v1947_v63 = vrot.slane %v1942_v61, %v1946_v29  ;;  %v1951_v9 = vrot.slane %v1942_v61, %v1950_v62  ;;  %v1955_v19 = vrot.slane %v1942_v61, %v1954_v15 }
 0x21e   : > { %v1876_v34 = vadd.f32 1e-05, %v1868_v32  ;;  %v1869_v35 = vmax.f32 %v1865_v33, 0.0 }
 0x220   : > { %v6101_v37 = vpop.eup %6100  ;;  %6104 = vrsqrt.f32 %v1876_v34  ;;  %v1877_v38 = vadd.f32 1e-05, %v1869_v35 }
 0x221   : > { %v1882_v39 = vmul.f32 %v6101_v37, %v1870_v36 }
 0x222   : > { %6106 = vrsqrt.f32 %v1877_v38 }
 0x223   : > { %v1893_v44 = vmul.f32 %v5261_v40, %v1882_v39 }
 0x224   : > { %v6103_v42 = vpop.eup %6102 }
 0x225   : > { %v1883_v43 = vmul.f32 %v6103_v42, %v1871_v41  ;;  %v1904_v48 = vadd.f32 %v5262_v45, %v1893_v44 }
 0x227   : > { %v1894_v46 = vmul.f32 %v5261_v40, %v1883_v43 }
 0x229   : > { %v1905_v49 = vadd.f32 %v5262_v45, %v1894_v46 }
 0x22a   : > { %v6105_v24 = vpop.eup %6104 }
 0x22b   : > { %v1908_v51 = vpack.c.bf16 %v1905_v49, %v1904_v48  ;;  %v1884_v52 = vmul.f32 %v6105_v24, %v1872_v47 }
 0x22c   : > { %v6107_v53 = vpop.eup %6106 }
 0x22d   : > { %2120 = vmatmul.mubr.bf16.vlgmr.msra.gmra.mrb[0].mxu0 %v1908_v51  ;;  %5637 = vmatprep.mubr.bf16.mxu1 %v1908_v51  ;;  %v1885_v25 = vmul.f32 %v6107_v53, %v1873_v50  ;;  %v1895_v55 = vmul.f32 %v5261_v40, %v1884_v52 }
 0x22e   : > { %2129 = vmatprep.mubr.bf16.mxu0 %v6342_v54 }
 0x22f   : > { %v1896_v56 = vmul.f32 %v5261_v40, %v1885_v25  ;;  %v1906_v57 = vadd.f32 %v5262_v45, %v1895_v55 }
 0x231   : > { %v1907_v58 = vadd.f32 %v5262_v45, %v1896_v56 }
 0x233   : > { %v1909_v59 = vpack.c.bf16 %v1907_v58, %v1906_v57 }
 0x235   : > { %2130 = vmatmul.mubr.bf16.gmra.mrb[4].mxu0 %v1909_v59  ;;  %5638 = vmatmul.mubr.bf16.vlgmr.msra.gmra.mrb[0].mxu1 %v1909_v59  ;;  %v5287_v59 = vld [vmem:[%s7429_s14] ss:$0 sm:$0xff] }
 0x300   : > { %v2121_v8 = vpop.f32.mrb[0].mxu0 }
 0x301   : > { %v2122_v10 = vadd.f32 %v2121_v8, %v1947_v63  ;;  %v2123_v11 = vpop.f32.mrb[1].mxu0 }
 0x302   : > { %v2125_v12 = vpop.f32.mrb[2].mxu0  ;;  %v2124_v16 = vadd.f32 %v2123_v11, %v1951_v9 }
 0x303   : > { %v2127_v13 = vpop.f32.mrb[3].mxu0  ;;  %v2189_v14 = vmul.f32 %v2122_v10, %v6550_v0  ;;  %v2126_v26 = vadd.f32 %v2125_v12, %v1947_v63  ;;  %v2191_v43 = vmul.f32 %v2122_v10, %v6556_v2  ;;  %v2193_v45 = vmul.f32 %v2122_v10, %v6562_v4 }
 0x304   : > { %v2128_v17 = vadd.f32 %v2127_v13, %v1951_v9  ;;  %v2195_v48 = vmul.f32 %v2122_v10, %v6571_v6 }
 0x305   : > { %5645 = vmatprep.mubr.f32.mxu1 %v2189_v14  ;;  %v2190_v42 = vmul.f32 %v2126_v26, %v6553_v1  ;;  %v2192_v44 = vmul.f32 %v2126_v26, %v6559_v3  ;;  %v2194_v46 = vmul.f32 %v2126_v26, %v6565_v5  ;;  %v2196_v24 = vmul.f32 %v2126_v26, %v6574_v7 }
 0x306   : > { %v5889_v18 = vpack.c.bf16 %v2128_v17, %v2124_v16 }
 0x308   : > { %v2131_v20 = vpop.f32.mrb[4].mxu0  ;;  %v5639_v21 = vpop.f32.mrb[0].mxu1  ;;  %5890 = vmatprep.subr.bf16.mxu1 %v5889_v18 }
 0x309   : > { %v2133_v22 = vpop.f32.mrb[5].mxu0  ;;  %v2174_v23 = vpop.f32.mrb[1].mxu1  ;;  %5892 = vmatpush3.bf16.xpose.msra.mxu1 %v5889_v18  ;;  %v2183_v31 = vadd.f32 %v5639_v21, %v1955_v19  ;;  %v2132_v47 = vadd.f32 %v2131_v20, %v1947_v63 }
 0x30a   : > { %v2135_v27 = vpop.f32.mrb[6].mxu0  ;;  %v5640_v30 = vpop.f32.mrb[2].mxu1  ;;  %v2134_v35 = vadd.f32 %v2133_v22, %v1951_v9  ;;  %v2175_v36 = vadd.f32 %v2174_v23, %v1955_v19 }
 0x30b   : > { %v2186_v32 = vadd.f32 %v5640_v30, %v1955_v19  ;;  %v2137_v33 = vpop.f32.mrb[7].mxu0  ;;  %v2177_v34 = vpop.f32.mrb[3].mxu1  ;;  %v2136_v49 = vadd.f32 %v2135_v27, %v1947_v63  ;;  %v2197_v50 = vmul.f32 %v2132_v47, %v6550_v0  ;;  %v2199_v52 = vmul.f32 %v2132_v47, %v6556_v2 }
 0x30c   : > { %v2138_v37 = vadd.f32 %v2137_v33, %v1951_v9  ;;  %v2178_v38 = vadd.f32 %v2177_v34, %v1955_v19  ;;  %v2201_v25 = vmul.f32 %v2132_v47, %v6562_v4  ;;  %v2203_v56 = vmul.f32 %v2132_v47, %v6571_v6 }
 0x30d   : > { %v5901_v39 = vpack.c.bf16 %v2186_v32, %v2183_v31  ;;  %v2198_v51 = vmul.f32 %v2136_v49, %v6553_v1  ;;  %v2200_v53 = vmul.f32 %v2136_v49, %v6559_v3  ;;  %v2202_v55 = vmul.f32 %v2136_v49, %v6565_v5 }
 0x30e   : > { %v5893_v40 = vpack.c.bf16 %v2138_v37, %v2134_v35  ;;  %v5897_v41 = vpack.c.bf16 %v2178_v38, %v2175_v36  ;;  %v2204_v57 = vmul.f32 %v2136_v49, %v6574_v7 }
 0x30f   : > { %5902 = vmatprep.subr.bf16.mxu0 %v5901_v39 }
 0x310   : > { %5646 = vmatmul.mubr.f32.vlgmr.msra.gmra.mrb[4].mxu1 %v2190_v42  ;;  %5894 = vmatprep.subr.bf16.mxu1 %v5893_v40 }
 0x311   : > { %5904 = vmatpush3.bf16.msra.mxu0 %v5901_v39  ;;  %5648 = vmatprep.mubr.f32.mxu1 %v2191_v43  ;;  %v5288_v39 = vld [vmem:[%s7429_s14 + $0x1] ss:$0 sm:$0xff] }
 0x312   : > { %5896 = vmatpush3.bf16.xpose.msra.mxu1 %v5893_v40 }
 0x313   : > { %5898 = vmatprep.subr.bf16.mxu1 %v5897_v41 }
 0x314   : > { %5649 = vmatmul.mubr.f32.gmra.mrb[6].mxu1 %v2192_v44 }
 0x315   : > { %5651 = vmatprep.mubr.f32.mxu1 %v2193_v45 }
 0x318   : > { %5652 = vmatmul.mubr.f32.gmra.mrb[8].mxu1 %v2194_v46 }
 0x319   : > { %5654 = vmatprep.mubr.f32.mxu1 %v2195_v48 }
 0x31c   : > { %5655 = vmatmul.mubr.f32.gmra.mrb[10].mxu1 %v2196_v24 }
 0x31d   : > { %5661 = vmatprep.mubr.f32.mxu1 %v2197_v50 }
 0x320   : > { %5662 = vmatmul.mubr.f32.vlgmr.msra.gmra.mrb[12].mxu1 %v2198_v51 }
 0x321   : > { %5900 = vmatpush3.bf16.msra.mxu1 %v5897_v41  ;;  %5664 = vmatprep.mubr.f32.mxu1 %v2199_v52 }
 0x324   : > { %5665 = vmatmul.mubr.f32.gmra.mrb[14].mxu1 %v2200_v53 }
 0x325   : > { %5667 = vmatprep.mubr.f32.mxu1 %v2201_v25 }
 0x328   : > { %5668 = vmatmul.mubr.f32.gmra.mrb[16].mxu1 %v2202_v55 }
 0x329   : > { %5670 = vmatprep.mubr.f32.mxu1 %v2203_v56 }
 0x32c   : > { %5671 = vmatmul.mubr.f32.gmra.mrb[18].mxu1 %v2204_v57 }
 0x3e3   : > { %v5647_v58 = vpop.f32.mrb[4].mxu1 }
 0x3e4   : > { %v2416_v28 = vmul.f32 0.35355338, %v5647_v58  ;;  %v2271_v61 = vpop.f32.mrb[5].mxu1 }
 0x3e5   : > { %v2415_v63 = vmul.f32 0.35355338, %v2271_v61 }
 0x3e6   : > { %v6740_v8 = vadd.f32 %v5287_v59, %v2416_v28 }
 0x3e7   : > { %v5650_v9 = vpop.f32.mrb[6].mxu1  ;;  %v6742_v10 = vadd.f32 %v5287_v59, %v2415_v63 }
 0x3e8   : > { %v2418_v11 = vmul.f32 0.35355338, %v5650_v9  ;;  %v2281_v12 = vpop.f32.mrb[7].mxu1  ;;  %v2463_v13 = vsel %vm2459_vm3, %v6740_v8, -inf }
 0x3e9   : > { %v2417_v14 = vmul.f32 0.35355338, %v2281_v12  ;;  %2464 = vmax.xlane.f32.xlu1 %v2463_v13  ;;  %v2460_v15 = vsel %vm2459_vm3, %v6742_v10, -inf }
 0x3ea   : > { %2461 = vmax.xlane.f32.xlu0 %v2460_v15  ;;  %v6748_v16 = vadd.f32 %v5287_v59, %v2418_v11 }
 0x3eb   : > { %v5653_v17 = vpop.f32.mrb[8].mxu1  ;;  %v6750_v18 = vadd.f32 %v5287_v59, %v2417_v14 }
 0x3ec   : > { %v2420_v19 = vmul.f32 0.35355338, %v5653_v17  ;;  %v2291_v20 = vpop.f32.mrb[9].mxu1  ;;  %v2469_v21 = vsel %vm2459_vm3, %v6748_v16, -inf }
 0x3ed   : > { %v2419_v22 = vmul.f32 0.35355338, %v2291_v20  ;;  %2470 = vmax.xlane.f32.xlu1 %v2469_v21  ;;  %v2466_v23 = vsel %vm2459_vm3, %v6750_v18, -inf }
 0x3ee   : > { %2467 = vmax.xlane.f32.xlu0 %v2466_v23  ;;  %v6756_v26 = vadd.f32 %v5287_v59, %v2420_v19 }
 0x3ef   : > { %v5656_v27 = vpop.f32.mrb[10].mxu1  ;;  %v6758_v30 = vadd.f32 %v5287_v59, %v2419_v22 }
 0x3f0   : > { %v2422_v31 = vmul.f32 0.35355338, %v5656_v27  ;;  %v2301_v32 = vpop.f32.mrb[11].mxu1  ;;  %v2475_v33 = vsel %vm2459_vm3, %v6756_v26, -inf }
 0x3f1   : > { %v2421_v34 = vmul.f32 0.35355338, %v2301_v32  ;;  %2476 = vmax.xlane.f32.xlu1 %v2475_v33  ;;  %v2472_v35 = vsel %vm2459_vm3, %v6758_v30, -inf }
 0x3f2   : > { %2473 = vmax.xlane.f32.xlu0 %v2472_v35  ;;  %v6764_v36 = vadd.f32 %v5287_v59, %v2422_v31 }
 0x3f3   : > { %v5663_v37 = vpop.f32.mrb[12].mxu1  ;;  %v6766_v38 = vadd.f32 %v5287_v59, %v2421_v34 }
 0x3f4   : > { %v2424_v40 = vmul.f32 0.35355338, %v5663_v37  ;;  %v2376_v41 = vpop.f32.mrb[13].mxu1  ;;  %v2481_v42 = vsel %vm2459_vm3, %v6764_v36, -inf }
 0x3f5   : > { %v2423_v43 = vmul.f32 0.35355338, %v2376_v41  ;;  %2482 = vmax.xlane.f32.xlu1 %v2481_v42  ;;  %v2478_v44 = vsel %vm2459_vm3, %v6766_v38, -inf }
 0x3f6   : > { %2479 = vmax.xlane.f32.xlu0 %v2478_v44  ;;  %v6773_v45 = vadd.f32 %v5288_v39, %v2424_v40 }
 0x3f7   : > { %v5666_v46 = vpop.f32.mrb[14].mxu1  ;;  %v6775_v47 = vadd.f32 %v5288_v39, %v2423_v43 }
 0x3f8   : > { %v2426_v48 = vmul.f32 0.35355338, %v5666_v46  ;;  %v2386_v49 = vpop.f32.mrb[15].mxu1  ;;  %v2487_v24 = vsel %vm2459_vm3, %v6773_v45, -inf }
 0x3f9   : > { %v2425_v50 = vmul.f32 0.35355338, %v2386_v49  ;;  %2488 = vmax.xlane.f32.xlu1 %v2487_v24  ;;  %v2484_v51 = vsel %vm2459_vm3, %v6775_v47, -inf }
 0x3fa   : > { %2485 = vmax.xlane.f32.xlu0 %v2484_v51  ;;  %v6781_v52 = vadd.f32 %v5288_v39, %v2426_v48 }
 0x3fb   : > { %v5669_v53 = vpop.f32.mrb[16].mxu1  ;;  %v6783_v25 = vadd.f32 %v5288_v39, %v2425_v50 }
 0x3fc   : > { %v2428_v55 = vmul.f32 0.35355338, %v5669_v53  ;;  %v2396_v56 = vpop.f32.mrb[17].mxu1  ;;  %v2493_v57 = vsel %vm2459_vm3, %v6781_v52, -inf }
 0x3fd   : > { %v2427_v58 = vmul.f32 0.35355338, %v2396_v56  ;;  %2494 = vmax.xlane.f32.xlu1 %v2493_v57  ;;  %v2490_v59 = vsel %vm2459_vm3, %v6783_v25, -inf }
 0x3fe   : > { %2491 = vmax.xlane.f32.xlu0 %v2490_v59  ;;  %v6789_v28 = vadd.f32 %v5288_v39, %v2428_v55 }
 0x3ff   : > { %v5672_v61 = vpop.f32.mrb[18].mxu1  ;;  %v6791_v63 = vadd.f32 %v5288_v39, %v2427_v58 }
 0x400   : > { %v2430_v9 = vmul.f32 0.35355338, %v5672_v61  ;;  %v2406_v11 = vpop.f32.mrb[19].mxu1  ;;  %v2499_v12 = vsel %vm2459_vm3, %v6789_v28, -inf }
 0x401   : > { %v2429_v13 = vmul.f32 0.35355338, %v2406_v11  ;;  %2500 = vmax.xlane.f32.xlu1 %v2499_v12  ;;  %v2496_v14 = vsel %vm2459_vm3, %v6791_v63, -inf }
 0x402   : > { %2497 = vmax.xlane.f32.xlu0 %v2496_v14  ;;  %v6797_v15 = vadd.f32 %v5288_v39, %v2430_v9 }
 0x403   : > { %v6799_v17 = vadd.f32 %v5288_v39, %v2429_v13 }
 0x404   : > { %v2505_v19 = vsel %vm2459_vm3, %v6797_v15, -inf }
 0x405   : > { %2506 = vmax.xlane.f32.xlu1 %v2505_v19  ;;  %v2502_v20 = vsel %vm2459_vm3, %v6799_v17, -inf }
 0x406   : > { %2503 = vmax.xlane.f32.xlu0 %v2502_v20 }
 0x476   : > { %v2465_v21 = vpop.xlane.xlu1 %2464 }
 0x477   : > { %v2509_v22 = vsub.f32 %v6740_v8, %v2465_v21  ;;  %v2462_v23 = vpop.xlane.xlu0 %2461 }
 0x478   : > { %v2508_v27 = vsub.f32 %v6742_v10, %v2462_v23 }
 0x479   : > { %v2526_v31 = vmul.f32 1.442695, %v2509_v22 }
 0x47a   : > { %v2524_v32 = vmul.f32 1.442695, %v2508_v27  ;;  %v2471_v33 = vpop.xlane.xlu1 %2470 }
 0x47b   : > { %6108 = vpow2.f32 %v2526_v31  ;;  %v2511_v34 = vsub.f32 %v6748_v16, %v2471_v33  ;;  %v2468_v35 = vpop.xlane.xlu0 %2467 }
 0x47c   : > { %6110 = vpow2.f32 %v2524_v32  ;;  %v2510_v37 = vsub.f32 %v6750_v18, %v2468_v35 }
 0x47d   : > { %v2530_v39 = vmul.f32 1.442695, %v2511_v34 }
 0x47e   : > { %v2528_v40 = vmul.f32 1.442695, %v2510_v37  ;;  %v2477_v41 = vpop.xlane.xlu1 %2476 }
 0x47f   : > { %6112 = vpow2.f32 %v2530_v39  ;;  %v2513_v42 = vsub.f32 %v6756_v26, %v2477_v41  ;;  %v2474_v8 = vpop.xlane.xlu0 %2473 }
 0x480   : > { %6114 = vpow2.f32 %v2528_v40  ;;  %v2512_v10 = vsub.f32 %v6758_v30, %v2474_v8 }
 0x481   : > { %v2534_v43 = vmul.f32 1.442695, %v2513_v42 }
 0x482   : > { %v2532_v44 = vmul.f32 1.442695, %v2512_v10  ;;  %v2483_v46 = vpop.xlane.xlu1 %2482 }
 0x483   : > { %6116 = vpow2.f32 %v2534_v43  ;;  %v2515_v16 = vsub.f32 %v6764_v36, %v2483_v46  ;;  %v2480_v48 = vpop.xlane.xlu0 %2479 }
 0x484   : > { %6118 = vpow2.f32 %v2532_v44  ;;  %v2514_v18 = vsub.f32 %v6766_v38, %v2480_v48 }
 0x485   : > { %v6813_v49 = vpop.eup %6108  ;;  %v2538_v24 = vmul.f32 1.442695, %v2515_v16 }
 0x486   : > { %v6815_v50 = vpop.eup %6110  ;;  %v2536_v26 = vmul.f32 1.442695, %v2514_v18  ;;  %v2489_v51 = vpop.xlane.xlu1 %2488  ;;  %v2559_v30 = vsel %vm2459_vm3, %v6813_v49, 0.0 }
 0x487   : > { %6120 = vpow2.f32 %v2538_v24  ;;  %v2517_v53 = vsub.f32 %v6773_v45, %v2489_v51  ;;  %v2486_v55 = vpop.xlane.xlu0 %2485  ;;  %2560 = vadd.xlane.f32.xlu1 %v2559_v30  ;;  %v2556_v36 = vsel %vm2459_vm3, %v6815_v50, 0.0 }
 0x488   : > { %6122 = vpow2.f32 %v2536_v26  ;;  %v2516_v38 = vsub.f32 %v6775_v47, %v2486_v55  ;;  %2557 = vadd.xlane.f32.xlu0 %v2556_v36 }
 0x489   : > { %v6823_v56 = vpop.eup %6112  ;;  %v2542_v57 = vmul.f32 1.442695, %v2517_v53 }
 0x48a   : > { %v6825_v58 = vpop.eup %6114  ;;  %v2540_v59 = vmul.f32 1.442695, %v2516_v38  ;;  %v2495_v61 = vpop.xlane.xlu1 %2494  ;;  %v2565_v9 = vsel %vm2459_vm3, %v6823_v56, 0.0 }
 0x48b   : > { %6124 = vpow2.f32 %v2542_v57  ;;  %v2519_v45 = vsub.f32 %v6781_v52, %v2495_v61  ;;  %v2492_v11 = vpop.xlane.xlu0 %2491  ;;  %2566 = vadd.xlane.f32.xlu1 %v2565_v9  ;;  %v2562_v12 = vsel %vm2459_vm3, %v6825_v58, 0.0 }
 0x48c   : > { %6126 = vpow2.f32 %v2540_v59  ;;  %v2518_v47 = vsub.f32 %v6783_v25, %v2492_v11  ;;  %2563 = vadd.xlane.f32.xlu0 %v2562_v12 }
 0x48d   : > { %v6833_v13 = vpop.eup %6116  ;;  %v2546_v14 = vmul.f32 1.442695, %v2519_v45 }
 0x48e   : > { %v6835_v19 = vpop.eup %6118  ;;  %v2544_v20 = vmul.f32 1.442695, %v2518_v47  ;;  %v2501_v21 = vpop.xlane.xlu1 %2500  ;;  %v2571_v22 = vsel %vm2459_vm3, %v6833_v13, 0.0 }
 0x48f   : > { %6128 = vpow2.f32 %v2546_v14  ;;  %v2521_v52 = vsub.f32 %v6789_v28, %v2501_v21  ;;  %v2498_v23 = vpop.xlane.xlu0 %2497  ;;  %2572 = vadd.xlane.f32.xlu1 %v2571_v22  ;;  %v2568_v27 = vsel %vm2459_vm3, %v6835_v19, 0.0 }
 0x490   : > { %6130 = vpow2.f32 %v2544_v20  ;;  %v2520_v25 = vsub.f32 %v6791_v63, %v2498_v23  ;;  %2569 = vadd.xlane.f32.xlu0 %v2568_v27 }
 0x491   : > { %v6843_v31 = vpop.eup %6120  ;;  %v2550_v32 = vmul.f32 1.442695, %v2521_v52 }
 0x492   : > { %v6845_v33 = vpop.eup %6122  ;;  %v2548_v34 = vmul.f32 1.442695, %v2520_v25  ;;  %v2507_v35 = vpop.xlane.xlu1 %2506  ;;  %v2577_v37 = vsel %vm2459_vm3, %v6843_v31, 0.0 }
 0x493   : > { %6132 = vpow2.f32 %v2550_v32  ;;  %v2523_v28 = vsub.f32 %v6797_v15, %v2507_v35  ;;  %2578 = vadd.xlane.f32.xlu1 %v2577_v37  ;;  %v2504_v39 = vpop.xlane.xlu0 %2503  ;;  %v2574_v40 = vsel %vm2459_vm3, %v6845_v33, 0.0 }
 0x494   : > { %6134 = vpow2.f32 %v2548_v34  ;;  %v2522_v63 = vsub.f32 %v6799_v17, %v2504_v39  ;;  %2575 = vadd.xlane.f32.xlu0 %v2574_v40 }
 0x495   : > { %v6853_v41 = vpop.eup %6124  ;;  %v2554_v42 = vmul.f32 1.442695, %v2523_v28 }
 0x496   : > { %v6855_v8 = vpop.eup %6126  ;;  %v2552_v10 = vmul.f32 1.442695, %v2522_v63  ;;  %v2583_v43 = vsel %vm2459_vm3, %v6853_v41, 0.0 }
 0x497   : > { %6136 = vpow2.f32 %v2554_v42  ;;  %2584 = vadd.xlane.f32.xlu1 %v2583_v43  ;;  %v2580_v15 = vsel %vm2459_vm3, %v6855_v8, 0.0 }
 0x498   : > { %6138 = vpow2.f32 %v2552_v10  ;;  %2581 = vadd.xlane.f32.xlu0 %v2580_v15 }
 0x499   : > { %v6861_v44 = vpop.eup %6128 }
 0x49a   : > { %v6863_v17 = vpop.eup %6130  ;;  %v2589_v46 = vsel %vm2459_vm3, %v6861_v44, 0.0 }
 0x49b   : > { %2590 = vadd.xlane.f32.xlu1 %v2589_v46  ;;  %v2586_v16 = vsel %vm2459_vm3, %v6863_v17, 0.0 }
 0x49c   : > { %2587 = vadd.xlane.f32.xlu0 %v2586_v16 }
 0x49d   : > { %v6869_v48 = vpop.eup %6132 }
 0x49e   : > { %v6871_v18 = vpop.eup %6134  ;;  %v2595_v24 = vsel %vm2459_vm3, %v6869_v48, 0.0 }
 0x49f   : > { %2596 = vadd.xlane.f32.xlu1 %v2595_v24  ;;  %v2592_v26 = vsel %vm2459_vm3, %v6871_v18, 0.0 }
 0x4a0   : > { %2593 = vadd.xlane.f32.xlu0 %v2592_v26 }
 0x4a1   : > { %v6877_v51 = vpop.eup %6136 }
 0x4a2   : > { %v6879_v30 = vpop.eup %6138  ;;  %v2601_v53 = vsel %vm2459_vm3, %v6877_v51, 0.0 }
 0x4a3   : > { %2602 = vadd.xlane.f32.xlu1 %v2601_v53  ;;  %v2598_v55 = vsel %vm2459_vm3, %v6879_v30, 0.0 }
 0x4a4   : > { %2599 = vadd.xlane.f32.xlu0 %v2598_v55 }
 0x514   : > { %v2561_v36 = vpop.xlane.xlu1 %2560 }
 0x515   : > { %6140 = vrcp.f32 %v2561_v36  ;;  %v2558_v38 = vpop.xlane.xlu0 %2557  ;;  %v6036_v36 = vld [vmem:[%s7430_s23 + $0x10] sm:$0xff]  }
 0x516   : > { %6142 = vrcp.f32 %v2558_v38  ;;  %v6039_v38 = vld [vmem:[%s7430_s23 + $0x28] sm:$0xff]  }
 0x518   : > { %v2567_v57 = vpop.xlane.xlu1 %2566 }
 0x519   : > { %6144 = vrcp.f32 %v2567_v57  ;;  %v2564_v59 = vpop.xlane.xlu0 %2563  ;;  %v6040_v57 = vld [vmem:[%s7430_s23 + $0x30] sm:$0xff]  }
 0x51a   : > { %6146 = vrcp.f32 %v2564_v59  ;;  %v6041_v59 = vld [vmem:[%s7430_s23 + $0x38] sm:$0xff]  }
 0x51c   : > { %v2573_v61 = vpop.xlane.xlu1 %2572 }
 0x51d   : > { %6148 = vrcp.f32 %v2573_v61  ;;  %v2570_v9 = vpop.xlane.xlu0 %2569 }
 0x51e   : > { %6150 = vrcp.f32 %v2570_v9 }
 0x51f   : > { %v6141_v45 = vpop.eup %6140 }
 0x520   : > { %v6143_v11 = vpop.eup %6142  ;;  %v2579_v12 = vpop.xlane.xlu1 %2578  ;;  %v2621_v20 = vmul.f32 %v6141_v45, %v6813_v49 }
 0x521   : > { %6152 = vrcp.f32 %v2579_v12  ;;  %v2576_v47 = vpop.xlane.xlu0 %2575  ;;  %v2620_v14 = vmul.f32 %v6143_v11, %v6815_v50 }
 0x522   : > { %6154 = vrcp.f32 %v2576_v47 }
 0x523   : > { %v6145_v21 = vpop.eup %6144  ;;  %5677 = vmatprep.mubr.msk.f32.mxu1 %vm2459_vm3, %v2620_v14 }
 0x524   : > { %v6147_v22 = vpop.eup %6146  ;;  %v2585_v52 = vpop.xlane.xlu1 %2584  ;;  %5678 = vmatmul.mubr.msk.f32.vlgmr.msra.gmra.mrb[20].mxu1 %vm2459_vm3, %v2621_v20  ;;  %v2623_v25 = vmul.f32 %v6145_v21, %v6823_v56 }
 0x525   : > { %6156 = vrcp.f32 %v2585_v52  ;;  %v2582_v23 = vpop.xlane.xlu0 %2581  ;;  %v2622_v27 = vmul.f32 %v6147_v22, %v6825_v58 }
 0x526   : > { %6158 = vrcp.f32 %v2582_v23 }
 0x527   : > { %v6149_v32 = vpop.eup %6148  ;;  %5680 = vmatprep.mubr.msk.f32.mxu1 %vm2459_vm3, %v2622_v27 }
 0x528   : > { %v6151_v50 = vpop.eup %6150  ;;  %v2591_v49 = vpop.xlane.xlu1 %2590  ;;  %5681 = vmatmul.mubr.msk.f32.gmra.mrb[22].mxu1 %vm2459_vm3, %v2623_v25  ;;  %v2625_v37 = vmul.f32 %v6149_v32, %v6833_v13 }
 0x529   : > { %6160 = vrcp.f32 %v2591_v49  ;;  %v2588_v34 = vpop.xlane.xlu0 %2587  ;;  %v2624_v35 = vmul.f32 %v6151_v50, %v6835_v19 }
 0x52a   : > { %6162 = vrcp.f32 %v2588_v34 }
 0x52b   : > { %v6153_v28 = vpop.eup %6152  ;;  %5683 = vmatprep.mubr.msk.f32.mxu1 %vm2459_vm3, %v2624_v35 }
 0x52c   : > { %v6155_v58 = vpop.eup %6154  ;;  %v2597_v39 = vpop.xlane.xlu1 %2596  ;;  %5684 = vmatmul.mubr.msk.f32.gmra.mrb[24].mxu1 %vm2459_vm3, %v2625_v37  ;;  %v2627_v63 = vmul.f32 %v6153_v28, %v6843_v31 }
 0x52d   : > { %6164 = vrcp.f32 %v2597_v39  ;;  %v2594_v56 = vpop.xlane.xlu0 %2593  ;;  %v2626_v40 = vmul.f32 %v6155_v58, %v6845_v33 }
 0x52e   : > { %6166 = vrcp.f32 %v2594_v56 }
 0x52f   : > { %v6157_v42 = vpop.eup %6156  ;;  %5686 = vmatprep.mubr.msk.f32.mxu1 %vm2459_vm3, %v2626_v40 }
 0x530   : > { %v6159_v19 = vpop.eup %6158  ;;  %v2603_v10 = vpop.xlane.xlu1 %2602  ;;  %5687 = vmatmul.mubr.msk.f32.gmra.mrb[26].mxu1 %vm2459_vm3, %v2627_v63  ;;  %v2629_v15 = vmul.f32 %v6157_v42, %v6853_v41 }
 0x531   : > { %6168 = vrcp.f32 %v2603_v10  ;;  %v2600_v13 = vpop.xlane.xlu0 %2599  ;;  %v2628_v43 = vmul.f32 %v6159_v19, %v6855_v8 }
 0x532   : > { %6170 = vrcp.f32 %v2600_v13 }
 0x533   : > { %v6161_v46 = vpop.eup %6160  ;;  %5693 = vmatprep.mubr.msk.f32.mxu0 %vm2459_vm3, %v2628_v43 }
 0x534   : > { %v6163_v33 = vpop.eup %6162  ;;  %5694 = vmatmul.mubr.msk.f32.vlgmr.msra.gmra.mrb[8].mxu0 %vm2459_vm3, %v2629_v15  ;;  %v2631_v16 = vmul.f32 %v6161_v46, %v6861_v44 }
 0x535   : > { %v2630_v31 = vmul.f32 %v6163_v33, %v6863_v17 }
 0x537   : > { %v6165_v24 = vpop.eup %6164  ;;  %5696 = vmatprep.mubr.msk.f32.mxu0 %vm2459_vm3, %v2630_v31 }
 0x538   : > { %v6167_v26 = vpop.eup %6166  ;;  %5697 = vmatmul.mubr.msk.f32.gmra.mrb[10].mxu0 %vm2459_vm3, %v2631_v16  ;;  %v2633_v8 = vmul.f32 %v6165_v24, %v6869_v48  ;;  %v6035_v48 = vld [vmem:[%s7430_s23 + $0x8] sm:$0xff]  }
 0x539   : > { %v2632_v41 = vmul.f32 %v6167_v26, %v6871_v18  ;;  %v6034_v18 = vld [vmem:[%s7430_s23] sm:$0xff]  }
 0x53a   : > { %5705 = vmatprep.subr.bf16.mxu1 %v6034_v18 }
 0x53b   : > { %v6169_v53 = vpop.eup %6168  ;;  %5699 = vmatprep.mubr.msk.f32.mxu0 %vm2459_vm3, %v2632_v41  ;;  %5706 = vmatpush3.bf16.msra.mxu1 %v6034_v18 }
 0x53c   : > { %v6171_v17 = vpop.eup %6170  ;;  %5700 = vmatmul.mubr.msk.f32.gmra.mrb[12].mxu0 %vm2459_vm3, %v2633_v8  ;;  %v2635_v55 = vmul.f32 %v6169_v53, %v6877_v51  ;;  %5707 = vmatprep.subr.bf16.mxu1 %v6035_v48  ;;  %v6038_v51 = vld [vmem:[%s7430_s23 + $0x20] sm:$0xff]  }
 0x53d   : > { %v2634_v44 = vmul.f32 %v6171_v17, %v6879_v30  ;;  %v6037_v30 = vld [vmem:[%s7430_s23 + $0x18] sm:$0xff]  }
 0x53f   : > { %5702 = vmatprep.mubr.msk.f32.mxu0 %vm2459_vm3, %v2634_v44  ;;  %5708 = vmatpush3.bf16.msra.mxu1 %v6035_v48 }
 0x540   : > { %5703 = vmatmul.mubr.msk.f32.gmra.mrb[14].mxu0 %vm2459_vm3, %v2635_v55  ;;  %5709 = vmatprep.subr.bf16.mxu1 %v6036_v36 }
 0x543   : > { %5710 = vmatpush3.bf16.msra.mxu1 %v6036_v36  ;;  %v6042_v36 = vld [vmem:[%s6605_s20] ss:$8 sps:$4 sm:$0xff]  }
 0x544   : > { %5711 = vmatprep.subr.bf16.mxu1 %v6037_v30 }
 0x547   : > { %5712 = vmatpush3.bf16.msra.mxu1 %v6037_v30  ;;  %v6044_v30 = vld [vmem:[%s6605_s20 + $0x4] ss:$8 sps:$4 sm:$0xff]  }
 0x548   : > { %5713 = vmatprep.subr.bf16.mxu1 %v6038_v51 }
 0x54b   : > { %5714 = vmatpush3.bf16.msra.mxu1 %v6038_v51  ;;  %v5305_v51 = vld [vmem:[%s7432_s11] ss:$0 sm:$0xff] }
 0x54c   : > { %5715 = vmatprep.subr.bf16.mxu1 %v6039_v38 }
 0x54f   : > { %5716 = vmatpush3.bf16.msra.mxu1 %v6039_v38 }
 0x550   : > { %5717 = vmatprep.subr.bf16.mxu1 %v6040_v57 }
 0x553   : > { %5718 = vmatpush3.bf16.msra.mxu1 %v6040_v57 }
 0x554   : > { %5719 = vmatprep.subr.bf16.mxu1 %v6041_v59 }
 0x557   : > { %5720 = vmatpush3.bf16.msra.mxu1 %v6041_v59 }
 0x558   : > { %3372 = vmatprep.subr.bf16.mxu1 %v6044_v30 }
 0x5f7   : > { %v5679_v61 = vpop.f32.mrb[20].mxu1 }
 0x5f8   : > { %v2726_v9 = vpop.f32.mrb[21].mxu1  ;;  %v2895_v11 = vmul.f32 %v5679_v61, %v6553_v1 }
 0x5f9   : > { %v2894_v14 = vmul.f32 %v2726_v9, %v6550_v0  ;;  %v6260_v9 = vld [vmem:[#allocation2 + $0x10] sm:$0xff] }
 0x5fb   : > { %v5682_v45 = vpop.f32.mrb[22].mxu1 }
 0x5fc   : > { %v2897_v12 = vmul.f32 %v5682_v45, %v6559_v3  ;;  %v2736_v47 = vpop.f32.mrb[23].mxu1 }
 0x5fd   : > { %v2896_v20 = vmul.f32 %v2736_v47, %v6556_v2 }
 0x5fe   : > { %v2911_v21 = vadd.f32 %v2897_v12, %v2895_v11 }
 0x5ff   : > { %v2910_v22 = vadd.f32 %v2896_v20, %v2894_v14  ;;  %v5685_v52 = vpop.f32.mrb[24].mxu1  ;;  %v6261_v14 = vld [vmem:[#allocation2 + $0x18] sm:$0xff] }
 0x600   : > { %v2899_v23 = vmul.f32 %v5685_v52, %v6565_v5  ;;  %v2746_v27 = vpop.f32.mrb[25].mxu1 }
 0x601   : > { %v2898_v25 = vmul.f32 %v2746_v27, %v6562_v4 }
 0x602   : > { %v2915_v32 = vadd.f32 %v2911_v21, %v2899_v23  ;;  %v6263_v23 = vld [vmem:[#allocation2 + $0x8] sm:$0xff] }
 0x603   : > { %v2914_v50 = vadd.f32 %v2910_v22, %v2898_v25  ;;  %v5688_v49 = vpop.f32.mrb[26].mxu1  ;;  %v6262_v22 = vld [vmem:[#allocation2] sm:$0xff] }
 0x604   : > { %v2901_v34 = vmul.f32 %v5688_v49, %v6574_v7  ;;  %v2756_v35 = vpop.f32.mrb[27].mxu1 }
 0x605   : > { %v2900_v37 = vmul.f32 %v2756_v35, %v6571_v6  ;;  %v6045_v35 = vld [vmem:[%s6605_s20 + $0x10] ss:$8 sps:$4 sm:$0xff]  }
 0x606   : > { %v2919_v28 = vadd.f32 %v2915_v32, %v2901_v34  ;;  %v6047_v34 = vld [vmem:[%s6605_s20 + $0x14] ss:$8 sps:$4 sm:$0xff]  }
 0x607   : > { %v2918_v58 = vadd.f32 %v2914_v50, %v2900_v37  ;;  %v5695_v39 = vpop.f32.mrb[8].mxu0  ;;  %v6050_v37 = vld [vmem:[%s6605_s20 + $0x24] ss:$8 sps:$4 sm:$0xff]  }
 0x608   : > { %v2855_v56 = vpop.f32.mrb[9].mxu0  ;;  %v2903_v42 = vmul.f32 %v5695_v39, %v6553_v1  ;;  %v6054_v39 = vld [vmem:[%s6605_s20 + $0x34] ss:$8 sps:$4 sm:$0xff]  }
 0x609   : > { %v2922_v40 = vpack.c.bf16 %v2919_v28, %v2918_v58  ;;  %v2902_v13 = vmul.f32 %v2855_v56, %v6550_v0  ;;  %v6048_v28 = vld [vmem:[%s6605_s20 + $0x20] ss:$8 sps:$4 sm:$0xff]   ;;  %v6052_v56 = vld [vmem:[%s6605_s20 + $0x30] ss:$8 sps:$4 sm:$0xff]  }
 0x60a   : > { %v6051_v58 = vld [vmem:[%s6599_s30] sm:$0xff]  }
 0x60b   : > { %v5698_v63 = vpop.f32.mrb[10].mxu0  ;;  %5721 = vmatprep.mubr.bf16.mxu1 %v2922_v40  ;;  %5725 = vmatprep.subr.bf16.mxu0 %v6051_v58  ;;  %v6055_v40 = vld [vmem:[%s6599_s30 + $0x8] sm:$0xff]  }
 0x60c   : > { %v2905_v19 = vmul.f32 %v5698_v63, %v6559_v3  ;;  %v2865_v10 = vpop.f32.mrb[11].mxu0  ;;  %5726 = vmatpush3.bf16.msra.mxu0 %v6051_v58  ;;  %v6058_v63 = vld [vmem:[%s6605_s20 + $0x44] ss:$8 sps:$4 sm:$0xff]  }
 0x60d   : > { %v2904_v43 = vmul.f32 %v2865_v10, %v6556_v2  ;;  %5727 = vmatprep.subr.bf16.mxu0 %v6055_v40  ;;  %v6062_v10 = vld [vmem:[%s6605_s20 + $0x54] ss:$8 sps:$4 sm:$0xff]  }
 0x60e   : > { %v2913_v15 = vadd.f32 %v2905_v19, %v2903_v42  ;;  %v6056_v42 = vld [vmem:[%s6605_s20 + $0x40] ss:$8 sps:$4 sm:$0xff]   ;;  %v6059_v19 = vld [vmem:[%s6599_s30 + $0x10] sm:$0xff]  }
 0x60f   : > { %v2912_v46 = vadd.f32 %v2904_v43, %v2902_v13  ;;  %v5701_v33 = vpop.f32.mrb[12].mxu0  ;;  %v6060_v13 = vld [vmem:[%s6605_s20 + $0x50] ss:$8 sps:$4 sm:$0xff]  }
 0x610   : > { %v2907_v31 = vmul.f32 %v5701_v33, %v6565_v5  ;;  %v2875_v16 = vpop.f32.mrb[13].mxu0  ;;  %5728 = vmatpush3.bf16.msra.mxu0 %v6055_v40  ;;  %v6063_v43 = vld [vmem:[%s6599_s30 + $0x18] sm:$0xff]   ;;  %v6067_v33 = vld [vmem:[%s6599_s30 + $0x20] sm:$0xff]  }
 0x611   : > { %v2906_v24 = vmul.f32 %v2875_v16, %v6562_v4  ;;  %5729 = vmatprep.subr.bf16.mxu0 %v6059_v19  ;;  %v6068_v16 = vld [vmem:[%s6605_s20 + $0x70] ss:$8 sps:$4 sm:$0xff]  }
 0x612   : > { %v2917_v26 = vadd.f32 %v2913_v15, %v2907_v31  ;;  %v6066_v15 = vld [vmem:[%s6605_s20 + $0x64] ss:$8 sps:$4 sm:$0xff]   ;;  %v6070_v31 = vld [vmem:[%s6605_s20 + $0x74] ss:$8 sps:$4 sm:$0xff]  }
 0x613   : > { %v2916_v41 = vadd.f32 %v2912_v46, %v2906_v24  ;;  %v5704_v8 = vpop.f32.mrb[14].mxu0  ;;  %v6064_v46 = vld [vmem:[%s6605_s20 + $0x60] ss:$8 sps:$4 sm:$0xff]   ;;  %s7435_s20 = scalar_lea.vmem %s6441_s29, %s6568_s28 }
 0x614   : > { %v2909_v53 = vmul.f32 %v5704_v8, %v6574_v7  ;;  %v2885_v17 = vpop.f32.mrb[15].mxu0  ;;  %5730 = vmatpush3.bf16.msra.mxu0 %v6059_v19  ;;  %v6071_v24 = vld [vmem:[%s6599_s30 + $0x28] sm:$0xff]   ;;  %v6074_v8 = vld [vmem:[%s6599_s30 + $0x38] sm:$0xff]  }
 0x615   : > { %v2908_v44 = vmul.f32 %v2885_v17, %v6571_v6  ;;  %5731 = vmatprep.subr.bf16.mxu0 %v6063_v43 }
 0x616   : > { %v2921_v55 = vadd.f32 %v2917_v26, %v2909_v53  ;;  %v6072_v26 = vld [vmem:[%s7433_s15] sm:$0xff]   ;;  %v6075_v53 = vld [vmem:[%s7433_s15 + $0x8] sm:$0xff]  }
 0x617   : > { %v2920_v18 = vadd.f32 %v2916_v41, %v2908_v44  ;;  %v6073_v41 = vld [vmem:[%s6599_s30 + $0x30] sm:$0xff]   ;;  %s7434_s30 = scalar_lea.vmem %s6436_s4, %s6568_s28 }
 0x618   : > { %5732 = vmatpush3.bf16.msra.mxu0 %v6063_v43 }
 0x619   : > { %v2923_v48 = vpack.c.bf16 %v2921_v55, %v2920_v18  ;;  %5733 = vmatprep.subr.bf16.mxu0 %v6067_v33 }
 0x61b   : > { %5722 = vmatmul.mubr.bf16.vlgmr.msra.gmra.mrb[28].mxu1 %v2923_v48 }
 0x61c   : > { %3404 = vmatprep.mubr.bf16.mxu1 %v6342_v54  ;;  %3373 = vmatpush1.bf16.msra.mxu1 %v6042_v36 }
 0x61d   : > { %3374 = vmatprep.subr.bf16.mxu1 %v6047_v34  ;;  %5734 = vmatpush3.bf16.msra.mxu0 %v6067_v33 }
 0x61e   : > { %5735 = vmatprep.subr.bf16.mxu0 %v6071_v24 }
 0x620   : > { %3375 = vmatpush1.bf16.msra.mxu1 %v6045_v35 }
 0x621   : > { %3376 = vmatprep.subr.bf16.mxu1 %v6050_v37  ;;  %5736 = vmatpush3.bf16.msra.mxu0 %v6071_v24 }
 0x622   : > { %5737 = vmatprep.subr.bf16.mxu0 %v6073_v41 }
 0x624   : > { %3377 = vmatpush1.bf16.msra.mxu1 %v6048_v28 }
 0x625   : > { %3378 = vmatprep.subr.bf16.mxu1 %v6054_v39  ;;  %5738 = vmatpush3.bf16.msra.mxu0 %v6073_v41 }
 0x626   : > { %5739 = vmatprep.subr.bf16.mxu0 %v6074_v8 }
 0x628   : > { %3379 = vmatpush1.bf16.msra.mxu1 %v6052_v56 }
 0x629   : > { %3380 = vmatprep.subr.bf16.mxu1 %v6058_v63  ;;  %5740 = vmatpush3.bf16.msra.mxu0 %v6074_v8 }
 0x62c   : > { %3381 = vmatpush1.bf16.msra.mxu1 %v6056_v42  ;;  %v5314_v42 = vld [vmem:[%s7434_s30] ss:$0 sm:$0xff] }
 0x62d   : > { %3382 = vmatprep.subr.bf16.mxu1 %v6062_v10 }
 0x630   : > { %3383 = vmatpush1.bf16.msra.mxu1 %v6060_v13 }
 0x631   : > { %3384 = vmatprep.subr.bf16.mxu1 %v6066_v15 }
 0x634   : > { %3385 = vmatpush1.bf16.msra.mxu1 %v6064_v46 }
 0x635   : > { %3386 = vmatprep.subr.bf16.mxu1 %v6070_v31  ;;  %v5315_v31 = vld [vmem:[%s7435_s20] ss:$0 sm:$0xff] }
 0x638   : > { %3387 = vmatpush1.bf16.msra.mxu1 %v6068_v16 }
 0x63b   : > { %3405 = vmatmul.mubr.bf16.vlgmr.msra.gmra.mrb[32].mxu1 %v6072_v26 }
 0x63c   : > { %3414 = vmatprep.mubr.bf16.mxu1 %v6342_v54 }
 0x643   : > { %3415 = vmatmul.mubr.bf16.gmra.mrb[36].mxu1 %v6075_v53 }
 0x6ee   : > { %v5723_v38 = vpop.f32.mrb[28].mxu1 }
 0x6ef   : > { %v3038_v57 = vadd.f32 %v5723_v38, %v5305_v51  ;;  %v3029_v59 = vpop.f32.mrb[29].mxu1 }
 0x6f0   : > { %v5724_v61 = vpop.f32.mrb[30].mxu1  ;;  %v3030_v11 = vadd.f32 %v5305_v51, %v3029_v59 }
 0x6f1   : > { %v6947_v45 = vadd.f32 %v6260_v9, %v3038_v57  ;;  %v3041_v12 = vadd.f32 %v5724_v61, %v5305_v51  ;;  %v3032_v47 = vpop.f32.mrb[31].mxu1 }
 0x6f2   : > { %v3033_v21 = vadd.f32 %v5305_v51, %v3032_v47  ;;  %v6952_v52 = vadd.f32 %v6262_v22, %v3030_v11 }
 0x6f3   : > { %v6949_v20 = vadd.f32 %v6261_v14, %v3041_v12  ;;  %3052 = vadd.xlane.f32.xlu0 %v6947_v45  ;;  %v3062_v50 = vmul.f32 %v6947_v45, %v6947_v45 }
 0x6f4   : > { %v6955_v27 = vadd.f32 %v6263_v23, %v3033_v21  ;;  %v3060_v25 = vmul.f32 %v6952_v52, %v6952_v52 }
 0x6f5   : > { %3054 = vadd.xlane.f32.xlu1 %v6949_v20  ;;  %v3063_v49 = vmul.f32 %v6949_v20, %v6949_v20 }
 0x6f6   : > { %v3061_v32 = vmul.f32 %v6955_v27, %v6955_v27 }
 0x6f7   : > { %3048 = vadd.xlane.f32.xlu0 %v6952_v52 }
 0x6f9   : > { %3050 = vadd.xlane.f32.xlu1 %v6955_v27 }
 0x6fb   : > { %3064 = vadd.xlane.f32.xlu0 %v3060_v25 }
 0x6fd   : > { %3066 = vadd.xlane.f32.xlu1 %v3061_v32 }
 0x6ff   : > { %3068 = vadd.xlane.f32.xlu0 %v3062_v50 }
 0x701   : > { %3070 = vadd.xlane.f32.xlu1 %v3063_v49 }
 0x780   : > { %v3053_v17 = vpop.xlane.xlu0 %3052 }
 0x781   : > { %v3058_v51 = vmul.f32 0.03125, %v3053_v17 }
 0x782   : > { %v3055_v44 = vpop.xlane.xlu1 %3054 }
 0x783   : > { %v3059_v59 = vmul.f32 0.03125, %v3055_v44  ;;  %v3078_v47 = vmul.f32 %v3058_v51, %v3058_v51  ;;  %v3090_v43 = vsub.f32 %v6947_v45, %v3058_v51  ;;  %v3268_v51 = vld [vmem:[%s6609_s6] sm:$0x3]  ;;  %s7436_s6 = scalar_lea.vmem %s6451_s13, %s6568_s28 }
 0x784   : > { %v3049_v55 = vpop.xlane.xlu0 %3048 }
 0x785   : > { %v3056_v18 = vmul.f32 0.03125, %v3049_v55  ;;  %v3079_v23 = vmul.f32 %v3059_v59, %v3059_v59  ;;  %v3091_v16 = vsub.f32 %v6949_v20, %v3059_v59  ;;  %v3406_v59 = vpop.f32.mrb[32].mxu1 }
 0x786   : > { %v3051_v48 = vpop.xlane.xlu1 %3050 }
 0x787   : > { %v3057_v36 = vmul.f32 0.03125, %v3051_v48  ;;  %v3076_v38 = vmul.f32 %v3056_v18, %v3056_v18  ;;  %v3088_v40 = vsub.f32 %v6952_v52, %v3056_v18 }
 0x788   : > { %v3065_v30 = vpop.xlane.xlu0 %3064 }
 0x789   : > { %v3072_v57 = vmul.f32 0.03125, %v3065_v30  ;;  %v3077_v9 = vmul.f32 %v3057_v36, %v3057_v36  ;;  %v3089_v19 = vsub.f32 %v6955_v27, %v3057_v36 }
 0x78a   : > { %v3067_v61 = vpop.xlane.xlu1 %3066 }
 0x78b   : > { %v3080_v54 = vsub.f32 %v3072_v57, %v3076_v38  ;;  %v3073_v11 = vmul.f32 0.03125, %v3067_v61  ;;  %v3273_v38 = vrot.slane %v3268_v51, %v1946_v29  ;;  %v3277_v57 = vrot.slane %v3268_v51, %v1950_v62 }
 0x78c   : > { %v3069_v12 = vpop.xlane.xlu0 %3068 }
 0x78d   : > { %v3084_v14 = vmax.f32 %v3080_v54, 0.0  ;;  %v3081_v21 = vsub.f32 %v3073_v11, %v3077_v9  ;;  %v3074_v22 = vmul.f32 0.03125, %v3069_v12  ;;  %v3407_v61 = vadd.f32 %v3406_v59, %v3273_v38  ;;  %v3408_v9 = vpop.f32.mrb[33].mxu1 }
 0x78e   : > { %v3071_v25 = vpop.xlane.xlu1 %3070  ;;  %v3409_v54 = vadd.f32 %v3408_v9, %v3277_v57  ;;  %v3410_v11 = vpop.f32.mrb[34].mxu1 }
 0x78f   : > { %v3092_v32 = vadd.f32 1e-05, %v3084_v14  ;;  %v3085_v50 = vmax.f32 %v3081_v21, 0.0  ;;  %v3082_v49 = vsub.f32 %v3074_v22, %v3078_v47  ;;  %v3075_v34 = vmul.f32 0.03125, %v3071_v25  ;;  %v3412_v47 = vpop.f32.mrb[35].mxu1 }
 0x790   : > { %v3411_v12 = vadd.f32 %v3410_v11, %v3273_v38  ;;  %v3413_v14 = vadd.f32 %v3412_v47, %v3277_v57 }
 0x791   : > { %6172 = vrsqrt.f32 %v3092_v32  ;;  %v3093_v35 = vadd.f32 1e-05, %v3085_v50  ;;  %v3086_v37 = vmax.f32 %v3082_v49, 0.0  ;;  %v3083_v28 = vsub.f32 %v3075_v34, %v3079_v23  ;;  %v3416_v23 = vpop.f32.mrb[36].mxu1 }
 0x792   : > { %v5905_v21 = vpack.c.bf16 %v3411_v12, %v3407_v61  ;;  %v5913_v22 = vpack.c.bf16 %v3413_v14, %v3409_v54  ;;  %v3417_v25 = vadd.f32 %v3416_v23, %v3273_v38  ;;  %v3418_v29 = vpop.f32.mrb[37].mxu1 }
 0x793   : > { %6174 = vrsqrt.f32 %v3093_v35  ;;  %v3094_v58 = vadd.f32 1e-05, %v3086_v37  ;;  %v3087_v39 = vmax.f32 %v3083_v28, 0.0  ;;  %v3419_v32 = vadd.f32 %v3418_v29, %v3277_v57  ;;  %v3420_v60 = vpop.f32.mrb[38].mxu1  ;;  %v5316_v37 = vld [vmem:[%s7436_s6] ss:$0 sm:$0xff] }
 0x794   : > { %5906 = vmatprep.subr.bf16.mxu0 %v5905_v21  ;;  %v3421_v62 = vadd.f32 %v3420_v60, %v3273_v38  ;;  %v3422_v50 = vpop.f32.mrb[39].mxu1 }
 0x795   : > { %6176 = vrsqrt.f32 %v3094_v58  ;;  %v3095_v56 = vadd.f32 1e-05, %v3087_v39  ;;  %v3423_v49 = vadd.f32 %v3422_v50, %v3277_v57 }
 0x796   : > { %v5909_v34 = vpack.c.bf16 %v3421_v62, %v3417_v25 }
 0x797   : > { %6178 = vrsqrt.f32 %v3095_v56  ;;  %v5917_v35 = vpack.c.bf16 %v3423_v49, %v3419_v32 }
 0x799   : > { %5918 = vmatprep.subr.bf16.mxu1 %v5917_v35 }
 0x79a   : > { %5920 = vmatpush3.bf16.msra.mxu1 %v5917_v35 }
 0x79b   : > { %v6173_v63 = vpop.eup %6172 }
 0x79c   : > { %v3100_v10 = vmul.f32 %v6173_v63, %v3088_v40 }
 0x79d   : > { %v6175_v13 = vpop.eup %6174 }
 0x79e   : > { %v3101_v15 = vmul.f32 %v6175_v13, %v3089_v19  ;;  %v3111_v46 = vmul.f32 %v5314_v42, %v3100_v10 }
 0x79f   : > { %v6177_v33 = vpop.eup %6176 }
 0x7a0   : > { %v3102_v24 = vmul.f32 %v6177_v33, %v3090_v43  ;;  %v3112_v26 = vmul.f32 %v5314_v42, %v3101_v15  ;;  %v3122_v53 = vadd.f32 %v5315_v31, %v3111_v46 }
 0x7a1   : > { %v6179_v41 = vpop.eup %6178 }
 0x7a2   : > { %v3103_v8 = vmul.f32 %v6179_v41, %v3091_v16  ;;  %v3123_v17 = vadd.f32 %v5315_v31, %v3112_v26  ;;  %v3113_v44 = vmul.f32 %v5314_v42, %v3102_v24 }
 0x7a4   : > { %v3126_v55 = vpack.c.bf16 %v3123_v17, %v3122_v53  ;;  %v3114_v18 = vmul.f32 %v5314_v42, %v3103_v8  ;;  %v3124_v48 = vadd.f32 %v5315_v31, %v3113_v44 }
 0x7a6   : > { %5741 = vmatprep.mubr.bf16.mxu0 %v3126_v55  ;;  %v3125_v36 = vadd.f32 %v5315_v31, %v3114_v18 }
 0x7a8   : > { %v3127_v30 = vpack.c.bf16 %v3125_v36, %v3124_v48  ;;  %v5343_v48 = vld [vmem:[%s7437_s18] ss:$0 sm:$0xff] }
 0x7aa   : > { %5742 = vmatmul.mubr.bf16.vlgmr.msra.gmra.mrb[16].mxu0 %v3127_v30 }
 0x7ab   : > { %5908 = vmatpush3.bf16.xpose.msra.mxu0 %v5905_v21 }
 0x7ac   : > { %5910 = vmatprep.subr.bf16.mxu0 %v5909_v34 }
 0x87d   : > { %v5743_v28 = vpop.f32.mrb[16].mxu0 }
 0x87e   : > { %v3233_v58 = vpop.f32.mrb[17].mxu0  ;;  %v3242_v46 = vadd.f32 %v5743_v28, %v5316_v37 }
 0x87f   : > { %v3234_v39 = vadd.f32 %v5316_v37, %v3233_v58  ;;  %v5744_v56 = vpop.f32.mrb[18].mxu0 }
 0x880   : > { %v3236_v40 = vpop.f32.mrb[19].mxu0  ;;  %v3245_v31 = vadd.f32 %v5744_v56, %v5316_v37  ;;  %v3435_v24 = vmul.f32 %v3242_v46, %v6550_v0  ;;  %v3437_v41 = vmul.f32 %v3242_v46, %v6556_v2  ;;  %v3439_v53 = vmul.f32 %v3242_v46, %v6562_v4 }
 0x881   : > { %v3237_v63 = vadd.f32 %v5316_v37, %v3236_v40  ;;  %v3427_v42 = vmul.f32 %v3234_v39, %v6550_v0  ;;  %v3429_v10 = vmul.f32 %v3234_v39, %v6556_v2  ;;  %v3431_v43 = vmul.f32 %v3234_v39, %v6562_v4  ;;  %v5344_v40 = vld [vmem:[%s7437_s18 + $0x1] ss:$0 sm:$0xff] }
 0x882   : > { %v3433_v33 = vmul.f32 %v3234_v39, %v6571_v6  ;;  %v3436_v26 = vmul.f32 %v3245_v31, %v6553_v1  ;;  %v3438_v8 = vmul.f32 %v3245_v31, %v6559_v3  ;;  %v3440_v17 = vmul.f32 %v3245_v31, %v6565_v5 }
 0x883   : > { %5749 = vmatprep.mubr.f32.mxu0 %v3427_v42  ;;  %v3428_v19 = vmul.f32 %v3237_v63, %v6553_v1  ;;  %v3430_v13 = vmul.f32 %v3237_v63, %v6559_v3  ;;  %v3432_v15 = vmul.f32 %v3237_v63, %v6565_v5  ;;  %v3434_v16 = vmul.f32 %v3237_v63, %v6574_v7 }
 0x884   : > { %v3441_v44 = vmul.f32 %v3242_v46, %v6571_v6  ;;  %v3442_v55 = vmul.f32 %v3245_v31, %v6574_v7 }
 0x885   : > { %5750 = vmatmul.mubr.f32.vlgmr.msra.gmra.mrb[20].mxu0 %v3428_v19 }
 0x886   : > { %5912 = vmatpush3.bf16.xpose.msra.mxu0 %v5909_v34  ;;  %5752 = vmatprep.mubr.f32.mxu0 %v3429_v10 }
 0x887   : > { %5914 = vmatprep.subr.bf16.mxu0 %v5913_v22 }
 0x889   : > { %5753 = vmatmul.mubr.f32.gmra.mrb[22].mxu0 %v3430_v13 }
 0x88a   : > { %5755 = vmatprep.mubr.f32.mxu0 %v3431_v43 }
 0x88d   : > { %5756 = vmatmul.mubr.f32.gmra.mrb[24].mxu0 %v3432_v15 }
 0x88e   : > { %5758 = vmatprep.mubr.f32.mxu0 %v3433_v33 }
 0x891   : > { %5759 = vmatmul.mubr.f32.gmra.mrb[26].mxu0 %v3434_v16 }
 0x892   : > { %5765 = vmatprep.mubr.f32.mxu0 %v3435_v24 }
 0x895   : > { %5766 = vmatmul.mubr.f32.vlgmr.msra.gmra.mrb[28].mxu0 %v3436_v26 }
 0x896   : > { %5916 = vmatpush3.bf16.msra.mxu0 %v5913_v22  ;;  %5768 = vmatprep.mubr.f32.mxu0 %v3437_v41 }
 0x899   : > { %5769 = vmatmul.mubr.f32.gmra.mrb[30].mxu0 %v3438_v8 }
 0x89a   : > { %5771 = vmatprep.mubr.f32.mxu0 %v3439_v53 }
 0x89d   : > { %5772 = vmatmul.mubr.f32.gmra.mrb[32].mxu0 %v3440_v17 }
 0x89e   : > { %5774 = vmatprep.mubr.f32.mxu0 %v3441_v44 }
 0x8a1   : > { %5775 = vmatmul.mubr.f32.gmra.mrb[34].mxu0 %v3442_v55 }
 0x958   : > { %v5751_v18 = vpop.f32.mrb[20].mxu0 }
 0x959   : > { %v3654_v36 = vmul.f32 0.35355338, %v5751_v18  ;;  %v3509_v30 = vpop.f32.mrb[21].mxu0 }
 0x95a   : > { %v3653_v51 = vmul.f32 0.35355338, %v3509_v30 }
 0x95b   : > { %v7027_v38 = vadd.f32 %v5343_v48, %v3654_v36 }
 0x95c   : > { %v5754_v57 = vpop.f32.mrb[22].mxu0  ;;  %v7029_v59 = vadd.f32 %v5343_v48, %v3653_v51 }
 0x95d   : > { %v3656_v61 = vmul.f32 0.35355338, %v5754_v57  ;;  %v3519_v9 = vpop.f32.mrb[23].mxu0  ;;  %v3700_v54 = vsel %vm2459_vm3, %v7027_v38, -inf }
 0x95e   : > { %v3655_v11 = vmul.f32 0.35355338, %v3519_v9  ;;  %3701 = vmax.xlane.f32.xlu1 %v3700_v54  ;;  %v3697_v12 = vsel %vm2459_vm3, %v7029_v59, -inf }
 0x95f   : > { %3698 = vmax.xlane.f32.xlu0 %v3697_v12  ;;  %v7035_v47 = vadd.f32 %v5343_v48, %v3656_v61 }
 0x960   : > { %v5757_v14 = vpop.f32.mrb[24].mxu0  ;;  %v7037_v21 = vadd.f32 %v5343_v48, %v3655_v11 }
 0x961   : > { %v3658_v22 = vmul.f32 0.35355338, %v5757_v14  ;;  %v3529_v23 = vpop.f32.mrb[25].mxu0  ;;  %v3706_v25 = vsel %vm2459_vm3, %v7035_v47, -inf }
 0x962   : > { %v3657_v29 = vmul.f32 0.35355338, %v3529_v23  ;;  %3707 = vmax.xlane.f32.xlu1 %v3706_v25  ;;  %v3703_v32 = vsel %vm2459_vm3, %v7037_v21, -inf }
 0x963   : > { %3704 = vmax.xlane.f32.xlu0 %v3703_v32  ;;  %v7043_v60 = vadd.f32 %v5343_v48, %v3658_v22 }
 0x964   : > { %v5760_v62 = vpop.f32.mrb[26].mxu0  ;;  %v7045_v50 = vadd.f32 %v5343_v48, %v3657_v29 }
 0x965   : > { %v3660_v49 = vmul.f32 0.35355338, %v5760_v62  ;;  %v3539_v34 = vpop.f32.mrb[27].mxu0  ;;  %v3712_v35 = vsel %vm2459_vm3, %v7043_v60, -inf }
 0x966   : > { %v3659_v37 = vmul.f32 0.35355338, %v3539_v34  ;;  %3713 = vmax.xlane.f32.xlu1 %v3712_v35  ;;  %v3709_v28 = vsel %vm2459_vm3, %v7045_v50, -inf }
 0x967   : > { %3710 = vmax.xlane.f32.xlu0 %v3709_v28  ;;  %v7051_v58 = vadd.f32 %v5343_v48, %v3660_v49 }
 0x968   : > { %v5767_v39 = vpop.f32.mrb[28].mxu0  ;;  %v7053_v56 = vadd.f32 %v5343_v48, %v3659_v37 }
 0x969   : > { %v3662_v63 = vmul.f32 0.35355338, %v5767_v39  ;;  %v3614_v42 = vpop.f32.mrb[29].mxu0  ;;  %v3718_v19 = vsel %vm2459_vm3, %v7051_v58, -inf }
 0x96a   : > { %v3661_v10 = vmul.f32 0.35355338, %v3614_v42  ;;  %3719 = vmax.xlane.f32.xlu1 %v3718_v19  ;;  %v3715_v13 = vsel %vm2459_vm3, %v7053_v56, -inf }
 0x96b   : > { %3716 = vmax.xlane.f32.xlu0 %v3715_v13  ;;  %v7060_v43 = vadd.f32 %v5344_v40, %v3662_v63 }
 0x96c   : > { %v5770_v15 = vpop.f32.mrb[30].mxu0  ;;  %v7062_v46 = vadd.f32 %v5344_v40, %v3661_v10 }
 0x96d   : > { %v3664_v33 = vmul.f32 0.35355338, %v5770_v15  ;;  %v3624_v31 = vpop.f32.mrb[31].mxu0  ;;  %v3724_v16 = vsel %vm2459_vm3, %v7060_v43, -inf }
 0x96e   : > { %v3663_v24 = vmul.f32 0.35355338, %v3624_v31  ;;  %3725 = vmax.xlane.f32.xlu1 %v3724_v16  ;;  %v3721_v26 = vsel %vm2459_vm3, %v7062_v46, -inf }
 0x96f   : > { %3722 = vmax.xlane.f32.xlu0 %v3721_v26  ;;  %v7068_v41 = vadd.f32 %v5344_v40, %v3664_v33 }
 0x970   : > { %v5773_v8 = vpop.f32.mrb[32].mxu0  ;;  %v7070_v53 = vadd.f32 %v5344_v40, %v3663_v24 }
 0x971   : > { %v3666_v17 = vmul.f32 0.35355338, %v5773_v8  ;;  %v3634_v44 = vpop.f32.mrb[33].mxu0  ;;  %v3730_v55 = vsel %vm2459_vm3, %v7068_v41, -inf }
 0x972   : > { %v3665_v18 = vmul.f32 0.35355338, %v3634_v44  ;;  %3731 = vmax.xlane.f32.xlu1 %v3730_v55  ;;  %v3727_v48 = vsel %vm2459_vm3, %v7070_v53, -inf }
 0x973   : > { %3728 = vmax.xlane.f32.xlu0 %v3727_v48  ;;  %v7076_v36 = vadd.f32 %v5344_v40, %v3666_v17 }
 0x974   : > { %v5776_v30 = vpop.f32.mrb[34].mxu0  ;;  %v7078_v51 = vadd.f32 %v5344_v40, %v3665_v18 }
 0x975   : > { %v3668_v57 = vmul.f32 0.35355338, %v5776_v30  ;;  %v3644_v61 = vpop.f32.mrb[35].mxu0  ;;  %v3736_v9 = vsel %vm2459_vm3, %v7076_v36, -inf }
 0x976   : > { %v3667_v54 = vmul.f32 0.35355338, %v3644_v61  ;;  %3737 = vmax.xlane.f32.xlu1 %v3736_v9  ;;  %v3733_v11 = vsel %vm2459_vm3, %v7078_v51, -inf }
 0x977   : > { %3734 = vmax.xlane.f32.xlu0 %v3733_v11  ;;  %v7084_v12 = vadd.f32 %v5344_v40, %v3668_v57 }
 0x978   : > { %v7086_v14 = vadd.f32 %v5344_v40, %v3667_v54 }
 0x979   : > { %v3742_v22 = vsel %vm2459_vm3, %v7084_v12, -inf }
 0x97a   : > { %3743 = vmax.xlane.f32.xlu1 %v3742_v22  ;;  %v3739_v23 = vsel %vm2459_vm3, %v7086_v14, -inf }
 0x97b   : > { %3740 = vmax.xlane.f32.xlu0 %v3739_v23 }
 0x9eb   : > { %v3702_v25 = vpop.xlane.xlu1 %3701 }
 0x9ec   : > { %v3746_v29 = vsub.f32 %v7027_v38, %v3702_v25  ;;  %v3699_v32 = vpop.xlane.xlu0 %3698 }
 0x9ed   : > { %v3745_v62 = vsub.f32 %v7029_v59, %v3699_v32 }
 0x9ee   : > { %v3763_v49 = vmul.f32 1.442695, %v3746_v29 }
 0x9ef   : > { %v3761_v34 = vmul.f32 1.442695, %v3745_v62  ;;  %v3708_v35 = vpop.xlane.xlu1 %3707 }
 0x9f0   : > { %6180 = vpow2.f32 %v3763_v49  ;;  %v3748_v37 = vsub.f32 %v7035_v47, %v3708_v35  ;;  %v3705_v28 = vpop.xlane.xlu0 %3704 }
 0x9f1   : > { %6182 = vpow2.f32 %v3761_v34  ;;  %v3747_v39 = vsub.f32 %v7037_v21, %v3705_v28 }
 0x9f2   : > { %v3767_v40 = vmul.f32 1.442695, %v3748_v37 }
 0x9f3   : > { %v3765_v63 = vmul.f32 1.442695, %v3747_v39  ;;  %v3714_v42 = vpop.xlane.xlu1 %3713 }
 0x9f4   : > { %6184 = vpow2.f32 %v3767_v40  ;;  %v3750_v19 = vsub.f32 %v7043_v60, %v3714_v42  ;;  %v3711_v38 = vpop.xlane.xlu0 %3710 }
 0x9f5   : > { %6186 = vpow2.f32 %v3765_v63  ;;  %v3749_v59 = vsub.f32 %v7045_v50, %v3711_v38 }
 0x9f6   : > { %v3771_v10 = vmul.f32 1.442695, %v3750_v19 }
 0x9f7   : > { %v3769_v13 = vmul.f32 1.442695, %v3749_v59  ;;  %v3720_v15 = vpop.xlane.xlu1 %3719 }
 0x9f8   : > { %6188 = vpow2.f32 %v3771_v10  ;;  %v3752_v47 = vsub.f32 %v7051_v58, %v3720_v15  ;;  %v3717_v33 = vpop.xlane.xlu0 %3716 }
 0x9f9   : > { %6190 = vpow2.f32 %v3769_v13  ;;  %v3751_v21 = vsub.f32 %v7053_v56, %v3717_v33 }
 0x9fa   : > { %v7100_v31 = vpop.eup %6180  ;;  %v3775_v16 = vmul.f32 1.442695, %v3752_v47 }
 0x9fb   : > { %v7102_v24 = vpop.eup %6182  ;;  %v3773_v60 = vmul.f32 1.442695, %v3751_v21  ;;  %v3726_v26 = vpop.xlane.xlu1 %3725  ;;  %v3796_v50 = vsel %vm2459_vm3, %v7100_v31, 0.0 }
 0x9fc   : > { %6192 = vpow2.f32 %v3775_v16  ;;  %v3754_v8 = vsub.f32 %v7060_v43, %v3726_v26  ;;  %v3723_v17 = vpop.xlane.xlu0 %3722  ;;  %3797 = vadd.xlane.f32.xlu1 %v3796_v50  ;;  %v3793_v58 = vsel %vm2459_vm3, %v7102_v24, 0.0 }
 0x9fd   : > { %6194 = vpow2.f32 %v3773_v60  ;;  %v3753_v56 = vsub.f32 %v7062_v46, %v3723_v17  ;;  %3794 = vadd.xlane.f32.xlu0 %v3793_v58 }
 0x9fe   : > { %v7110_v44 = vpop.eup %6184  ;;  %v3779_v55 = vmul.f32 1.442695, %v3754_v8 }
 0x9ff   : > { %v7112_v18 = vpop.eup %6186  ;;  %v3777_v48 = vmul.f32 1.442695, %v3753_v56  ;;  %v3732_v30 = vpop.xlane.xlu1 %3731  ;;  %v3802_v57 = vsel %vm2459_vm3, %v7110_v44, 0.0 }
 0xa00   : > { %6196 = vpow2.f32 %v3779_v55  ;;  %v3756_v43 = vsub.f32 %v7068_v41, %v3732_v30  ;;  %v3729_v61 = vpop.xlane.xlu0 %3728  ;;  %3803 = vadd.xlane.f32.xlu1 %v3802_v57  ;;  %v3799_v9 = vsel %vm2459_vm3, %v7112_v18, 0.0 }
 0xa01   : > { %6198 = vpow2.f32 %v3777_v48  ;;  %v3755_v46 = vsub.f32 %v7070_v53, %v3729_v61  ;;  %3800 = vadd.xlane.f32.xlu0 %v3799_v9 }
 0xa02   : > { %v7120_v54 = vpop.eup %6188  ;;  %v3783_v11 = vmul.f32 1.442695, %v3756_v43 }
 0xa03   : > { %v7122_v22 = vpop.eup %6190  ;;  %v3781_v23 = vmul.f32 1.442695, %v3755_v46  ;;  %v3738_v25 = vpop.xlane.xlu1 %3737  ;;  %v3808_v29 = vsel %vm2459_vm3, %v7120_v54, 0.0 }
 0xa04   : > { %6200 = vpow2.f32 %v3783_v11  ;;  %v3758_v41 = vsub.f32 %v7076_v36, %v3738_v25  ;;  %v3735_v32 = vpop.xlane.xlu0 %3734  ;;  %3809 = vadd.xlane.f32.xlu1 %v3808_v29  ;;  %v3805_v62 = vsel %vm2459_vm3, %v7122_v22, 0.0 }
 0xa05   : > { %6202 = vpow2.f32 %v3781_v23  ;;  %v3757_v53 = vsub.f32 %v7078_v51, %v3735_v32  ;;  %3806 = vadd.xlane.f32.xlu0 %v3805_v62 }
 0xa06   : > { %v7130_v49 = vpop.eup %6192  ;;  %v3787_v34 = vmul.f32 1.442695, %v3758_v41 }
 0xa07   : > { %v7132_v35 = vpop.eup %6194  ;;  %v3785_v37 = vmul.f32 1.442695, %v3757_v53  ;;  %v3744_v28 = vpop.xlane.xlu1 %3743  ;;  %v3814_v39 = vsel %vm2459_vm3, %v7130_v49, 0.0 }
 0xa08   : > { %6204 = vpow2.f32 %v3787_v34  ;;  %v3760_v36 = vsub.f32 %v7084_v12, %v3744_v28  ;;  %3815 = vadd.xlane.f32.xlu1 %v3814_v39  ;;  %v3741_v40 = vpop.xlane.xlu0 %3740  ;;  %v3811_v63 = vsel %vm2459_vm3, %v7132_v35, 0.0 }
 0xa09   : > { %6206 = vpow2.f32 %v3785_v37  ;;  %v3759_v51 = vsub.f32 %v7086_v14, %v3741_v40  ;;  %3812 = vadd.xlane.f32.xlu0 %v3811_v63 }
 0xa0a   : > { %v7140_v42 = vpop.eup %6196  ;;  %v3791_v19 = vmul.f32 1.442695, %v3760_v36 }
 0xa0b   : > { %v7142_v38 = vpop.eup %6198  ;;  %v3789_v59 = vmul.f32 1.442695, %v3759_v51  ;;  %v3820_v10 = vsel %vm2459_vm3, %v7140_v42, 0.0 }
 0xa0c   : > { %6208 = vpow2.f32 %v3791_v19  ;;  %3821 = vadd.xlane.f32.xlu1 %v3820_v10  ;;  %v3817_v12 = vsel %vm2459_vm3, %v7142_v38, 0.0 }
 0xa0d   : > { %6210 = vpow2.f32 %v3789_v59  ;;  %3818 = vadd.xlane.f32.xlu0 %v3817_v12 }
 0xa0e   : > { %v7148_v13 = vpop.eup %6200 }
 0xa0f   : > { %v7150_v14 = vpop.eup %6202  ;;  %v3826_v15 = vsel %vm2459_vm3, %v7148_v13, 0.0 }
 0xa10   : > { %3827 = vadd.xlane.f32.xlu1 %v3826_v15  ;;  %v3823_v47 = vsel %vm2459_vm3, %v7150_v14, 0.0 }
 0xa11   : > { %3824 = vadd.xlane.f32.xlu0 %v3823_v47 }
 0xa12   : > { %v7156_v33 = vpop.eup %6204 }
 0xa13   : > { %v7158_v21 = vpop.eup %6206  ;;  %v3832_v16 = vsel %vm2459_vm3, %v7156_v33, 0.0 }
 0xa14   : > { %3833 = vadd.xlane.f32.xlu1 %v3832_v16  ;;  %v3829_v60 = vsel %vm2459_vm3, %v7158_v21, 0.0 }
 0xa15   : > { %3830 = vadd.xlane.f32.xlu0 %v3829_v60 }
 0xa16   : > { %v7164_v26 = vpop.eup %6208 }
 0xa17   : > { %v7166_v50 = vpop.eup %6210  ;;  %v3838_v8 = vsel %vm2459_vm3, %v7164_v26, 0.0 }
 0xa18   : > { %3839 = vadd.xlane.f32.xlu1 %v3838_v8  ;;  %v3835_v17 = vsel %vm2459_vm3, %v7166_v50, 0.0 }
 0xa19   : > { %3836 = vadd.xlane.f32.xlu0 %v3835_v17 }
 0xa89   : > { %v3798_v58 = vpop.xlane.xlu1 %3797 }
 0xa8a   : > { %6212 = vrcp.f32 %v3798_v58  ;;  %v3795_v56 = vpop.xlane.xlu0 %3794  ;;  %v6078_v58 = vld [vmem:[%s6612_s7 + $0x10] sm:$0xff]  }
 0xa8b   : > { %6214 = vrcp.f32 %v3795_v56  ;;  %v6081_v56 = vld [vmem:[%s6612_s7 + $0x28] sm:$0xff]  }
 0xa8d   : > { %v3804_v55 = vpop.xlane.xlu1 %3803 }
 0xa8e   : > { %6216 = vrcp.f32 %v3804_v55  ;;  %v3801_v48 = vpop.xlane.xlu0 %3800  ;;  %v6082_v55 = vld [vmem:[%s6612_s7 + $0x30] sm:$0xff]  }
 0xa8f   : > { %6218 = vrcp.f32 %v3801_v48  ;;  %v6083_v48 = vld [vmem:[%s6612_s7 + $0x38] sm:$0xff]  }
 0xa91   : > { %v3810_v30 = vpop.xlane.xlu1 %3809 }
 0xa92   : > { %6220 = vrcp.f32 %v3810_v30  ;;  %v3807_v57 = vpop.xlane.xlu0 %3806 }
 0xa93   : > { %6222 = vrcp.f32 %v3807_v57 }
 0xa94   : > { %v6213_v43 = vpop.eup %6212 }
 0xa95   : > { %v6215_v61 = vpop.eup %6214  ;;  %v3816_v9 = vpop.xlane.xlu1 %3815  ;;  %v3858_v23 = vmul.f32 %v6213_v43, %v7100_v31 }
 0xa96   : > { %6224 = vrcp.f32 %v3816_v9  ;;  %v3813_v46 = vpop.xlane.xlu0 %3812  ;;  %v3857_v11 = vmul.f32 %v6215_v61, %v7102_v24 }
 0xa97   : > { %6226 = vrcp.f32 %v3813_v46 }
 0xa98   : > { %v6217_v25 = vpop.eup %6216  ;;  %5781 = vmatprep.mubr.msk.f32.mxu0 %vm2459_vm3, %v3857_v11 }
 0xa99   : > { %v6219_v29 = vpop.eup %6218  ;;  %v3822_v41 = vpop.xlane.xlu1 %3821  ;;  %5782 = vmatmul.mubr.msk.f32.vlgmr.msra.gmra.mrb[36].mxu0 %vm2459_vm3, %v3858_v23  ;;  %v3860_v53 = vmul.f32 %v6217_v25, %v7110_v44 }
 0xa9a   : > { %6228 = vrcp.f32 %v3822_v41  ;;  %v3819_v32 = vpop.xlane.xlu0 %3818  ;;  %v3859_v62 = vmul.f32 %v6219_v29, %v7112_v18 }
 0xa9b   : > { %6230 = vrcp.f32 %v3819_v32 }
 0xa9c   : > { %v6221_v34 = vpop.eup %6220  ;;  %5784 = vmatprep.mubr.msk.f32.mxu0 %vm2459_vm3, %v3859_v62 }
 0xa9d   : > { %v6223_v24 = vpop.eup %6222  ;;  %v3828_v31 = vpop.xlane.xlu1 %3827  ;;  %5785 = vmatmul.mubr.msk.f32.gmra.mrb[38].mxu0 %vm2459_vm3, %v3860_v53  ;;  %v3862_v39 = vmul.f32 %v6221_v34, %v7120_v54 }
 0xa9e   : > { %6232 = vrcp.f32 %v3828_v31  ;;  %v3825_v37 = vpop.xlane.xlu0 %3824  ;;  %v3861_v28 = vmul.f32 %v6223_v24, %v7122_v22 }
 0xa9f   : > { %6234 = vrcp.f32 %v3825_v37 }
 0xaa0   : > { %v6225_v36 = vpop.eup %6224  ;;  %5787 = vmatprep.mubr.msk.f32.mxu0 %vm2459_vm3, %v3861_v28 }
 0xaa1   : > { %v6227_v18 = vpop.eup %6226  ;;  %v3834_v40 = vpop.xlane.xlu1 %3833  ;;  %5788 = vmatmul.mubr.msk.f32.gmra.mrb[40].mxu0 %vm2459_vm3, %v3862_v39  ;;  %v3864_v51 = vmul.f32 %v6225_v36, %v7130_v49 }
 0xaa2   : > { %6236 = vrcp.f32 %v3834_v40  ;;  %v3831_v44 = vpop.xlane.xlu0 %3830  ;;  %v3863_v63 = vmul.f32 %v6227_v18, %v7132_v35 }
 0xaa3   : > { %6238 = vrcp.f32 %v3831_v44 }
 0xaa4   : > { %v6229_v19 = vpop.eup %6228  ;;  %5790 = vmatprep.mubr.msk.f32.mxu0 %vm2459_vm3, %v3863_v63 }
 0xaa5   : > { %v6231_v22 = vpop.eup %6230  ;;  %v3840_v59 = vpop.xlane.xlu1 %3839  ;;  %5791 = vmatmul.mubr.msk.f32.gmra.mrb[42].mxu0 %vm2459_vm3, %v3864_v51  ;;  %v3866_v12 = vmul.f32 %v6229_v19, %v7140_v42 }
 0xaa6   : > { %6240 = vrcp.f32 %v3840_v59  ;;  %v3837_v54 = vpop.xlane.xlu0 %3836  ;;  %v3865_v10 = vmul.f32 %v6231_v22, %v7142_v38 }
 0xaa7   : > { %6242 = vrcp.f32 %v3837_v54 }
 0xaa8   : > { %v6233_v15 = vpop.eup %6232  ;;  %5797 = vmatprep.mubr.msk.f32.mxu1 %vm2459_vm3, %v3865_v10 }
 0xaa9   : > { %v6235_v35 = vpop.eup %6234  ;;  %5798 = vmatmul.mubr.msk.f32.vlgmr.msra.gmra.mrb[40].mxu1 %vm2459_vm3, %v3866_v12  ;;  %v3868_v47 = vmul.f32 %v6233_v15, %v7148_v13 }
 0xaaa   : > { %v3867_v49 = vmul.f32 %v6235_v35, %v7150_v14 }
 0xaac   : > { %v6237_v16 = vpop.eup %6236  ;;  %5800 = vmatprep.mubr.msk.f32.mxu1 %vm2459_vm3, %v3867_v49 }
 0xaad   : > { %v6239_v60 = vpop.eup %6238  ;;  %5801 = vmatmul.mubr.msk.f32.gmra.mrb[42].mxu1 %vm2459_vm3, %v3868_v47  ;;  %v3870_v38 = vmul.f32 %v6237_v16, %v7156_v33  ;;  %v6077_v33 = vld [vmem:[%s6612_s7 + $0x8] sm:$0xff]  }
 0xaae   : > { %v3869_v42 = vmul.f32 %v6239_v60, %v7158_v21  ;;  %v6076_v21 = vld [vmem:[%s6612_s7] sm:$0xff]  }
 0xaaf   : > { %5809 = vmatprep.subr.bf16.mxu0 %v6076_v21 }
 0xab0   : > { %v6241_v8 = vpop.eup %6240  ;;  %5803 = vmatprep.mubr.msk.f32.mxu1 %vm2459_vm3, %v3869_v42  ;;  %5810 = vmatpush3.bf16.msra.mxu0 %v6076_v21 }
 0xab1   : > { %v6243_v14 = vpop.eup %6242  ;;  %5804 = vmatmul.mubr.msk.f32.gmra.mrb[44].mxu1 %vm2459_vm3, %v3870_v38  ;;  %v3872_v17 = vmul.f32 %v6241_v8, %v7164_v26  ;;  %5811 = vmatprep.subr.bf16.mxu0 %v6077_v33  ;;  %v6080_v26 = vld [vmem:[%s6612_s7 + $0x20] sm:$0xff]  }
 0xab2   : > { %v3871_v13 = vmul.f32 %v6243_v14, %v7166_v50  ;;  %v6079_v50 = vld [vmem:[%s6612_s7 + $0x18] sm:$0xff]  }
 0xab4   : > { %5806 = vmatprep.mubr.msk.f32.mxu1 %vm2459_vm3, %v3871_v13  ;;  %5812 = vmatpush3.bf16.msra.mxu0 %v6077_v33  ;;  %v5361_v13 = vld [vmem:[%s1471_s26] ss:$0 sm:$0xff] }
 0xab5   : > { %5807 = vmatmul.mubr.msk.f32.gmra.mrb[46].mxu1 %vm2459_vm3, %v3872_v17  ;;  %5813 = vmatprep.subr.bf16.mxu0 %v6078_v58 }
 0xab8   : > { %5814 = vmatpush3.bf16.msra.mxu0 %v6078_v58 }
 0xab9   : > { %5815 = vmatprep.subr.bf16.mxu0 %v6079_v50 }
 0xabc   : > { %5816 = vmatpush3.bf16.msra.mxu0 %v6079_v50 }
 0xabd   : > { %5817 = vmatprep.subr.bf16.mxu0 %v6080_v26 }
 0xac0   : > { %5818 = vmatpush3.bf16.msra.mxu0 %v6080_v26 }
 0xac1   : > { %5819 = vmatprep.subr.bf16.mxu0 %v6081_v56 }
 0xac4   : > { %5820 = vmatpush3.bf16.msra.mxu0 %v6081_v56 }
 0xac5   : > { %5821 = vmatprep.subr.bf16.mxu0 %v6082_v55 }
 0xac8   : > { %5822 = vmatpush3.bf16.msra.mxu0 %v6082_v55 }
 0xac9   : > { %5823 = vmatprep.subr.bf16.mxu0 %v6083_v48 }
 0xacc   : > { %5824 = vmatpush3.bf16.msra.mxu0 %v6083_v48  ;;  %v6084_v48 = vld [vmem:[%s6621_s16] sm:$0xff]  }
 0xacd   : > { %5829 = vmatprep.subr.bf16.mxu1 %v6084_v48 }
 0xace   : > { %5830 = vmatpush3.bf16.msra.mxu1 %v6084_v48 }
 0xb6c   : > { %v5783_v30 = vpop.f32.mrb[36].mxu0 }
 0xb6d   : > { %v3963_v57 = vpop.f32.mrb[37].mxu0  ;;  %v4132_v61 = vmul.f32 %v5783_v30, %v6553_v1  ;;  %v6085_v30 = vld [vmem:[%s6621_s16 + $0x8] sm:$0xff]  }
 0xb6e   : > { %v4131_v11 = vmul.f32 %v3963_v57, %v6550_v0  ;;  %5831 = vmatprep.subr.bf16.mxu1 %v6085_v30  ;;  %v6086_v57 = vld [vmem:[%s6621_s16 + $0x10] sm:$0xff]  }
 0xb6f   : > { %5832 = vmatpush3.bf16.msra.mxu1 %v6085_v30 }
 0xb70   : > { %v5786_v43 = vpop.f32.mrb[38].mxu0  ;;  %5833 = vmatprep.subr.bf16.mxu1 %v6086_v57 }
 0xb71   : > { %v4134_v9 = vmul.f32 %v5786_v43, %v6559_v3  ;;  %v3973_v46 = vpop.f32.mrb[39].mxu0  ;;  %v6087_v43 = vld [vmem:[%s6621_s16 + $0x18] sm:$0xff]  }
 0xb72   : > { %v4133_v23 = vmul.f32 %v3973_v46, %v6556_v2  ;;  %v6090_v46 = vld [vmem:[%s6621_s16 + $0x30] sm:$0xff]  }
 0xb73   : > { %v4148_v25 = vadd.f32 %v4134_v9, %v4132_v61  ;;  %5834 = vmatpush3.bf16.msra.mxu1 %v6086_v57  ;;  %v6088_v61 = vld [vmem:[%s6621_s16 + $0x20] sm:$0xff]   ;;  %v6089_v9 = vld [vmem:[%s6621_s16 + $0x28] sm:$0xff]  }
 0xb74   : > { %v4147_v29 = vadd.f32 %v4133_v23, %v4131_v11  ;;  %v5789_v41 = vpop.f32.mrb[40].mxu0  ;;  %5835 = vmatprep.subr.bf16.mxu1 %v6087_v43  ;;  %v6091_v11 = vld [vmem:[%s6621_s16 + $0x38] sm:$0xff]  }
 0xb75   : > { %v4136_v32 = vmul.f32 %v5789_v41, %v6565_v5  ;;  %v3983_v62 = vpop.f32.mrb[41].mxu0 }
 0xb76   : > { %v4135_v53 = vmul.f32 %v3983_v62, %v6562_v4 }
 0xb77   : > { %v4152_v34 = vadd.f32 %v4148_v25, %v4136_v32  ;;  %5836 = vmatpush3.bf16.msra.mxu1 %v6087_v43 }
 0xb78   : > { %v4151_v24 = vadd.f32 %v4147_v29, %v4135_v53  ;;  %v5792_v31 = vpop.f32.mrb[42].mxu0  ;;  %5837 = vmatprep.subr.bf16.mxu1 %v6088_v61 }
 0xb79   : > { %v4138_v37 = vmul.f32 %v5792_v31, %v6574_v7  ;;  %v3993_v28 = vpop.f32.mrb[43].mxu0 }
 0xb7a   : > { %v4137_v39 = vmul.f32 %v3993_v28, %v6571_v6 }
 0xb7b   : > { %v4156_v36 = vadd.f32 %v4152_v34, %v4138_v37  ;;  %5838 = vmatpush3.bf16.msra.mxu1 %v6088_v61  ;;  %v6092_v61 = vld [vmem:[%s6626_s2] sm:$0xff]  }
 0xb7c   : > { %v4155_v18 = vadd.f32 %v4151_v24, %v4137_v39  ;;  %v5799_v40 = vpop.f32.mrb[40].mxu1  ;;  %5839 = vmatprep.subr.bf16.mxu1 %v6089_v9  ;;  %5849 = vmatprep.subr.bf16.mxu0 %v6092_v61 }
 0xb7d   : > { %v4092_v44 = vpop.f32.mrb[41].mxu1  ;;  %v4140_v19 = vmul.f32 %v5799_v40, %v6553_v1 }
 0xb7e   : > { %v4159_v63 = vpack.c.bf16 %v4156_v36, %v4155_v18  ;;  %v4139_v54 = vmul.f32 %v4092_v44, %v6550_v0 }
 0xb7f   : > { %5840 = vmatpush3.bf16.msra.mxu1 %v6089_v9  ;;  %v6093_v9 = vld [vmem:[%s6626_s2 + $0x8] sm:$0xff]  }
 0xb80   : > { %v5802_v51 = vpop.f32.mrb[42].mxu1  ;;  %5825 = vmatprep.mubr.bf16.mxu0 %v4159_v63  ;;  %5841 = vmatprep.subr.bf16.mxu1 %v6090_v46 }
 0xb81   : > { %v4142_v22 = vmul.f32 %v5802_v51, %v6559_v3  ;;  %v4102_v59 = vpop.f32.mrb[43].mxu1 }
 0xb82   : > { %v4141_v10 = vmul.f32 %v4102_v59, %v6556_v2 }
 0xb83   : > { %v4150_v12 = vadd.f32 %v4142_v22, %v4140_v19  ;;  %5842 = vmatpush3.bf16.msra.mxu1 %v6090_v46  ;;  %v6094_v46 = vld [vmem:[%s6626_s2 + $0x10] sm:$0xff]  }
 0xb84   : > { %v4149_v15 = vadd.f32 %v4141_v10, %v4139_v54  ;;  %v5805_v35 = vpop.f32.mrb[44].mxu1  ;;  %5843 = vmatprep.subr.bf16.mxu1 %v6091_v11 }
 0xb85   : > { %v4144_v49 = vmul.f32 %v5805_v35, %v6565_v5  ;;  %v4112_v47 = vpop.f32.mrb[45].mxu1 }
 0xb86   : > { %v4143_v16 = vmul.f32 %v4112_v47, %v6562_v4 }
 0xb87   : > { %v4154_v60 = vadd.f32 %v4150_v12, %v4144_v49  ;;  %5844 = vmatpush3.bf16.msra.mxu1 %v6091_v11  ;;  %v6095_v11 = vld [vmem:[%s6626_s2 + $0x18] sm:$0xff]  }
 0xb88   : > { %v4153_v42 = vadd.f32 %v4149_v15, %v4143_v16  ;;  %v5808_v1 = vpop.f32.mrb[46].mxu1 }
 0xb89   : > { %v4146_v3 = vmul.f32 %v5808_v1, %v6574_v7  ;;  %v4122_v38 = vpop.f32.mrb[47].mxu1 }
 0xb8a   : > { %v4145_v0 = vmul.f32 %v4122_v38, %v6571_v6  ;;  %v5370_v38 = vld [vmem:[%s1474_s1] ss:$0 sm:$0xff] }
 0xb8b   : > { %v4158_v8 = vadd.f32 %v4154_v60, %v4146_v3 }
 0xb8c   : > { %v4157_v2 = vadd.f32 %v4153_v42, %v4145_v0 }
 0xb8e   : > { %v4160_v14 = vpack.c.bf16 %v4158_v8, %v4157_v2 }
 0xb90   : > { %5826 = vmatmul.mubr.bf16.vlgmr.msra.gmra.mrb[44].mxu0 %v4160_v14 }
 0xb91   : > { %5850 = vmatpush3.bf16.msra.mxu0 %v6092_v61 }
 0xb92   : > { %5851 = vmatprep.subr.bf16.mxu0 %v6093_v9 }
 0xb95   : > { %5852 = vmatpush3.bf16.msra.mxu0 %v6093_v9 }
 0xb96   : > { %5853 = vmatprep.subr.bf16.mxu0 %v6094_v46 }
 0xb99   : > { %5854 = vmatpush3.bf16.msra.mxu0 %v6094_v46 }
 0xb9a   : > { %5855 = vmatprep.subr.bf16.mxu0 %v6095_v11 }
 0xb9d   : > { %5856 = vmatpush3.bf16.msra.mxu0 %v6095_v11 }
 0xc63   : > { %v5827_v17 = vpop.f32.mrb[44].mxu0 }
 0xc64   : > { %v4275_v21 = vadd.f32 %v5827_v17, %v5361_v13  ;;  %v4266_v5 = vpop.f32.mrb[45].mxu0 }
 0xc65   : > { %v5828_v33 = vpop.f32.mrb[46].mxu0  ;;  %v4267_v58 = vadd.f32 %v5361_v13, %v4266_v5  ;;  %v5371_v5 = vld [vmem:[%s1477_s27] ss:$0 sm:$0xff] }
 0xc66   : > { %v7232_v4 = vadd.f32 %v4275_v21, %v6947_v45  ;;  %v4278_v50 = vadd.f32 %v5828_v33, %v5361_v13  ;;  %v4269_v26 = vpop.f32.mrb[47].mxu0 }
 0xc67   : > { %v4270_v6 = vadd.f32 %v5361_v13, %v4269_v26  ;;  %v7239_v56 = vadd.f32 %v4267_v58, %v6952_v52 }
 0xc68   : > { %v7235_v7 = vadd.f32 %v4278_v50, %v6949_v20  ;;  %4289 = vadd.xlane.f32.xlu0 %v7232_v4  ;;  %v4299_v52 = vmul.f32 %v7232_v4, %v7232_v4 }
 0xc69   : > { %v7243_v55 = vadd.f32 %v4270_v6, %v6955_v27  ;;  %v4297_v45 = vmul.f32 %v7239_v56, %v7239_v56 }
 0xc6a   : > { %4291 = vadd.xlane.f32.xlu1 %v7235_v7  ;;  %v4300_v27 = vmul.f32 %v7235_v7, %v7235_v7 }
 0xc6b   : > { %v4298_v20 = vmul.f32 %v7243_v55, %v7243_v55 }
 0xc6c   : > { %4285 = vadd.xlane.f32.xlu0 %v7239_v56 }
 0xc6e   : > { %4287 = vadd.xlane.f32.xlu1 %v7243_v55 }
 0xc70   : > { %4301 = vadd.xlane.f32.xlu0 %v4297_v45 }
 0xc72   : > { %4303 = vadd.xlane.f32.xlu1 %v4298_v20 }
 0xc74   : > { %4305 = vadd.xlane.f32.xlu0 %v4299_v52 }
 0xc76   : > { %4307 = vadd.xlane.f32.xlu1 %v4300_v27 }
 0xcf5   : > { %v4290_v23 = vpop.xlane.xlu0 %4289 }
 0xcf6   : > { %v4295_v34 = vmul.f32 0.03125, %v4290_v23  ;;  %v6096_v23 = vld [vmem:[%s6626_s2 + $0x20] sm:$0xff]  }
 0xcf7   : > { %v4292_v25 = vpop.xlane.xlu1 %4291  ;;  %5857 = vmatprep.subr.bf16.mxu0 %v6096_v23 }
 0xcf8   : > { %v4296_v37 = vmul.f32 0.03125, %v4292_v25  ;;  %v4315_v44 = vmul.f32 %v4295_v34, %v4295_v34  ;;  %v4327_v14 = vsub.f32 %v7232_v4, %v4295_v34  ;;  %5858 = vmatpush3.bf16.msra.mxu0 %v6096_v23  ;;  %v6097_v25 = vld [vmem:[%s6626_s2 + $0x28] sm:$0xff]  }
 0xcf9   : > { %v4286_v29 = vpop.xlane.xlu0 %4285  ;;  %5859 = vmatprep.subr.bf16.mxu0 %v6097_v25 }
 0xcfa   : > { %v4293_v41 = vmul.f32 0.03125, %v4286_v29  ;;  %v4316_v22 = vmul.f32 %v4296_v37, %v4296_v37  ;;  %v4328_v33 = vsub.f32 %v7235_v7, %v4296_v37  ;;  %v6098_v29 = vld [vmem:[%s6626_s2 + $0x30] sm:$0xff]  }
 0xcfb   : > { %v4288_v32 = vpop.xlane.xlu1 %4287 }
 0xcfc   : > { %v4294_v62 = vmul.f32 0.03125, %v4288_v32  ;;  %v4313_v24 = vmul.f32 %v4293_v41, %v4293_v41  ;;  %v4325_v1 = vsub.f32 %v7239_v56, %v4293_v41  ;;  %5860 = vmatpush3.bf16.msra.mxu0 %v6097_v25  ;;  %v6099_v41 = vld [vmem:[%s6626_s2 + $0x38] sm:$0xff]   ;;  %v5372_v32 = vld [vmem:[%s1485_s12] ss:$0 sm:$0xff] }
 0xcfd   : > { %v4302_v53 = vpop.xlane.xlu0 %4301  ;;  %5861 = vmatprep.subr.bf16.mxu0 %v6098_v29 }
 0xcfe   : > { %v4309_v31 = vmul.f32 0.03125, %v4302_v53  ;;  %v4314_v39 = vmul.f32 %v4294_v62, %v4294_v62  ;;  %v4326_v0 = vsub.f32 %v7243_v55, %v4294_v62 }
 0xcff   : > { %v4304_v28 = vpop.xlane.xlu1 %4303 }
 0xd00   : > { %v4317_v36 = vsub.f32 %v4309_v31, %v4313_v24  ;;  %v4310_v18 = vmul.f32 0.03125, %v4304_v28  ;;  %5862 = vmatpush3.bf16.msra.mxu0 %v6098_v29 }
 0xd01   : > { %v4306_v40 = vpop.xlane.xlu0 %4305  ;;  %5863 = vmatprep.subr.bf16.mxu0 %v6099_v41 }
 0xd02   : > { %v4321_v63 = vmax.f32 %v4317_v36, 0.0  ;;  %v4318_v51 = vsub.f32 %v4310_v18, %v4314_v39  ;;  %v4311_v19 = vmul.f32 0.03125, %v4306_v40 }
 0xd03   : > { %v4308_v59 = vpop.xlane.xlu1 %4307 }
 0xd04   : > { %v4329_v54 = vadd.f32 1e-05, %v4321_v63  ;;  %v4322_v10 = vmax.f32 %v4318_v51, 0.0  ;;  %v4319_v12 = vsub.f32 %v4311_v19, %v4315_v44  ;;  %v4312_v15 = vmul.f32 0.03125, %v4308_v59  ;;  %5864 = vmatpush3.bf16.msra.mxu0 %v6099_v41 }
 0xd06   : > { %6244 = vrsqrt.f32 %v4329_v54  ;;  %v4330_v35 = vadd.f32 1e-05, %v4322_v10  ;;  %v4323_v49 = vmax.f32 %v4319_v12, 0.0  ;;  %v4320_v47 = vsub.f32 %v4312_v15, %v4316_v22 }
 0xd08   : > { %6246 = vrsqrt.f32 %v4330_v35  ;;  %v4331_v16 = vadd.f32 1e-05, %v4323_v49  ;;  %v4324_v60 = vmax.f32 %v4320_v47, 0.0 }
 0xd0a   : > { %6248 = vrsqrt.f32 %v4331_v16  ;;  %v4332_v42 = vadd.f32 1e-05, %v4324_v60 }
 0xd0c   : > { %6250 = vrsqrt.f32 %v4332_v42 }
 0xd10   : > { %v6245_v3 = vpop.eup %6244 }
 0xd11   : > { %v4337_v8 = vmul.f32 %v6245_v3, %v4325_v1 }
 0xd12   : > { %v6247_v2 = vpop.eup %6246 }
 0xd13   : > { %v4338_v13 = vmul.f32 %v6247_v2, %v4326_v0  ;;  %v4348_v17 = vmul.f32 %v5370_v38, %v4337_v8 }
 0xd14   : > { %v6249_v21 = vpop.eup %6248 }
 0xd15   : > { %v4339_v58 = vmul.f32 %v6249_v21, %v4327_v14  ;;  %v4349_v50 = vmul.f32 %v5370_v38, %v4338_v13  ;;  %v4359_v45 = vadd.f32 %v5371_v5, %v4348_v17 }
 0xd16   : > { %v6251_v26 = vpop.eup %6250 }
 0xd17   : > { %v4340_v6 = vmul.f32 %v6251_v26, %v4328_v33  ;;  %v4360_v20 = vadd.f32 %v5371_v5, %v4349_v50  ;;  %v4350_v52 = vmul.f32 %v5370_v38, %v4339_v58 }
 0xd19   : > { %v4363_v27 = vpack.c.bf16 %v4360_v20, %v4359_v45  ;;  %v4351_v48 = vmul.f32 %v5370_v38, %v4340_v6  ;;  %v4361_v30 = vadd.f32 %v5371_v5, %v4350_v52 }
 0xd1b   : > { %5845 = vmatprep.mubr.bf16.mxu1 %v4363_v27  ;;  %v4362_v57 = vadd.f32 %v5371_v5, %v4351_v48  ;;  %v5381_v27 = vld [vmem:[%s1493_s21] ss:$0 sm:$0xff]  ;;  %s7443_s21 = sld [smem:[#allocation33_spill]] }
 0xd1d   : > { %v4364_v43 = vpack.c.bf16 %v4362_v57, %v4361_v30 }
 0xd1f   : > { %5846 = vmatmul.mubr.bf16.vlgmr.msra.gmra.mrb[48].mxu1 %v4364_v43 }
 0xd21   : > { %p5390_p6 = scmp.ne.s32.totalorder %s7443_s21, 1 }
 0xd22   : > { %s7444_s28 = sld [smem:[#allocation30_spill]] (!%p5390_p6)  ;;  %s7445_s1 = sld [smem:[#allocation28_spill]] (!%p5390_p6) }
 0xd23   : > { %s7446_s2 = sld [smem:[#allocation29_spill]] (!%p5390_p6)  ;;  %s7447_s22 = sld [smem:[#allocation31_spill]] (!%p5390_p6) }
 0xd24   : > { %s7448_s3 = sld [smem:[#allocation32_spill]] (!%p5390_p6) }
 0xdf2   : > { %v5847_v62 = vpop.f32.mrb[48].mxu1 }
 0xdf3   : > { %v4479_v53 = vadd.f32 %v5847_v62, %v5372_v32  ;;  %v4470_v34 = vpop.f32.mrb[49].mxu1  ;;  %v6265_v62 = vld [vmem:[%s7444_s28 + $0x8] sm:$0xff] (!%p5390_p6)  }
 0xdf4   : > { %v4471_v24 = vadd.f32 %v5372_v32, %v4470_v34  ;;  %v5848_v31 = vpop.f32.mrb[50].mxu1  ;;  %v6267_v34 = vld [vmem:[%s7444_s28 + $0x18] sm:$0xff] (!%p5390_p6)  }
 0xdf5   : > { %v4487_v37 = vmul.f32 %v4479_v53, %v4479_v53  ;;  %v4482_v28 = vadd.f32 %v5848_v31, %v5372_v32  ;;  %v4473_v39 = vpop.f32.mrb[51].mxu1  ;;  %v6269_v31 = vld [vmem:[%s7444_s28 + $0x28] sm:$0xff] (!%p5390_p6)  }
 0xdf6   : > { %v4485_v36 = vmul.f32 %v4471_v24, %v4471_v24  ;;  %v4474_v18 = vadd.f32 %v5372_v32, %v4473_v39  ;;  %v6264_v32 = vld [vmem:[%s7444_s28] sm:$0xff] (!%p5390_p6)  }
 0xdf7   : > { %v4491_v40 = vmul.f32 %v4487_v37, %v4479_v53  ;;  %v4488_v44 = vmul.f32 %v4482_v28, %v4482_v28  ;;  %5869 = vmatprep.subr.bf16.mxu0 (!%p5390_p6), %v6264_v32  ;;  %v6270_v37 = vld [vmem:[%s7444_s28 + $0x30] sm:$0xff] (!%p5390_p6)  }
 0xdf8   : > { %v4489_v63 = vmul.f32 %v4485_v36, %v4471_v24  ;;  %v4486_v51 = vmul.f32 %v4474_v18, %v4474_v18 }
 0xdf9   : > { %v4495_v19 = vmul.f32 0.044715, %v4491_v40  ;;  %v4492_v22 = vmul.f32 %v4488_v44, %v4482_v28 }
 0xdfa   : > { %v4493_v59 = vmul.f32 0.044715, %v4489_v63  ;;  %v4490_v54 = vmul.f32 %v4486_v51, %v4474_v18 }
 0xdfb   : > { %v4499_v10 = vadd.f32 %v4495_v19, %v4479_v53  ;;  %v4496_v12 = vmul.f32 0.044715, %v4492_v22 }
 0xdfc   : > { %v4497_v15 = vadd.f32 %v4493_v59, %v4471_v24  ;;  %v4494_v35 = vmul.f32 0.044715, %v4490_v54 }
 0xdfd   : > { %v4503_v49 = vmul.f32 0.7978846, %v4499_v10  ;;  %v4500_v47 = vadd.f32 %v4496_v12, %v4482_v28 }
 0xdfe   : > { %v4501_v16 = vmul.f32 0.7978846, %v4497_v15  ;;  %v4498_v60 = vadd.f32 %v4494_v35, %v4474_v18 }
 0xdff   : > { %6252 = vtanh.f32 %v4503_v49  ;;  %v4504_v42 = vmul.f32 0.7978846, %v4500_v47 }
 0xe00   : > { %6254 = vtanh.f32 %v4501_v16  ;;  %v4502_v1 = vmul.f32 0.7978846, %v4498_v60 }
 0xe01   : > { %6256 = vtanh.f32 %v4504_v42 }
 0xe02   : > { %6258 = vtanh.f32 %v4502_v1 }
 0xe09   : > { %v6253_v3 = vpop.eup %6252 }
 0xe0a   : > { %v6255_v38 = vpop.eup %6254  ;;  %v4511_v0 = vadd.f32 1.0, %v6253_v3 }
 0xe0b   : > { %v6257_v8 = vpop.eup %6256  ;;  %v4509_v2 = vadd.f32 1.0, %v6255_v38 }
 0xe0c   : > { %v6259_v14 = vpop.eup %6258  ;;  %v4515_v13 = vmul.f32 0.5, %v4511_v0  ;;  %v4512_v17 = vadd.f32 1.0, %v6257_v8 }
 0xe0d   : > { %v4510_v21 = vadd.f32 1.0, %v6259_v14  ;;  %v4513_v5 = vmul.f32 0.5, %v4509_v2 }
 0xe0e   : > { %v4516_v33 = vmul.f32 0.5, %v4512_v17  ;;  %v4519_v50 = vmul.f32 %v4515_v13, %v4479_v53  ;;  %v6266_v53 = vld [vmem:[%s7444_s28 + $0x10] sm:$0xff] (!%p5390_p6)  }
 0xe0f   : > { %v4514_v58 = vmul.f32 0.5, %v4510_v21  ;;  %v4517_v6 = vmul.f32 %v4513_v5, %v4471_v24  ;;  %v6268_v24 = vld [vmem:[%s7444_s28 + $0x20] sm:$0xff] (!%p5390_p6)  }
 0xe10   : > { %v4520_v26 = vmul.f32 %v4516_v33, %v4482_v28  ;;  %v6271_v28 = vld [vmem:[%s7444_s28 + $0x38] sm:$0xff] (!%p5390_p6)  }
 0xe11   : > { %v4518_v45 = vmul.f32 %v4514_v58, %v4474_v18 }
 0xe12   : > { %v4522_v20 = vpack.c.bf16 %v4520_v26, %v4519_v50 }
 0xe13   : > { %v4521_v52 = vpack.c.bf16 %v4518_v45, %v4517_v6  ;;  %v5391_v6 = vld [vmem:[%s7445_s1] ss:$0 sm:$0xff] (!%p5390_p6) }
 0xe15   : > { %5865 = vmatprep.mubr.bf16.mxu0 %v4521_v52 }
 0xe16   : > { %5866 = vmatmul.mubr.bf16.vlgmr.msra.gmra.mrb[48].mxu0 %v4522_v20 }
 0xe17   : > { %5870 = vmatpush3.bf16.msra.mxu0 (!%p5390_p6), %v6264_v32 }
 0xe18   : > { %5871 = vmatprep.subr.bf16.mxu0 (!%p5390_p6), %v6265_v62 }
 0xe1b   : > { %5872 = vmatpush3.bf16.msra.mxu0 (!%p5390_p6), %v6265_v62  ;;  %v5393_v62 = vld [vmem:[%s7447_s22] ss:$0 sm:$0xff] (!%p5390_p6) }
 0xe1c   : > { %5873 = vmatprep.subr.bf16.mxu0 (!%p5390_p6), %v6266_v53 }
 0xe1f   : > { %5874 = vmatpush3.bf16.msra.mxu0 (!%p5390_p6), %v6266_v53 }
 0xe20   : > { %5875 = vmatprep.subr.bf16.mxu0 (!%p5390_p6), %v6267_v34 }
 0xe23   : > { %5876 = vmatpush3.bf16.msra.mxu0 (!%p5390_p6), %v6267_v34 }
 0xe24   : > { %5877 = vmatprep.subr.bf16.mxu0 (!%p5390_p6), %v6268_v24 }
 0xe27   : > { %5878 = vmatpush3.bf16.msra.mxu0 (!%p5390_p6), %v6268_v24 }
 0xe28   : > { %5879 = vmatprep.subr.bf16.mxu0 (!%p5390_p6), %v6269_v31 }
 0xe2b   : > { %5880 = vmatpush3.bf16.msra.mxu0 (!%p5390_p6), %v6269_v31 }
 0xe2c   : > { %5881 = vmatprep.subr.bf16.mxu0 (!%p5390_p6), %v6270_v37 }
 0xe2f   : > { %5882 = vmatpush3.bf16.msra.mxu0 (!%p5390_p6), %v6270_v37 }
 0xe30   : > { %5883 = vmatprep.subr.bf16.mxu0 (!%p5390_p6), %v6271_v28 }
 0xe33   : > { %5884 = vmatpush3.bf16.msra.mxu0 (!%p5390_p6), %v6271_v28 }
 0xee9   : > { %v5867_v48 = vpop.f32.mrb[48].mxu0 }
 0xeea   : > { %v4637_v30 = vadd.f32 %v5867_v48, %v5381_v27  ;;  %v4628_v57 = vpop.f32.mrb[49].mxu0 }
 0xeeb   : > { %v4629_v43 = vadd.f32 %v5381_v27, %v4628_v57  ;;  %v5868_v61 = vpop.f32.mrb[50].mxu0  ;;  %4654 = sbr.rel (%p5390_p6) target bundleno = 4222 (0x107e), region = 168 }
 0xeec   : > { %v7288_v9 = vadd.f32 %v4637_v30, %v7232_v4  ;;  %v4640_v46 = vadd.f32 %v5868_v61, %v5381_v27  ;;  %v4631_v11 = vpop.f32.mrb[51].mxu0 }
 0xeed   : > { %v7291_v23 = vadd.f32 %v4629_v43, %v7239_v56  ;;  %v4632_v25 = vadd.f32 %v5381_v27, %v4631_v11  ;;  %v5392_v27 = vld [vmem:[%s7446_s2] ss:$0 sm:$0xff] (!%p5390_p6) }
 0xeee   : > { %4649 = vst [vmem:[#allocation2 + $0x10] sm:$0xff] %v7288_v9  ;;  %v7295_v29 = vadd.f32 %v4640_v46, %v7235_v7  ;;  %4659 = vadd.xlane.f32.xlu1 (!%p5390_p6), %v7288_v9 }
 0xeef   : > { %4647 = vst [vmem:[#allocation2] sm:$0xff] %v7291_v23  ;;  %v7299_v41 = vadd.f32 %v4632_v25, %v7243_v55  ;;  %4655 = vadd.xlane.f32.xlu0 (!%p5390_p6), %v7291_v23  ;;  %v4667_v7 = vmul.f32 (!%p5390_p6), %v7291_v23, %v7291_v23  ;;  %v4669_v55 = vmul.f32 (!%p5390_p6), %v7288_v9, %v7288_v9 }
 0xef0   : > { %4650 = vst [vmem:[#allocation2 + $0x18] sm:$0xff] %v7295_v29  ;;  %v4670_v56 = vmul.f32 (!%p5390_p6), %v7295_v29, %v7295_v29 }
 0xef1   : > { %4648 = vst [vmem:[#allocation2 + $0x8] sm:$0xff] %v7299_v41  ;;  %v4668_v4 = vmul.f32 (!%p5390_p6), %v7299_v41, %v7299_v41 }
 0xef2   : > { %4661 = vadd.xlane.f32.xlu1 %v7295_v29 }
 0xef3   : > { %4657 = vadd.xlane.f32.xlu0 %v7299_v41 }
 0xef6   : > { %4673 = vadd.xlane.f32.xlu1 %v4668_v4 }
 0xef7   : > { %4671 = vadd.xlane.f32.xlu0 %v4667_v7 }
 0xefa   : > { %4677 = vadd.xlane.f32.xlu1 %v4670_v56 }
 0xefb   : > { %4675 = vadd.xlane.f32.xlu0 %v4669_v55 }
 0xf7b   : > { %v4660_v39 = vpop.xlane.xlu1 %4659 }
 0xf7c   : > { %v4656_v36 = vpop.xlane.xlu0 %4655  ;;  %v4665_v51 = vmul.f32 0.03125, %v4660_v39 }
 0xf7d   : > { %v4663_v44 = vmul.f32 0.03125, %v4656_v36 }
 0xf7e   : > { %v4685_v47 = vmul.f32 %v4665_v51, %v4665_v51  ;;  %v4697_v43 = vsub.f32 %v7288_v9, %v4665_v51 }
 0xf7f   : > { %v4662_v18 = vpop.xlane.xlu1 %4661  ;;  %v4683_v54 = vmul.f32 %v4663_v44, %v4663_v44  ;;  %v4695_v26 = vsub.f32 %v7291_v23, %v4663_v44 }
 0xf80   : > { %v4658_v40 = vpop.xlane.xlu0 %4657  ;;  %v4666_v19 = vmul.f32 0.03125, %v4662_v18 }
 0xf81   : > { %v4664_v63 = vmul.f32 0.03125, %v4658_v40 }
 0xf82   : > { %v4686_v16 = vmul.f32 %v4666_v19, %v4666_v19  ;;  %v4698_v48 = vsub.f32 %v7295_v29, %v4666_v19 }
 0xf83   : > { %v4674_v22 = vpop.xlane.xlu1 %4673  ;;  %v4684_v10 = vmul.f32 %v4664_v63, %v4664_v63  ;;  %v4696_v58 = vsub.f32 %v7299_v41, %v4664_v63 }
 0xf84   : > { %v4672_v59 = vpop.xlane.xlu0 %4671  ;;  %v4680_v12 = vmul.f32 0.03125, %v4674_v22 }
 0xf85   : > { %v4679_v15 = vmul.f32 0.03125, %v4672_v59 }
 0xf86   : > { %v4688_v35 = vsub.f32 %v4680_v12, %v4684_v10 }
 0xf87   : > { %v4687_v49 = vsub.f32 %v4679_v15, %v4683_v54  ;;  %v4678_v60 = vpop.xlane.xlu1 %4677 }
 0xf88   : > { %v4676_v42 = vpop.xlane.xlu0 %4675  ;;  %v4692_v1 = vmax.f32 %v4688_v35, 0.0  ;;  %v4682_v38 = vmul.f32 0.03125, %v4678_v60 }
 0xf89   : > { %v4691_v3 = vmax.f32 %v4687_v49, 0.0  ;;  %v4681_v0 = vmul.f32 0.03125, %v4676_v42 }
 0xf8a   : > { %v4700_v8 = vadd.f32 1e-05, %v4692_v1  ;;  %v4690_v14 = vsub.f32 %v4682_v38, %v4686_v16 }
 0xf8b   : > { %v4699_v2 = vadd.f32 1e-05, %v4691_v3  ;;  %v4689_v13 = vsub.f32 %v4681_v0, %v4685_v47 }
 0xf8c   : > { %6272 = vrsqrt.f32 %v4700_v8  ;;  %v4694_v17 = vmax.f32 %v4690_v14, 0.0 }
 0xf8d   : > { %v4693_v21 = vmax.f32 %v4689_v13, 0.0  ;;  %6274 = vrsqrt.f32 %v4699_v2 }
 0xf8e   : > { %v4702_v5 = vadd.f32 1e-05, %v4694_v17 }
 0xf8f   : > { %v4701_v33 = vadd.f32 1e-05, %v4693_v21 }
 0xf90   : > { %6276 = vrsqrt.f32 %v4702_v5 }
 0xf91   : > { %6278 = vrsqrt.f32 %v4701_v33 }
 0xf96   : > { %v6273_v50 = vpop.eup %6272 }
 0xf97   : > { %v6275_v45 = vpop.eup %6274  ;;  %v4708_v20 = vmul.f32 %v6273_v50, %v4696_v58 }
 0xf98   : > { %v4707_v52 = vmul.f32 %v6275_v45, %v4695_v26 }
 0xf99   : > { %v4719_v30 = vmul.f32 %v5391_v6, %v4708_v20 }
 0xf9a   : > { %v6277_v57 = vpop.eup %6276  ;;  %v4718_v61 = vmul.f32 %v5391_v6, %v4707_v52 }
 0xf9b   : > { %v6279_v46 = vpop.eup %6278  ;;  %v4730_v11 = vadd.f32 %v5392_v27, %v4719_v30  ;;  %v4710_v25 = vmul.f32 %v6277_v57, %v4698_v48 }
 0xf9c   : > { %v4729_v41 = vadd.f32 %v5392_v27, %v4718_v61  ;;  %v4709_v4 = vmul.f32 %v6279_v46, %v4697_v43 }
 0xf9d   : > { %v4721_v23 = vmul.f32 %v5391_v6, %v4710_v25 }
 0xf9e   : > { %v4733_v7 = vpack.c.bf16 %v4730_v11, %v4729_v41  ;;  %v4720_v56 = vmul.f32 %v5391_v6, %v4709_v4 }
 0xf9f   : > { %v4732_v55 = vadd.f32 %v5392_v27, %v4721_v23 }
 0xfa0   : > { %5885 = vmatprep.mubr.bf16.mxu0 %v4733_v7  ;;  %v4731_v29 = vadd.f32 %v5392_v27, %v4720_v56 }
 0xfa2   : > { %v4734_v32 = vpack.c.bf16 %v4732_v55, %v4731_v29 }
 0xfa4   : > { %5886 = vmatmul.mubr.bf16.vlgmr.msra.gmra.mrb[0].mxu0 %v4734_v32 }
0x1077   : > { %v5887_v9 = vpop.f32.mrb[0].mxu0 }
0x1078   : > { %v4849_v53 = vadd.f32 %v5887_v9, %v5393_v62  ;;  %v4840_v34 = vpop.f32.mrb[1].mxu0 }
0x1079   : > { %v4841_v24 = vadd.f32 %v5393_v62, %v4840_v34  ;;  %v5888_v31 = vpop.f32.mrb[2].mxu0 }
0x107a   : > { %4857 = vst [vmem:[%s7448_s3 + $0x10] sm:$0xff] %v4849_v53  ;;  %v4852_v37 = vadd.f32 %v5888_v31, %v5393_v62  ;;  %v4843_v28 = vpop.f32.mrb[3].mxu0 }
0x107b   : > { %4855 = vst [vmem:[%s7448_s3] sm:$0xff] %v4841_v24  ;;  %v4844_v39 = vadd.f32 %v5393_v62, %v4843_v28 }
0x107c   : > { %4858 = vst [vmem:[%s7448_s3 + $0x18] sm:$0xff] %v4852_v37 }
0x107d   : > { %4856 = vst [vmem:[%s7448_s3 + $0x8] sm:$0xff] %v4844_v39 }
0x107e PF: > { %s7449_s23 = sld [smem:[#allocation35_spill]]  ;;  %s7450_s22 = sld [smem:[#allocation34_spill]] }
0x1084   : > { %s81_s26 = sadd.s32 1, %s7449_s23   ;;  %s7451_s23 = sld [smem:[#allocation36_spill]] }
0x1085   : > { %p78_p7 = scmp.ge.s32.totalorder %s81_s26, 4  }
0x1087   :  { %80 = sbr.rel (!%p78_p7) target bundleno = 72 (0x48), region = 305 }

</bundles_post_ra>
